<compile_context>
chip_gen: v6e
topology: v6e:2x2x1
jax: 0.10.0
libtpu: 0.0.40
codegen_flags: <defaults>
</compile_context>

<pallas_src>
import math
from functools import partial

import jax
import jax.numpy as jnp
from jax import lax
from jax.experimental import pallas as pl
from jax.experimental.pallas import tpu as pltpu


# ----------------------------- in-kernel helpers -----------------------------

def _relu(x):
    return jnp.maximum(x, 0.0)


def _softmax(x, axis, approx=False):
    m = jnp.max(x, axis=axis, keepdims=True)
    e = jnp.exp(x - m)
    s = jnp.sum(e, axis=axis, keepdims=True)
    if approx:
        return e * pl.reciprocal(s, approx=True)      # EUP slot, not VALU divide
    return e / s


def _layernorm(x, gamma, beta, eps=1e-5):
    mu = jnp.mean(x, axis=-1, keepdims=True)
    var = jnp.mean((x - mu) ** 2, axis=-1, keepdims=True)
    return (x - mu) * lax.rsqrt(var + eps) * gamma + beta


def _mlp(x, wi_ref, bi_ref, wh_ref, bh_ref, wo_ref, bo_ref, n_layer):
    """Residual MLP: relu(in) -> n_layer residual hidden -> linear out (2-D tiles)."""
    r = _relu(jnp.dot(x, wi_ref[...], preferred_element_type=jnp.float32) + bi_ref[...])
    for i in range(n_layer):
        h = jnp.dot(r, wh_ref[i], preferred_element_type=jnp.float32) + bh_ref[i]
        r = r + _relu(h)
    return jnp.dot(r, wo_ref[...], preferred_element_type=jnp.float32) + bo_ref[...]


# ------------------------------ fused LNO kernel ------------------------------

def _lno_kernel(*refs, n_layer, n_block, n_head, n_seq, b_chunk):
    (x_ref, y_ref,
     t_wi, t_bi, t_wh, t_bh, t_wo, t_bo,          # trunk projector MLP
     r_wi, r_bi, r_wh, r_bh, r_wo, r_bo,          # branch projector MLP
     p_wi, p_bi, p_wh, p_bh, p_wo, p_bo,          # attention projector MLP
     o_wi, o_bi, o_wh, o_bh, o_wo, o_bo,          # out MLP (lane-padded last layer)
     g1_r, be1_r, wqkv_r, bqkv_r, wp_r, bp_r,     # stacked block params (n_block, ...)
     g2_r, be2_r, w1_r, b1_r, w2_r, b2_r,
     out_ref) = refs

    N = n_seq
    H = n_head
    D = g1_r.shape[-1]
    dh = D // H
    scale = 1.0 / math.sqrt(dh)

    # ---- front-end MLPs on the full (b_chunk*N, feat) tile ----
    xf = _mlp(x_ref[...], t_wi, t_bi, t_wh, t_bh, t_wo, t_bo, n_layer)     # (Bc*N, D)
    yf = _mlp(y_ref[...], r_wi, r_bi, r_wh, r_bh, r_wo, r_bo, n_layer)     # (Bc*N, D)
    score = _mlp(xf, p_wi, p_bi, p_wh, p_bh, p_wo, p_bo, n_layer)          # (Bc*N, Mm)

    # ---- per batch element: encode -> attention blocks -> decode ----
    r_rows = []
    for bc in range(b_chunk):
        rows = slice(bc * N, (bc + 1) * N)                                  # static row slice
        sc = score[rows]                                                    # (N, Mm)
        yb = yf[rows]                                                       # (N, D)

        se_t = jnp.transpose(_softmax(sc, axis=0))                          # (Mm, N)
        sd = _softmax(sc, axis=-1)                                          # (N, Mm)

        # encode: canonical matmul (lhs-last vs rhs-second-to-last contraction)
        z = jnp.dot(se_t, yb, preferred_element_type=jnp.float32)           # (Mm, D)

        for blk in range(n_block):
            h = _layernorm(z, g1_r[blk], be1_r[blk])                        # (Mm, D)

            # fused QKV projection: ONE (Mm, D) @ (D, 3D) matmul
            qkv = jnp.dot(h, wqkv_r[blk],
                          preferred_element_type=jnp.float32) + bqkv_r[blk]  # (Mm, 3D)
            q = qkv[:, :D]
            k = qkv[:, D:2 * D]
            v = qkv[:, 2 * D:]

            # vanilla attention per head (static loop, tiny 2-D matmuls)
            o_cols = []
            for hh in range(H):
                cs = slice(hh * dh, (hh + 1) * dh)
                att = lax.dot_general(q[:, cs], k[:, cs],
                                      (((1,), (1,)), ((), ())),
                                      preferred_element_type=jnp.float32) * scale
                att = _softmax(att, axis=-1, approx=True)
                o_cols.append(jnp.dot(att, v[:, cs],
                                      preferred_element_type=jnp.float32))   # (Mm, dh)
            # head-major concat -> ONE K=D output-projection matmul (no per-head proj+sum)
            o = jnp.concatenate(o_cols, axis=-1)                             # (Mm, D)
            y1 = z + jnp.dot(o, wp_r[blk],
                             preferred_element_type=jnp.float32) + bp_r[blk]

            # feed-forward sub-block
            h2 = _layernorm(y1, g2_r[blk], be2_r[blk])
            m = _relu(jnp.dot(h2, w1_r[blk],
                              preferred_element_type=jnp.float32) + b1_r[blk])
            m = jnp.dot(m, w2_r[blk], preferred_element_type=jnp.float32) + b2_r[blk]
            z = y1 + m

        # decode
        r_rows.append(jnp.dot(sd, z, preferred_element_type=jnp.float32))    # (N, D)

    r_all = jnp.concatenate(r_rows, axis=0) if b_chunk > 1 else r_rows[0]    # (Bc*N, D)

    # ---- out MLP on the full tile (last layer lane-padded to a 128 multiple) ----
    out_ref[...] = _mlp(r_all, o_wi, o_bi, o_wh, o_bh, o_wo, o_bo, n_layer)  # (Bc*N, P)


# ------------------------------- LNO forward ----------------------------------

def lno_forward(params, x, y, *, n_layer, n_head):
    B, N, x_dim = x.shape
    y1_dim = y.shape[-1]
    n_dim = params['trunk'][4].shape[0]
    blocks = params['blocks']
    n_block = len(blocks)

    # --- fused QKV weights per block: Wqkv (D, 3D), bqkv (1, 3D) ---
    wqkv_s = jnp.stack([jnp.concatenate([b['wq'], b['wk'], b['wv']], axis=1) for b in blocks])
    bqkv_s = jnp.stack([jnp.concatenate([b['bq'], b['bk'], b['bv']], axis=1) for b in blocks])

    def stk(name):
        return jnp.stack([b[name] for b in blocks], axis=0)

    g1_s, be1_s = stk('g1'), stk('be1')
    g2_s, be2_s = stk('g2'), stk('be2')
    wp_s, bp_s = stk('wp'), stk('bp')
    w1_s, b1_s = stk('w1'), stk('b1')
    w2_s, b2_s = stk('w2'), stk('b2')

    # --- lane-dense output: pad the out MLP's last layer to a 128 multiple ---
    o_wi, o_bi, o_wh, o_bh, o_wo, o_bo = params['out']
    y2_dim = o_wo.shape[1]
    P = ((y2_dim + 127) // 128) * 128
    o_wo_p = jnp.zeros((n_dim, P), jnp.float32).at[:, :y2_dim].set(o_wo)
    o_bo_p = jnp.zeros((1, P), jnp.float32).at[:, :y2_dim].set(o_bo)

    w_args = (list(params['trunk']) + list(params['branch']) + list(params['attn_proj'])
              + [o_wi, o_bi, o_wh, o_bh, o_wo_p, o_bo_p]
              + [g1_s, be1_s, wqkv_s, bqkv_s, wp_s, bp_s,
                 g2_s, be2_s, w1_s, b1_s, w2_s, b2_s])

    # --- batch chunking: amortize per-grid-step overhead while keeping grid >= 2
    #     (v7x has 2 TensorCores; collapsing the grid to 1 step would serialize).
    b_chunk = 1
    for c in range(1, min(B, 8) + 1):
        if B % c == 0 and B // c >= 2:
            b_chunk = c
    if (b_chunk * N) % 8 != 0 and B // b_chunk > 1:
        b_chunk = B                         # full-extent block is always layout-legal
    grid = B // b_chunk
    rows = b_chunk * N

    x2 = x.reshape(B * N, x_dim)
    y2 = y.reshape(B * N, y1_dim)

    in_specs = [pl.BlockSpec((rows, x_dim), lambda b: (b, 0)),
                pl.BlockSpec((rows, y1_dim), lambda b: (b, 0))]
    for w in w_args:
        # whole weight resident per step; fine at these sizes.  For scaled configs:
        # stream the block-weight stack over an "arbitrary" grid axis and
        # single-buffer the constant weights to save VMEM (esp. v7x's 64 MiB).
        in_specs.append(pl.BlockSpec(w.shape, lambda b, nd=w.ndim: (0,) * nd))

    out_flat = pl.pallas_call(
        partial(_lno_kernel, n_layer=n_layer, n_block=n_block, n_head=n_head,
                n_seq=N, b_chunk=b_chunk),
        grid=(grid,),
        in_specs=in_specs,
        out_specs=pl.BlockSpec((rows, P), lambda b: (b, 0)),
        out_shape=jax.ShapeDtypeStruct((B * N, P), jnp.float32),
        compiler_params=pltpu.CompilerParams(
            dimension_semantics=("parallel",),          # shards across TCs on v7x
            vmem_limit_bytes=32 * 1024 * 1024),
    )(x2, y2, *w_args)

    return out_flat[:, :y2_dim].reshape(B, N, y2_dim)


# --------------------------- parameter construction ---------------------------

def init_linear(key, d_in, d_out, scale=0.1):
    kw, kb = jax.random.split(key)
    return (scale * jax.random.normal(kw, (d_in, d_out), jnp.float32),
            scale * jax.random.normal(kb, (1, d_out), jnp.float32))


def init_mlp(key, d_in, d_hid, d_out, n_layer, scale=0.1):
    keys = jax.random.split(key, n_layer + 2)
    w_in, b_in = init_linear(keys[0], d_in, d_hid, scale)
    w_h, b_h = [], []
    for i in range(n_layer):
        w, b = init_linear(keys[1 + i], d_hid, d_hid, scale)
        w_h.append(w)
        b_h.append(b)
    w_hid = jnp.stack(w_h)                    # (n_layer, d_hid, d_hid)
    b_hid = jnp.stack(b_h)                    # (n_layer, 1, d_hid)
    w_out, b_out = init_linear(keys[-1], d_hid, d_out, scale)
    return (w_in, b_in, w_hid, b_hid, w_out, b_out)


def init_attn_block(key, n_dim, scale=0.1):
    ks = jax.random.split(key, 6)
    wq, bq = init_linear(ks[0], n_dim, n_dim, scale)
    wk, bk = init_linear(ks[1], n_dim, n_dim, scale)
    wv, bv = init_linear(ks[2], n_dim, n_dim, scale)
    wp, bp = init_linear(ks[3], n_dim, n_dim, scale)
    w1, b1 = init_linear(ks[4], n_dim, 2 * n_dim, scale)
    w2, b2 = init_linear(ks[5], 2 * n_dim, n_dim, scale)
    return dict(wq=wq, bq=bq, wk=wk, bk=bk, wv=wv, bv=bv, wp=wp, bp=bp,
                w1=w1, b1=b1, w2=w2, b2=b2,
                g1=jnp.ones((1, n_dim), jnp.float32),
                be1=jnp.zeros((1, n_dim), jnp.float32),
                g2=jnp.ones((1, n_dim), jnp.float32),
                be2=jnp.zeros((1, n_dim), jnp.float32))


# --------------------------- pure-JAX reference (check) ------------------------

def _mlp_ref(x, p, n_layer):
    w_in, b_in, w_hid, b_hid, w_out, b_out = p
    r = jax.nn.relu(x @ w_in + b_in[0])
    for i in range(n_layer):
        r = r + jax.nn.relu(r @ w_hid[i] + b_hid[i, 0])
    return r @ w_out + b_out[0]


def _ln_ref(x, g, b, eps=1e-5):
    mu = x.mean(-1, keepdims=True)
    var = ((x - mu) ** 2).mean(-1, keepdims=True)
    return (x - mu) / jnp.sqrt(var + eps) * g[0] + b[0]


def _block_ref(z, p, n_head):
    B, M, D = z.shape
    dh = D // n_head
    h = _ln_ref(z, p['g1'], p['be1'])
    q = (h @ p['wq'] + p['bq'][0]).reshape(B, M, n_head, dh).transpose(0, 2, 1, 3)
    k = (h @ p['wk'] + p['bk'][0]).reshape(B, M, n_head, dh).transpose(0, 2, 1, 3)
    v = (h @ p['wv'] + p['bv'][0]).reshape(B, M, n_head, dh).transpose(0, 2, 1, 3)
    att = jax.nn.softmax(jnp.einsum('bhic,bhjc->bhij', q, k) / math.sqrt(dh), axis=-1)
    r = jnp.einsum('bhij,bhjc->bhic', att, v).transpose(0, 2, 1, 3).reshape(B, M, D)
    y1 = z + (r @ p['wp'] + p['bp'][0])
    h2 = _ln_ref(y1, p['g2'], p['be2'])
    m = jax.nn.relu(h2 @ p['w1'] + p['b1'][0]) @ p['w2'] + p['b2'][0]
    return y1 + m


def _lno_ref(params, x, y, n_layer, n_head):
    xf = _mlp_ref(x, params['trunk'], n_layer)
    yf = _mlp_ref(y, params['branch'], n_layer)
    score = _mlp_ref(xf, params['attn_proj'], n_layer)
    se = jax.nn.softmax(score, axis=1)
    sd = jax.nn.softmax(score, axis=-1)
    z = jnp.einsum('bij,bic->bjc', se, yf)
    for bp in params['blocks']:
        z = _block_ref(z, bp, n_head)
    r = jnp.einsum('bij,bjc->bic', sd, z)
    return _mlp_ref(r, params['out'], n_layer)


# ----------------------------------- main --------------------------------------

if __name__ == "__main__":
    B, N = 2, 16
    x_dim, y1_dim, y2_dim = 2, 3, 1
    n_dim, n_mode, n_head = 32, 8, 4
    n_layer, n_block = 2, 2

    key = jax.random.PRNGKey(0)
    k_x, k_y, k_p = jax.random.split(key, 3)
    x = jax.random.normal(k_x, (B, N, x_dim), jnp.float32)
    y = jax.random.normal(k_y, (B, N, y1_dim), jnp.float32)

    pk = jax.random.split(k_p, 4 + n_block)
    params = dict(
        trunk=init_mlp(pk[0], x_dim, n_dim, n_dim, n_layer),
        branch=init_mlp(pk[1], y1_dim, n_dim, n_dim, n_layer),
        attn_proj=init_mlp(pk[2], n_dim, n_dim, n_mode, n_layer),
        out=init_mlp(pk[3], n_dim, n_dim, y2_dim, n_layer),
        blocks=[init_attn_block(pk[4 + i], n_dim) for i in range(n_block)],
    )

    out = lno_forward(params, x, y, n_layer=n_layer, n_head=n_head)
    out = jax.block_until_ready(out)
    assert out.shape == (B, N, y2_dim)

    ref = _lno_ref(params, x, y, n_layer, n_head)
    err = float(jnp.max(jnp.abs(out - ref)))
    # f32 matmuls everywhere; encode/decode softmax use an exact divide, only the
    # attention softmax uses pl.reciprocal(approx=True) (~1e-4 relative on the EUP).
    if not err < 5e-3:
        raise AssertionError(f"mismatch vs pure-JAX reference: max|diff|={err}")

    print("KERNEL_OK")
</pallas_src>

<mosaic_0001>
module attributes {stable_mosaic.version = 11 : i64} {
  func.func @_lno_kernel(%arg0: i32, %arg1: memref<16x2xf32, #tpu.memory_space<vmem>>, %arg2: memref<16x3xf32, #tpu.memory_space<vmem>>, %arg3: memref<2x32xf32, #tpu.memory_space<vmem>>, %arg4: memref<1x32xf32, #tpu.memory_space<vmem>>, %arg5: memref<2x32x32xf32, #tpu.memory_space<vmem>>, %arg6: memref<2x1x32xf32, #tpu.memory_space<vmem>>, %arg7: memref<32x32xf32, #tpu.memory_space<vmem>>, %arg8: memref<1x32xf32, #tpu.memory_space<vmem>>, %arg9: memref<3x32xf32, #tpu.memory_space<vmem>>, %arg10: memref<1x32xf32, #tpu.memory_space<vmem>>, %arg11: memref<2x32x32xf32, #tpu.memory_space<vmem>>, %arg12: memref<2x1x32xf32, #tpu.memory_space<vmem>>, %arg13: memref<32x32xf32, #tpu.memory_space<vmem>>, %arg14: memref<1x32xf32, #tpu.memory_space<vmem>>, %arg15: memref<32x32xf32, #tpu.memory_space<vmem>>, %arg16: memref<1x32xf32, #tpu.memory_space<vmem>>, %arg17: memref<2x32x32xf32, #tpu.memory_space<vmem>>, %arg18: memref<2x1x32xf32, #tpu.memory_space<vmem>>, %arg19: memref<32x8xf32, #tpu.memory_space<vmem>>, %arg20: memref<1x8xf32, #tpu.memory_space<vmem>>, %arg21: memref<32x32xf32, #tpu.memory_space<vmem>>, %arg22: memref<1x32xf32, #tpu.memory_space<vmem>>, %arg23: memref<2x32x32xf32, #tpu.memory_space<vmem>>, %arg24: memref<2x1x32xf32, #tpu.memory_space<vmem>>, %arg25: memref<32x128xf32, #tpu.memory_space<vmem>>, %arg26: memref<1x128xf32, #tpu.memory_space<vmem>>, %arg27: memref<2x1x32xf32, #tpu.memory_space<vmem>>, %arg28: memref<2x1x32xf32, #tpu.memory_space<vmem>>, %arg29: memref<2x32x96xf32, #tpu.memory_space<vmem>>, %arg30: memref<2x1x96xf32, #tpu.memory_space<vmem>>, %arg31: memref<2x32x32xf32, #tpu.memory_space<vmem>>, %arg32: memref<2x1x32xf32, #tpu.memory_space<vmem>>, %arg33: memref<2x1x32xf32, #tpu.memory_space<vmem>>, %arg34: memref<2x1x32xf32, #tpu.memory_space<vmem>>, %arg35: memref<2x32x64xf32, #tpu.memory_space<vmem>>, %arg36: memref<2x1x64xf32, #tpu.memory_space<vmem>>, %arg37: memref<2x64x32xf32, #tpu.memory_space<vmem>>, %arg38: memref<2x1x32xf32, #tpu.memory_space<vmem>>, %arg39: memref<16x128xf32, #tpu.memory_space<vmem>>) attributes {dimension_semantics = [#tpu.dimension_semantics<parallel>], iteration_bounds = array<i64: 2>, scalar_prefetch = 0 : i64, scratch_operands = 0 : i64, tpu.core_type = #tpu.core_type<tc>, window_params = [{transform_indices = @transform_0, window_bounds = array<i64: 16, 2>}, {transform_indices = @transform_1, window_bounds = array<i64: 16, 3>}, {pipeline_mode = #tpu.pipeline_mode<synchronous>, transform_indices = @transform_2, window_bounds = array<i64: 2, 32>}, {pipeline_mode = #tpu.pipeline_mode<synchronous>, transform_indices = @transform_3, window_bounds = array<i64: 1, 32>}, {pipeline_mode = #tpu.pipeline_mode<synchronous>, transform_indices = @transform_4, window_bounds = array<i64: 2, 32, 32>}, {pipeline_mode = #tpu.pipeline_mode<synchronous>, transform_indices = @transform_5, window_bounds = array<i64: 2, 1, 32>}, {pipeline_mode = #tpu.pipeline_mode<synchronous>, transform_indices = @transform_6, window_bounds = array<i64: 32, 32>}, {pipeline_mode = #tpu.pipeline_mode<synchronous>, transform_indices = @transform_7, window_bounds = array<i64: 1, 32>}, {pipeline_mode = #tpu.pipeline_mode<synchronous>, transform_indices = @transform_8, window_bounds = array<i64: 3, 32>}, {pipeline_mode = #tpu.pipeline_mode<synchronous>, transform_indices = @transform_9, window_bounds = array<i64: 1, 32>}, {pipeline_mode = #tpu.pipeline_mode<synchronous>, transform_indices = @transform_10, window_bounds = array<i64: 2, 32, 32>}, {pipeline_mode = #tpu.pipeline_mode<synchronous>, transform_indices = @transform_11, window_bounds = array<i64: 2, 1, 32>}, {pipeline_mode = #tpu.pipeline_mode<synchronous>, transform_indices = @transform_12, window_bounds = array<i64: 32, 32>}, {pipeline_mode = #tpu.pipeline_mode<synchronous>, transform_indices = @transform_13, window_bounds = array<i64: 1, 32>}, {pipeline_mode = #tpu.pipeline_mode<synchronous>, transform_indices = @transform_14, window_bounds = array<i64: 32, 32>}, {pipeline_mode = #tpu.pipeline_mode<synchronous>, transform_indices = @transform_15, window_bounds = array<i64: 1, 32>}, {pipeline_mode = #tpu.pipeline_mode<synchronous>, transform_indices = @transform_16, window_bounds = array<i64: 2, 32, 32>}, {pipeline_mode = #tpu.pipeline_mode<synchronous>, transform_indices = @transform_17, window_bounds = array<i64: 2, 1, 32>}, {pipeline_mode = #tpu.pipeline_mode<synchronous>, transform_indices = @transform_18, window_bounds = array<i64: 32, 8>}, {pipeline_mode = #tpu.pipeline_mode<synchronous>, transform_indices = @transform_19, window_bounds = array<i64: 1, 8>}, {pipeline_mode = #tpu.pipeline_mode<synchronous>, transform_indices = @transform_20, window_bounds = array<i64: 32, 32>}, {pipeline_mode = #tpu.pipeline_mode<synchronous>, transform_indices = @transform_21, window_bounds = array<i64: 1, 32>}, {pipeline_mode = #tpu.pipeline_mode<synchronous>, transform_indices = @transform_22, window_bounds = array<i64: 2, 32, 32>}, {pipeline_mode = #tpu.pipeline_mode<synchronous>, transform_indices = @transform_23, window_bounds = array<i64: 2, 1, 32>}, {pipeline_mode = #tpu.pipeline_mode<synchronous>, transform_indices = @transform_24, window_bounds = array<i64: 32, 128>}, {pipeline_mode = #tpu.pipeline_mode<synchronous>, transform_indices = @transform_25, window_bounds = array<i64: 1, 128>}, {pipeline_mode = #tpu.pipeline_mode<synchronous>, transform_indices = @transform_26, window_bounds = array<i64: 2, 1, 32>}, {pipeline_mode = #tpu.pipeline_mode<synchronous>, transform_indices = @transform_27, window_bounds = array<i64: 2, 1, 32>}, {pipeline_mode = #tpu.pipeline_mode<synchronous>, transform_indices = @transform_28, window_bounds = array<i64: 2, 32, 96>}, {pipeline_mode = #tpu.pipeline_mode<synchronous>, transform_indices = @transform_29, window_bounds = array<i64: 2, 1, 96>}, {pipeline_mode = #tpu.pipeline_mode<synchronous>, transform_indices = @transform_30, window_bounds = array<i64: 2, 32, 32>}, {pipeline_mode = #tpu.pipeline_mode<synchronous>, transform_indices = @transform_31, window_bounds = array<i64: 2, 1, 32>}, {pipeline_mode = #tpu.pipeline_mode<synchronous>, transform_indices = @transform_32, window_bounds = array<i64: 2, 1, 32>}, {pipeline_mode = #tpu.pipeline_mode<synchronous>, transform_indices = @transform_33, window_bounds = array<i64: 2, 1, 32>}, {pipeline_mode = #tpu.pipeline_mode<synchronous>, transform_indices = @transform_34, window_bounds = array<i64: 2, 32, 64>}, {pipeline_mode = #tpu.pipeline_mode<synchronous>, transform_indices = @transform_35, window_bounds = array<i64: 2, 1, 64>}, {pipeline_mode = #tpu.pipeline_mode<synchronous>, transform_indices = @transform_36, window_bounds = array<i64: 2, 64, 32>}, {pipeline_mode = #tpu.pipeline_mode<synchronous>, transform_indices = @transform_37, window_bounds = array<i64: 2, 1, 32>}, {transform_indices = @transform_38, window_bounds = array<i64: 16, 128>}]} {
    %c0 = arith.constant 0 : index
    %c0_0 = arith.constant 0 : index
    %0 = vector.load %arg1[%c0, %c0_0] : memref<16x2xf32, #tpu.memory_space<vmem>>, vector<16x2xf32>
    %c0_1 = arith.constant 0 : index
    %c0_2 = arith.constant 0 : index
    %1 = vector.load %arg3[%c0_1, %c0_2] : memref<2x32xf32, #tpu.memory_space<vmem>>, vector<2x32xf32>
    %cst = arith.constant dense<0.000000e+00> : vector<16x32xf32>
    %2 = tpu.matmul %0, %1, %cst {dimension_numbers = #tpu.dot_dimension_numbers<[1], [0], [0], [1], [0, 0, 1, 1], [], []>} : vector<16x2xf32>, vector<2x32xf32>, vector<16x32xf32> -> vector<16x32xf32>
    %c0_3 = arith.constant 0 : index
    %c0_4 = arith.constant 0 : index
    %3 = vector.load %arg4[%c0_3, %c0_4] : memref<1x32xf32, #tpu.memory_space<vmem>>, vector<1x32xf32>
    %4 = vector.broadcast %3 : vector<1x32xf32> to vector<16x32xf32>
    %5 = arith.addf %2, %4 : vector<16x32xf32>
    %cst_5 = arith.constant 0.000000e+00 : f32
    %6 = vector.broadcast %cst_5 : f32 to vector<16x32xf32>
    %7 = arith.maximumf %5, %6 : vector<16x32xf32>
    %c0_6 = arith.constant 0 : index
    %c0_7 = arith.constant 0 : index
    %c0_8 = arith.constant 0 : index
    %8 = vector.load %arg5[%c0_6, %c0_7, %c0_8] : memref<2x32x32xf32, #tpu.memory_space<vmem>>, vector<1x32x32xf32>
    %9 = vector.shape_cast %8 : vector<1x32x32xf32> to vector<32x32xf32>
    %cst_9 = arith.constant dense<0.000000e+00> : vector<16x32xf32>
    %10 = tpu.matmul %7, %9, %cst_9 {dimension_numbers = #tpu.dot_dimension_numbers<[1], [0], [0], [1], [0, 0, 1, 1], [], []>} : vector<16x32xf32>, vector<32x32xf32>, vector<16x32xf32> -> vector<16x32xf32>
    %c0_10 = arith.constant 0 : index
    %c0_11 = arith.constant 0 : index
    %c0_12 = arith.constant 0 : index
    %11 = vector.load %arg6[%c0_10, %c0_11, %c0_12] : memref<2x1x32xf32, #tpu.memory_space<vmem>>, vector<1x1x32xf32>
    %12 = vector.shape_cast %11 : vector<1x1x32xf32> to vector<1x32xf32>
    %13 = vector.broadcast %12 : vector<1x32xf32> to vector<16x32xf32>
    %14 = arith.addf %10, %13 : vector<16x32xf32>
    %cst_13 = arith.constant 0.000000e+00 : f32
    %15 = vector.broadcast %cst_13 : f32 to vector<16x32xf32>
    %16 = arith.maximumf %14, %15 : vector<16x32xf32>
    %17 = arith.addf %7, %16 : vector<16x32xf32>
    %c1 = arith.constant 1 : index
    %c0_14 = arith.constant 0 : index
    %c0_15 = arith.constant 0 : index
    %18 = vector.load %arg5[%c1, %c0_14, %c0_15] : memref<2x32x32xf32, #tpu.memory_space<vmem>>, vector<1x32x32xf32>
    %19 = vector.shape_cast %18 : vector<1x32x32xf32> to vector<32x32xf32>
    %cst_16 = arith.constant dense<0.000000e+00> : vector<16x32xf32>
    %20 = tpu.matmul %17, %19, %cst_16 {dimension_numbers = #tpu.dot_dimension_numbers<[1], [0], [0], [1], [0, 0, 1, 1], [], []>} : vector<16x32xf32>, vector<32x32xf32>, vector<16x32xf32> -> vector<16x32xf32>
    %c1_17 = arith.constant 1 : index
    %c0_18 = arith.constant 0 : index
    %c0_19 = arith.constant 0 : index
    %21 = vector.load %arg6[%c1_17, %c0_18, %c0_19] : memref<2x1x32xf32, #tpu.memory_space<vmem>>, vector<1x1x32xf32>
    %22 = vector.shape_cast %21 : vector<1x1x32xf32> to vector<1x32xf32>
    %23 = vector.broadcast %22 : vector<1x32xf32> to vector<16x32xf32>
    %24 = arith.addf %20, %23 : vector<16x32xf32>
    %cst_20 = arith.constant 0.000000e+00 : f32
    %25 = vector.broadcast %cst_20 : f32 to vector<16x32xf32>
    %26 = arith.maximumf %24, %25 : vector<16x32xf32>
    %27 = arith.addf %17, %26 : vector<16x32xf32>
    %c0_21 = arith.constant 0 : index
    %c0_22 = arith.constant 0 : index
    %28 = vector.load %arg7[%c0_21, %c0_22] : memref<32x32xf32, #tpu.memory_space<vmem>>, vector<32x32xf32>
    %cst_23 = arith.constant dense<0.000000e+00> : vector<16x32xf32>
    %29 = tpu.matmul %27, %28, %cst_23 {dimension_numbers = #tpu.dot_dimension_numbers<[1], [0], [0], [1], [0, 0, 1, 1], [], []>} : vector<16x32xf32>, vector<32x32xf32>, vector<16x32xf32> -> vector<16x32xf32>
    %c0_24 = arith.constant 0 : index
    %c0_25 = arith.constant 0 : index
    %30 = vector.load %arg8[%c0_24, %c0_25] : memref<1x32xf32, #tpu.memory_space<vmem>>, vector<1x32xf32>
    %31 = vector.broadcast %30 : vector<1x32xf32> to vector<16x32xf32>
    %32 = arith.addf %29, %31 : vector<16x32xf32>
    %c0_26 = arith.constant 0 : index
    %c0_27 = arith.constant 0 : index
    %33 = vector.load %arg2[%c0_26, %c0_27] : memref<16x3xf32, #tpu.memory_space<vmem>>, vector<16x3xf32>
    %c0_28 = arith.constant 0 : index
    %c0_29 = arith.constant 0 : index
    %34 = vector.load %arg9[%c0_28, %c0_29] : memref<3x32xf32, #tpu.memory_space<vmem>>, vector<3x32xf32>
    %cst_30 = arith.constant dense<0.000000e+00> : vector<16x32xf32>
    %35 = tpu.matmul %33, %34, %cst_30 {dimension_numbers = #tpu.dot_dimension_numbers<[1], [0], [0], [1], [0, 0, 1, 1], [], []>} : vector<16x3xf32>, vector<3x32xf32>, vector<16x32xf32> -> vector<16x32xf32>
    %c0_31 = arith.constant 0 : index
    %c0_32 = arith.constant 0 : index
    %36 = vector.load %arg10[%c0_31, %c0_32] : memref<1x32xf32, #tpu.memory_space<vmem>>, vector<1x32xf32>
    %37 = vector.broadcast %36 : vector<1x32xf32> to vector<16x32xf32>
    %38 = arith.addf %35, %37 : vector<16x32xf32>
    %cst_33 = arith.constant 0.000000e+00 : f32
    %39 = vector.broadcast %cst_33 : f32 to vector<16x32xf32>
    %40 = arith.maximumf %38, %39 : vector<16x32xf32>
    %c0_34 = arith.constant 0 : index
    %c0_35 = arith.constant 0 : index
    %c0_36 = arith.constant 0 : index
    %41 = vector.load %arg11[%c0_34, %c0_35, %c0_36] : memref<2x32x32xf32, #tpu.memory_space<vmem>>, vector<1x32x32xf32>
    %42 = vector.shape_cast %41 : vector<1x32x32xf32> to vector<32x32xf32>
    %cst_37 = arith.constant dense<0.000000e+00> : vector<16x32xf32>
    %43 = tpu.matmul %40, %42, %cst_37 {dimension_numbers = #tpu.dot_dimension_numbers<[1], [0], [0], [1], [0, 0, 1, 1], [], []>} : vector<16x32xf32>, vector<32x32xf32>, vector<16x32xf32> -> vector<16x32xf32>
    %c0_38 = arith.constant 0 : index
    %c0_39 = arith.constant 0 : index
    %c0_40 = arith.constant 0 : index
    %44 = vector.load %arg12[%c0_38, %c0_39, %c0_40] : memref<2x1x32xf32, #tpu.memory_space<vmem>>, vector<1x1x32xf32>
    %45 = vector.shape_cast %44 : vector<1x1x32xf32> to vector<1x32xf32>
    %46 = vector.broadcast %45 : vector<1x32xf32> to vector<16x32xf32>
    %47 = arith.addf %43, %46 : vector<16x32xf32>
    %cst_41 = arith.constant 0.000000e+00 : f32
    %48 = vector.broadcast %cst_41 : f32 to vector<16x32xf32>
    %49 = arith.maximumf %47, %48 : vector<16x32xf32>
    %50 = arith.addf %40, %49 : vector<16x32xf32>
    %c1_42 = arith.constant 1 : index
    %c0_43 = arith.constant 0 : index
    %c0_44 = arith.constant 0 : index
    %51 = vector.load %arg11[%c1_42, %c0_43, %c0_44] : memref<2x32x32xf32, #tpu.memory_space<vmem>>, vector<1x32x32xf32>
    %52 = vector.shape_cast %51 : vector<1x32x32xf32> to vector<32x32xf32>
    %cst_45 = arith.constant dense<0.000000e+00> : vector<16x32xf32>
    %53 = tpu.matmul %50, %52, %cst_45 {dimension_numbers = #tpu.dot_dimension_numbers<[1], [0], [0], [1], [0, 0, 1, 1], [], []>} : vector<16x32xf32>, vector<32x32xf32>, vector<16x32xf32> -> vector<16x32xf32>
    %c1_46 = arith.constant 1 : index
    %c0_47 = arith.constant 0 : index
    %c0_48 = arith.constant 0 : index
    %54 = vector.load %arg12[%c1_46, %c0_47, %c0_48] : memref<2x1x32xf32, #tpu.memory_space<vmem>>, vector<1x1x32xf32>
    %55 = vector.shape_cast %54 : vector<1x1x32xf32> to vector<1x32xf32>
    %56 = vector.broadcast %55 : vector<1x32xf32> to vector<16x32xf32>
    %57 = arith.addf %53, %56 : vector<16x32xf32>
    %cst_49 = arith.constant 0.000000e+00 : f32
    %58 = vector.broadcast %cst_49 : f32 to vector<16x32xf32>
    %59 = arith.maximumf %57, %58 : vector<16x32xf32>
    %60 = arith.addf %50, %59 : vector<16x32xf32>
    %c0_50 = arith.constant 0 : index
    %c0_51 = arith.constant 0 : index
    %61 = vector.load %arg13[%c0_50, %c0_51] : memref<32x32xf32, #tpu.memory_space<vmem>>, vector<32x32xf32>
    %cst_52 = arith.constant dense<0.000000e+00> : vector<16x32xf32>
    %62 = tpu.matmul %60, %61, %cst_52 {dimension_numbers = #tpu.dot_dimension_numbers<[1], [0], [0], [1], [0, 0, 1, 1], [], []>} : vector<16x32xf32>, vector<32x32xf32>, vector<16x32xf32> -> vector<16x32xf32>
    %c0_53 = arith.constant 0 : index
    %c0_54 = arith.constant 0 : index
    %63 = vector.load %arg14[%c0_53, %c0_54] : memref<1x32xf32, #tpu.memory_space<vmem>>, vector<1x32xf32>
    %64 = vector.broadcast %63 : vector<1x32xf32> to vector<16x32xf32>
    %65 = arith.addf %62, %64 : vector<16x32xf32>
    %c0_55 = arith.constant 0 : index
    %c0_56 = arith.constant 0 : index
    %66 = vector.load %arg15[%c0_55, %c0_56] : memref<32x32xf32, #tpu.memory_space<vmem>>, vector<32x32xf32>
    %cst_57 = arith.constant dense<0.000000e+00> : vector<16x32xf32>
    %67 = tpu.matmul %32, %66, %cst_57 {dimension_numbers = #tpu.dot_dimension_numbers<[1], [0], [0], [1], [0, 0, 1, 1], [], []>} : vector<16x32xf32>, vector<32x32xf32>, vector<16x32xf32> -> vector<16x32xf32>
    %c0_58 = arith.constant 0 : index
    %c0_59 = arith.constant 0 : index
    %68 = vector.load %arg16[%c0_58, %c0_59] : memref<1x32xf32, #tpu.memory_space<vmem>>, vector<1x32xf32>
    %69 = vector.broadcast %68 : vector<1x32xf32> to vector<16x32xf32>
    %70 = arith.addf %67, %69 : vector<16x32xf32>
    %cst_60 = arith.constant 0.000000e+00 : f32
    %71 = vector.broadcast %cst_60 : f32 to vector<16x32xf32>
    %72 = arith.maximumf %70, %71 : vector<16x32xf32>
    %c0_61 = arith.constant 0 : index
    %c0_62 = arith.constant 0 : index
    %c0_63 = arith.constant 0 : index
    %73 = vector.load %arg17[%c0_61, %c0_62, %c0_63] : memref<2x32x32xf32, #tpu.memory_space<vmem>>, vector<1x32x32xf32>
    %74 = vector.shape_cast %73 : vector<1x32x32xf32> to vector<32x32xf32>
    %cst_64 = arith.constant dense<0.000000e+00> : vector<16x32xf32>
    %75 = tpu.matmul %72, %74, %cst_64 {dimension_numbers = #tpu.dot_dimension_numbers<[1], [0], [0], [1], [0, 0, 1, 1], [], []>} : vector<16x32xf32>, vector<32x32xf32>, vector<16x32xf32> -> vector<16x32xf32>
    %c0_65 = arith.constant 0 : index
    %c0_66 = arith.constant 0 : index
    %c0_67 = arith.constant 0 : index
    %76 = vector.load %arg18[%c0_65, %c0_66, %c0_67] : memref<2x1x32xf32, #tpu.memory_space<vmem>>, vector<1x1x32xf32>
    %77 = vector.shape_cast %76 : vector<1x1x32xf32> to vector<1x32xf32>
    %78 = vector.broadcast %77 : vector<1x32xf32> to vector<16x32xf32>
    %79 = arith.addf %75, %78 : vector<16x32xf32>
    %cst_68 = arith.constant 0.000000e+00 : f32
    %80 = vector.broadcast %cst_68 : f32 to vector<16x32xf32>
    %81 = arith.maximumf %79, %80 : vector<16x32xf32>
    %82 = arith.addf %72, %81 : vector<16x32xf32>
    %c1_69 = arith.constant 1 : index
    %c0_70 = arith.constant 0 : index
    %c0_71 = arith.constant 0 : index
    %83 = vector.load %arg17[%c1_69, %c0_70, %c0_71] : memref<2x32x32xf32, #tpu.memory_space<vmem>>, vector<1x32x32xf32>
    %84 = vector.shape_cast %83 : vector<1x32x32xf32> to vector<32x32xf32>
    %cst_72 = arith.constant dense<0.000000e+00> : vector<16x32xf32>
    %85 = tpu.matmul %82, %84, %cst_72 {dimension_numbers = #tpu.dot_dimension_numbers<[1], [0], [0], [1], [0, 0, 1, 1], [], []>} : vector<16x32xf32>, vector<32x32xf32>, vector<16x32xf32> -> vector<16x32xf32>
    %c1_73 = arith.constant 1 : index
    %c0_74 = arith.constant 0 : index
    %c0_75 = arith.constant 0 : index
    %86 = vector.load %arg18[%c1_73, %c0_74, %c0_75] : memref<2x1x32xf32, #tpu.memory_space<vmem>>, vector<1x1x32xf32>
    %87 = vector.shape_cast %86 : vector<1x1x32xf32> to vector<1x32xf32>
    %88 = vector.broadcast %87 : vector<1x32xf32> to vector<16x32xf32>
    %89 = arith.addf %85, %88 : vector<16x32xf32>
    %cst_76 = arith.constant 0.000000e+00 : f32
    %90 = vector.broadcast %cst_76 : f32 to vector<16x32xf32>
    %91 = arith.maximumf %89, %90 : vector<16x32xf32>
    %92 = arith.addf %82, %91 : vector<16x32xf32>
    %c0_77 = arith.constant 0 : index
    %c0_78 = arith.constant 0 : index
    %93 = vector.load %arg19[%c0_77, %c0_78] : memref<32x8xf32, #tpu.memory_space<vmem>>, vector<32x8xf32>
    %cst_79 = arith.constant dense<0.000000e+00> : vector<16x8xf32>
    %94 = tpu.matmul %92, %93, %cst_79 {dimension_numbers = #tpu.dot_dimension_numbers<[1], [0], [0], [1], [0, 0, 1, 1], [], []>} : vector<16x32xf32>, vector<32x8xf32>, vector<16x8xf32> -> vector<16x8xf32>
    %c0_80 = arith.constant 0 : index
    %c0_81 = arith.constant 0 : index
    %95 = vector.load %arg20[%c0_80, %c0_81] : memref<1x8xf32, #tpu.memory_space<vmem>>, vector<1x8xf32>
    %96 = vector.broadcast %95 : vector<1x8xf32> to vector<16x8xf32>
    %97 = arith.addf %94, %96 : vector<16x8xf32>
    %cst_82 = arith.constant dense<0xFF800000> : vector<8xf32>
    %98 = vector.multi_reduction <maximumf>, %97, %cst_82 [0] : vector<16x8xf32> to vector<8xf32>
    %99 = vector.shape_cast %98 : vector<8xf32> to vector<1x8xf32>
    %100 = vector.broadcast %99 : vector<1x8xf32> to vector<16x8xf32>
    %101 = arith.subf %97, %100 : vector<16x8xf32>
    %102 = math.exp %101 : vector<16x8xf32>
    %cst_83 = arith.constant dense<0.000000e+00> : vector<8xf32>
    %103 = vector.multi_reduction <add>, %102, %cst_83 [0] : vector<16x8xf32> to vector<8xf32>
    %104 = vector.shape_cast %103 : vector<8xf32> to vector<1x8xf32>
    %105 = vector.broadcast %104 : vector<1x8xf32> to vector<16x8xf32>
    %106 = arith.divf %102, %105 : vector<16x8xf32>
    %107 = tpu.transpose %106, [1, 0] : vector<16x8xf32> -> vector<8x16xf32>
    %cst_84 = arith.constant dense<0xFF800000> : vector<16xf32>
    %108 = vector.multi_reduction <maximumf>, %97, %cst_84 [1] : vector<16x8xf32> to vector<16xf32>
    %109 = vector.shape_cast %108 : vector<16xf32> to vector<16x1xf32>
    %110 = vector.broadcast %109 : vector<16x1xf32> to vector<16x8xf32>
    %111 = arith.subf %97, %110 : vector<16x8xf32>
    %112 = math.exp %111 : vector<16x8xf32>
    %cst_85 = arith.constant dense<0.000000e+00> : vector<16xf32>
    %113 = vector.multi_reduction <add>, %112, %cst_85 [1] : vector<16x8xf32> to vector<16xf32>
    %114 = vector.shape_cast %113 : vector<16xf32> to vector<16x1xf32>
    %115 = vector.broadcast %114 : vector<16x1xf32> to vector<16x8xf32>
    %116 = arith.divf %112, %115 : vector<16x8xf32>
    %cst_86 = arith.constant dense<0.000000e+00> : vector<8x32xf32>
    %117 = tpu.matmul %107, %65, %cst_86 {dimension_numbers = #tpu.dot_dimension_numbers<[1], [0], [0], [1], [0, 0, 1, 1], [], []>} : vector<8x16xf32>, vector<16x32xf32>, vector<8x32xf32> -> vector<8x32xf32>
    %c0_87 = arith.constant 0 : index
    %c0_88 = arith.constant 0 : index
    %c0_89 = arith.constant 0 : index
    %118 = vector.load %arg27[%c0_87, %c0_88, %c0_89] : memref<2x1x32xf32, #tpu.memory_space<vmem>>, vector<1x1x32xf32>
    %119 = vector.shape_cast %118 : vector<1x1x32xf32> to vector<1x32xf32>
    %c0_90 = arith.constant 0 : index
    %c0_91 = arith.constant 0 : index
    %c0_92 = arith.constant 0 : index
    %120 = vector.load %arg28[%c0_90, %c0_91, %c0_92] : memref<2x1x32xf32, #tpu.memory_space<vmem>>, vector<1x1x32xf32>
    %121 = vector.shape_cast %120 : vector<1x1x32xf32> to vector<1x32xf32>
    %cst_93 = arith.constant dense<0.000000e+00> : vector<8xf32>
    %122 = vector.multi_reduction <add>, %117, %cst_93 [1] : vector<8x32xf32> to vector<8xf32>
    %123 = vector.shape_cast %122 : vector<8xf32> to vector<8x1xf32>
    %cst_94 = arith.constant 3.200000e+01 : f32
    %124 = vector.broadcast %cst_94 : f32 to vector<8x1xf32>
    %125 = arith.divf %123, %124 : vector<8x1xf32>
    %126 = vector.broadcast %125 : vector<8x1xf32> to vector<8x32xf32>
    %127 = arith.subf %117, %126 : vector<8x32xf32>
    %128 = arith.mulf %127, %127 : vector<8x32xf32>
    %cst_95 = arith.constant dense<0.000000e+00> : vector<8xf32>
    %129 = vector.multi_reduction <add>, %128, %cst_95 [1] : vector<8x32xf32> to vector<8xf32>
    %130 = vector.shape_cast %129 : vector<8xf32> to vector<8x1xf32>
    %cst_96 = arith.constant 3.200000e+01 : f32
    %131 = vector.broadcast %cst_96 : f32 to vector<8x1xf32>
    %132 = arith.divf %130, %131 : vector<8x1xf32>
    %133 = vector.broadcast %125 : vector<8x1xf32> to vector<8x32xf32>
    %134 = arith.subf %117, %133 : vector<8x32xf32>
    %cst_97 = arith.constant 9.99999974E-6 : f32
    %135 = vector.broadcast %cst_97 : f32 to vector<8x1xf32>
    %136 = arith.addf %132, %135 : vector<8x1xf32>
    %137 = math.rsqrt %136 : vector<8x1xf32>
    %138 = vector.broadcast %137 : vector<8x1xf32> to vector<8x32xf32>
    %139 = arith.mulf %134, %138 : vector<8x32xf32>
    %140 = vector.broadcast %119 : vector<1x32xf32> to vector<8x32xf32>
    %141 = arith.mulf %139, %140 : vector<8x32xf32>
    %142 = vector.broadcast %121 : vector<1x32xf32> to vector<8x32xf32>
    %143 = arith.addf %141, %142 : vector<8x32xf32>
    %c0_98 = arith.constant 0 : index
    %c0_99 = arith.constant 0 : index
    %c0_100 = arith.constant 0 : index
    %144 = vector.load %arg29[%c0_98, %c0_99, %c0_100] : memref<2x32x96xf32, #tpu.memory_space<vmem>>, vector<1x32x96xf32>
    %145 = vector.shape_cast %144 : vector<1x32x96xf32> to vector<32x96xf32>
    %cst_101 = arith.constant dense<0.000000e+00> : vector<8x96xf32>
    %146 = tpu.matmul %143, %145, %cst_101 {dimension_numbers = #tpu.dot_dimension_numbers<[1], [0], [0], [1], [0, 0, 1, 1], [], []>} : vector<8x32xf32>, vector<32x96xf32>, vector<8x96xf32> -> vector<8x96xf32>
    %c0_102 = arith.constant 0 : index
    %c0_103 = arith.constant 0 : index
    %c0_104 = arith.constant 0 : index
    %147 = vector.load %arg30[%c0_102, %c0_103, %c0_104] : memref<2x1x96xf32, #tpu.memory_space<vmem>>, vector<1x1x96xf32>
    %148 = vector.shape_cast %147 : vector<1x1x96xf32> to vector<1x96xf32>
    %149 = vector.broadcast %148 : vector<1x96xf32> to vector<8x96xf32>
    %150 = arith.addf %146, %149 : vector<8x96xf32>
    %151 = vector.extract_strided_slice %150 {offsets = [0, 0], sizes = [8, 32], strides = [1, 1]} : vector<8x96xf32> to vector<8x32xf32>
    %152 = vector.extract_strided_slice %150 {offsets = [0, 32], sizes = [8, 32], strides = [1, 1]} : vector<8x96xf32> to vector<8x32xf32>
    %153 = vector.extract_strided_slice %150 {offsets = [0, 64], sizes = [8, 32], strides = [1, 1]} : vector<8x96xf32> to vector<8x32xf32>
    %154 = vector.extract_strided_slice %151 {offsets = [0, 0], sizes = [8, 8], strides = [1, 1]} : vector<8x32xf32> to vector<8x8xf32>
    %155 = vector.extract_strided_slice %152 {offsets = [0, 0], sizes = [8, 8], strides = [1, 1]} : vector<8x32xf32> to vector<8x8xf32>
    %cst_105 = arith.constant dense<0.000000e+00> : vector<8x8xf32>
    %156 = tpu.matmul %154, %155, %cst_105 {dimension_numbers = #tpu.dot_dimension_numbers<[1], [1], [0], [0], [0, 0, 1, 0], [], []>} : vector<8x8xf32>, vector<8x8xf32>, vector<8x8xf32> -> vector<8x8xf32>
    %cst_106 = arith.constant 0.353553385 : f32
    %157 = vector.broadcast %cst_106 : f32 to vector<8x8xf32>
    %158 = arith.mulf %156, %157 : vector<8x8xf32>
    %cst_107 = arith.constant dense<0xFF800000> : vector<8xf32>
    %159 = vector.multi_reduction <maximumf>, %158, %cst_107 [1] : vector<8x8xf32> to vector<8xf32>
    %160 = vector.shape_cast %159 : vector<8xf32> to vector<8x1xf32>
    %161 = vector.broadcast %160 : vector<8x1xf32> to vector<8x8xf32>
    %162 = arith.subf %158, %161 : vector<8x8xf32>
    %163 = math.exp %162 : vector<8x8xf32>
    %cst_108 = arith.constant dense<0.000000e+00> : vector<8xf32>
    %164 = vector.multi_reduction <add>, %163, %cst_108 [1] : vector<8x8xf32> to vector<8xf32>
    %165 = vector.shape_cast %164 : vector<8xf32> to vector<8x1xf32>
    %166 = tpu.reciprocal %165 {approx = true} : vector<8x1xf32> -> vector<8x1xf32>
    %167 = vector.broadcast %166 : vector<8x1xf32> to vector<8x8xf32>
    %168 = arith.mulf %163, %167 : vector<8x8xf32>
    %169 = vector.extract_strided_slice %153 {offsets = [0, 0], sizes = [8, 8], strides = [1, 1]} : vector<8x32xf32> to vector<8x8xf32>
    %cst_109 = arith.constant dense<0.000000e+00> : vector<8x8xf32>
    %170 = tpu.matmul %168, %169, %cst_109 {dimension_numbers = #tpu.dot_dimension_numbers<[1], [0], [0], [1], [0, 0, 1, 1], [], []>} : vector<8x8xf32>, vector<8x8xf32>, vector<8x8xf32> -> vector<8x8xf32>
    %171 = vector.extract_strided_slice %151 {offsets = [0, 8], sizes = [8, 8], strides = [1, 1]} : vector<8x32xf32> to vector<8x8xf32>
    %172 = vector.extract_strided_slice %152 {offsets = [0, 8], sizes = [8, 8], strides = [1, 1]} : vector<8x32xf32> to vector<8x8xf32>
    %cst_110 = arith.constant dense<0.000000e+00> : vector<8x8xf32>
    %173 = tpu.matmul %171, %172, %cst_110 {dimension_numbers = #tpu.dot_dimension_numbers<[1], [1], [0], [0], [0, 0, 1, 0], [], []>} : vector<8x8xf32>, vector<8x8xf32>, vector<8x8xf32> -> vector<8x8xf32>
    %cst_111 = arith.constant 0.353553385 : f32
    %174 = vector.broadcast %cst_111 : f32 to vector<8x8xf32>
    %175 = arith.mulf %173, %174 : vector<8x8xf32>
    %cst_112 = arith.constant dense<0xFF800000> : vector<8xf32>
    %176 = vector.multi_reduction <maximumf>, %175, %cst_112 [1] : vector<8x8xf32> to vector<8xf32>
    %177 = vector.shape_cast %176 : vector<8xf32> to vector<8x1xf32>
    %178 = vector.broadcast %177 : vector<8x1xf32> to vector<8x8xf32>
    %179 = arith.subf %175, %178 : vector<8x8xf32>
    %180 = math.exp %179 : vector<8x8xf32>
    %cst_113 = arith.constant dense<0.000000e+00> : vector<8xf32>
    %181 = vector.multi_reduction <add>, %180, %cst_113 [1] : vector<8x8xf32> to vector<8xf32>
    %182 = vector.shape_cast %181 : vector<8xf32> to vector<8x1xf32>
    %183 = tpu.reciprocal %182 {approx = true} : vector<8x1xf32> -> vector<8x1xf32>
    %184 = vector.broadcast %183 : vector<8x1xf32> to vector<8x8xf32>
    %185 = arith.mulf %180, %184 : vector<8x8xf32>
    %186 = vector.extract_strided_slice %153 {offsets = [0, 8], sizes = [8, 8], strides = [1, 1]} : vector<8x32xf32> to vector<8x8xf32>
    %cst_114 = arith.constant dense<0.000000e+00> : vector<8x8xf32>
    %187 = tpu.matmul %185, %186, %cst_114 {dimension_numbers = #tpu.dot_dimension_numbers<[1], [0], [0], [1], [0, 0, 1, 1], [], []>} : vector<8x8xf32>, vector<8x8xf32>, vector<8x8xf32> -> vector<8x8xf32>
    %188 = vector.extract_strided_slice %151 {offsets = [0, 16], sizes = [8, 8], strides = [1, 1]} : vector<8x32xf32> to vector<8x8xf32>
    %189 = vector.extract_strided_slice %152 {offsets = [0, 16], sizes = [8, 8], strides = [1, 1]} : vector<8x32xf32> to vector<8x8xf32>
    %cst_115 = arith.constant dense<0.000000e+00> : vector<8x8xf32>
    %190 = tpu.matmul %188, %189, %cst_115 {dimension_numbers = #tpu.dot_dimension_numbers<[1], [1], [0], [0], [0, 0, 1, 0], [], []>} : vector<8x8xf32>, vector<8x8xf32>, vector<8x8xf32> -> vector<8x8xf32>
    %cst_116 = arith.constant 0.353553385 : f32
    %191 = vector.broadcast %cst_116 : f32 to vector<8x8xf32>
    %192 = arith.mulf %190, %191 : vector<8x8xf32>
    %cst_117 = arith.constant dense<0xFF800000> : vector<8xf32>
    %193 = vector.multi_reduction <maximumf>, %192, %cst_117 [1] : vector<8x8xf32> to vector<8xf32>
    %194 = vector.shape_cast %193 : vector<8xf32> to vector<8x1xf32>
    %195 = vector.broadcast %194 : vector<8x1xf32> to vector<8x8xf32>
    %196 = arith.subf %192, %195 : vector<8x8xf32>
    %197 = math.exp %196 : vector<8x8xf32>
    %cst_118 = arith.constant dense<0.000000e+00> : vector<8xf32>
    %198 = vector.multi_reduction <add>, %197, %cst_118 [1] : vector<8x8xf32> to vector<8xf32>
    %199 = vector.shape_cast %198 : vector<8xf32> to vector<8x1xf32>
    %200 = tpu.reciprocal %199 {approx = true} : vector<8x1xf32> -> vector<8x1xf32>
    %201 = vector.broadcast %200 : vector<8x1xf32> to vector<8x8xf32>
    %202 = arith.mulf %197, %201 : vector<8x8xf32>
    %203 = vector.extract_strided_slice %153 {offsets = [0, 16], sizes = [8, 8], strides = [1, 1]} : vector<8x32xf32> to vector<8x8xf32>
    %cst_119 = arith.constant dense<0.000000e+00> : vector<8x8xf32>
    %204 = tpu.matmul %202, %203, %cst_119 {dimension_numbers = #tpu.dot_dimension_numbers<[1], [0], [0], [1], [0, 0, 1, 1], [], []>} : vector<8x8xf32>, vector<8x8xf32>, vector<8x8xf32> -> vector<8x8xf32>
    %205 = vector.extract_strided_slice %151 {offsets = [0, 24], sizes = [8, 8], strides = [1, 1]} : vector<8x32xf32> to vector<8x8xf32>
    %206 = vector.extract_strided_slice %152 {offsets = [0, 24], sizes = [8, 8], strides = [1, 1]} : vector<8x32xf32> to vector<8x8xf32>
    %cst_120 = arith.constant dense<0.000000e+00> : vector<8x8xf32>
    %207 = tpu.matmul %205, %206, %cst_120 {dimension_numbers = #tpu.dot_dimension_numbers<[1], [1], [0], [0], [0, 0, 1, 0], [], []>} : vector<8x8xf32>, vector<8x8xf32>, vector<8x8xf32> -> vector<8x8xf32>
    %cst_121 = arith.constant 0.353553385 : f32
    %208 = vector.broadcast %cst_121 : f32 to vector<8x8xf32>
    %209 = arith.mulf %207, %208 : vector<8x8xf32>
    %cst_122 = arith.constant dense<0xFF800000> : vector<8xf32>
    %210 = vector.multi_reduction <maximumf>, %209, %cst_122 [1] : vector<8x8xf32> to vector<8xf32>
    %211 = vector.shape_cast %210 : vector<8xf32> to vector<8x1xf32>
    %212 = vector.broadcast %211 : vector<8x1xf32> to vector<8x8xf32>
    %213 = arith.subf %209, %212 : vector<8x8xf32>
    %214 = math.exp %213 : vector<8x8xf32>
    %cst_123 = arith.constant dense<0.000000e+00> : vector<8xf32>
    %215 = vector.multi_reduction <add>, %214, %cst_123 [1] : vector<8x8xf32> to vector<8xf32>
    %216 = vector.shape_cast %215 : vector<8xf32> to vector<8x1xf32>
    %217 = tpu.reciprocal %216 {approx = true} : vector<8x1xf32> -> vector<8x1xf32>
    %218 = vector.broadcast %217 : vector<8x1xf32> to vector<8x8xf32>
    %219 = arith.mulf %214, %218 : vector<8x8xf32>
    %220 = vector.extract_strided_slice %153 {offsets = [0, 24], sizes = [8, 8], strides = [1, 1]} : vector<8x32xf32> to vector<8x8xf32>
    %cst_124 = arith.constant dense<0.000000e+00> : vector<8x8xf32>
    %221 = tpu.matmul %219, %220, %cst_124 {dimension_numbers = #tpu.dot_dimension_numbers<[1], [0], [0], [1], [0, 0, 1, 1], [], []>} : vector<8x8xf32>, vector<8x8xf32>, vector<8x8xf32> -> vector<8x8xf32>
    %222 = tpu.concatenate %170, %187, %204, %221 in 1 : vector<8x8xf32>, vector<8x8xf32>, vector<8x8xf32>, vector<8x8xf32> -> vector<8x32xf32>
    %c0_125 = arith.constant 0 : index
    %c0_126 = arith.constant 0 : index
    %c0_127 = arith.constant 0 : index
    %223 = vector.load %arg31[%c0_125, %c0_126, %c0_127] : memref<2x32x32xf32, #tpu.memory_space<vmem>>, vector<1x32x32xf32>
    %224 = vector.shape_cast %223 : vector<1x32x32xf32> to vector<32x32xf32>
    %cst_128 = arith.constant dense<0.000000e+00> : vector<8x32xf32>
    %225 = tpu.matmul %222, %224, %cst_128 {dimension_numbers = #tpu.dot_dimension_numbers<[1], [0], [0], [1], [0, 0, 1, 1], [], []>} : vector<8x32xf32>, vector<32x32xf32>, vector<8x32xf32> -> vector<8x32xf32>
    %226 = arith.addf %117, %225 : vector<8x32xf32>
    %c0_129 = arith.constant 0 : index
    %c0_130 = arith.constant 0 : index
    %c0_131 = arith.constant 0 : index
    %227 = vector.load %arg32[%c0_129, %c0_130, %c0_131] : memref<2x1x32xf32, #tpu.memory_space<vmem>>, vector<1x1x32xf32>
    %228 = vector.shape_cast %227 : vector<1x1x32xf32> to vector<1x32xf32>
    %229 = vector.broadcast %228 : vector<1x32xf32> to vector<8x32xf32>
    %230 = arith.addf %226, %229 : vector<8x32xf32>
    %c0_132 = arith.constant 0 : index
    %c0_133 = arith.constant 0 : index
    %c0_134 = arith.constant 0 : index
    %231 = vector.load %arg33[%c0_132, %c0_133, %c0_134] : memref<2x1x32xf32, #tpu.memory_space<vmem>>, vector<1x1x32xf32>
    %232 = vector.shape_cast %231 : vector<1x1x32xf32> to vector<1x32xf32>
    %c0_135 = arith.constant 0 : index
    %c0_136 = arith.constant 0 : index
    %c0_137 = arith.constant 0 : index
    %233 = vector.load %arg34[%c0_135, %c0_136, %c0_137] : memref<2x1x32xf32, #tpu.memory_space<vmem>>, vector<1x1x32xf32>
    %234 = vector.shape_cast %233 : vector<1x1x32xf32> to vector<1x32xf32>
    %cst_138 = arith.constant dense<0.000000e+00> : vector<8xf32>
    %235 = vector.multi_reduction <add>, %230, %cst_138 [1] : vector<8x32xf32> to vector<8xf32>
    %236 = vector.shape_cast %235 : vector<8xf32> to vector<8x1xf32>
    %cst_139 = arith.constant 3.200000e+01 : f32
    %237 = vector.broadcast %cst_139 : f32 to vector<8x1xf32>
    %238 = arith.divf %236, %237 : vector<8x1xf32>
    %239 = vector.broadcast %238 : vector<8x1xf32> to vector<8x32xf32>
    %240 = arith.subf %230, %239 : vector<8x32xf32>
    %241 = arith.mulf %240, %240 : vector<8x32xf32>
    %cst_140 = arith.constant dense<0.000000e+00> : vector<8xf32>
    %242 = vector.multi_reduction <add>, %241, %cst_140 [1] : vector<8x32xf32> to vector<8xf32>
    %243 = vector.shape_cast %242 : vector<8xf32> to vector<8x1xf32>
    %cst_141 = arith.constant 3.200000e+01 : f32
    %244 = vector.broadcast %cst_141 : f32 to vector<8x1xf32>
    %245 = arith.divf %243, %244 : vector<8x1xf32>
    %246 = vector.broadcast %238 : vector<8x1xf32> to vector<8x32xf32>
    %247 = arith.subf %230, %246 : vector<8x32xf32>
    %cst_142 = arith.constant 9.99999974E-6 : f32
    %248 = vector.broadcast %cst_142 : f32 to vector<8x1xf32>
    %249 = arith.addf %245, %248 : vector<8x1xf32>
    %250 = math.rsqrt %249 : vector<8x1xf32>
    %251 = vector.broadcast %250 : vector<8x1xf32> to vector<8x32xf32>
    %252 = arith.mulf %247, %251 : vector<8x32xf32>
    %253 = vector.broadcast %232 : vector<1x32xf32> to vector<8x32xf32>
    %254 = arith.mulf %252, %253 : vector<8x32xf32>
    %255 = vector.broadcast %234 : vector<1x32xf32> to vector<8x32xf32>
    %256 = arith.addf %254, %255 : vector<8x32xf32>
    %c0_143 = arith.constant 0 : index
    %c0_144 = arith.constant 0 : index
    %c0_145 = arith.constant 0 : index
    %257 = vector.load %arg35[%c0_143, %c0_144, %c0_145] : memref<2x32x64xf32, #tpu.memory_space<vmem>>, vector<1x32x64xf32>
    %258 = vector.shape_cast %257 : vector<1x32x64xf32> to vector<32x64xf32>
    %cst_146 = arith.constant dense<0.000000e+00> : vector<8x64xf32>
    %259 = tpu.matmul %256, %258, %cst_146 {dimension_numbers = #tpu.dot_dimension_numbers<[1], [0], [0], [1], [0, 0, 1, 1], [], []>} : vector<8x32xf32>, vector<32x64xf32>, vector<8x64xf32> -> vector<8x64xf32>
    %c0_147 = arith.constant 0 : index
    %c0_148 = arith.constant 0 : index
    %c0_149 = arith.constant 0 : index
    %260 = vector.load %arg36[%c0_147, %c0_148, %c0_149] : memref<2x1x64xf32, #tpu.memory_space<vmem>>, vector<1x1x64xf32>
    %261 = vector.shape_cast %260 : vector<1x1x64xf32> to vector<1x64xf32>
    %262 = vector.broadcast %261 : vector<1x64xf32> to vector<8x64xf32>
    %263 = arith.addf %259, %262 : vector<8x64xf32>
    %cst_150 = arith.constant 0.000000e+00 : f32
    %264 = vector.broadcast %cst_150 : f32 to vector<8x64xf32>
    %265 = arith.maximumf %263, %264 : vector<8x64xf32>
    %c0_151 = arith.constant 0 : index
    %c0_152 = arith.constant 0 : index
    %c0_153 = arith.constant 0 : index
    %266 = vector.load %arg37[%c0_151, %c0_152, %c0_153] : memref<2x64x32xf32, #tpu.memory_space<vmem>>, vector<1x64x32xf32>
    %267 = vector.shape_cast %266 : vector<1x64x32xf32> to vector<64x32xf32>
    %cst_154 = arith.constant dense<0.000000e+00> : vector<8x32xf32>
    %268 = tpu.matmul %265, %267, %cst_154 {dimension_numbers = #tpu.dot_dimension_numbers<[1], [0], [0], [1], [0, 0, 1, 1], [], []>} : vector<8x64xf32>, vector<64x32xf32>, vector<8x32xf32> -> vector<8x32xf32>
    %c0_155 = arith.constant 0 : index
    %c0_156 = arith.constant 0 : index
    %c0_157 = arith.constant 0 : index
    %269 = vector.load %arg38[%c0_155, %c0_156, %c0_157] : memref<2x1x32xf32, #tpu.memory_space<vmem>>, vector<1x1x32xf32>
    %270 = vector.shape_cast %269 : vector<1x1x32xf32> to vector<1x32xf32>
    %271 = vector.broadcast %270 : vector<1x32xf32> to vector<8x32xf32>
    %272 = arith.addf %268, %271 : vector<8x32xf32>
    %273 = arith.addf %230, %272 : vector<8x32xf32>
    %c1_158 = arith.constant 1 : index
    %c0_159 = arith.constant 0 : index
    %c0_160 = arith.constant 0 : index
    %274 = vector.load %arg27[%c1_158, %c0_159, %c0_160] : memref<2x1x32xf32, #tpu.memory_space<vmem>>, vector<1x1x32xf32>
    %275 = vector.shape_cast %274 : vector<1x1x32xf32> to vector<1x32xf32>
    %c1_161 = arith.constant 1 : index
    %c0_162 = arith.constant 0 : index
    %c0_163 = arith.constant 0 : index
    %276 = vector.load %arg28[%c1_161, %c0_162, %c0_163] : memref<2x1x32xf32, #tpu.memory_space<vmem>>, vector<1x1x32xf32>
    %277 = vector.shape_cast %276 : vector<1x1x32xf32> to vector<1x32xf32>
    %cst_164 = arith.constant dense<0.000000e+00> : vector<8xf32>
    %278 = vector.multi_reduction <add>, %273, %cst_164 [1] : vector<8x32xf32> to vector<8xf32>
    %279 = vector.shape_cast %278 : vector<8xf32> to vector<8x1xf32>
    %cst_165 = arith.constant 3.200000e+01 : f32
    %280 = vector.broadcast %cst_165 : f32 to vector<8x1xf32>
    %281 = arith.divf %279, %280 : vector<8x1xf32>
    %282 = vector.broadcast %281 : vector<8x1xf32> to vector<8x32xf32>
    %283 = arith.subf %273, %282 : vector<8x32xf32>
    %284 = arith.mulf %283, %283 : vector<8x32xf32>
    %cst_166 = arith.constant dense<0.000000e+00> : vector<8xf32>
    %285 = vector.multi_reduction <add>, %284, %cst_166 [1] : vector<8x32xf32> to vector<8xf32>
    %286 = vector.shape_cast %285 : vector<8xf32> to vector<8x1xf32>
    %cst_167 = arith.constant 3.200000e+01 : f32
    %287 = vector.broadcast %cst_167 : f32 to vector<8x1xf32>
    %288 = arith.divf %286, %287 : vector<8x1xf32>
    %289 = vector.broadcast %281 : vector<8x1xf32> to vector<8x32xf32>
    %290 = arith.subf %273, %289 : vector<8x32xf32>
    %cst_168 = arith.constant 9.99999974E-6 : f32
    %291 = vector.broadcast %cst_168 : f32 to vector<8x1xf32>
    %292 = arith.addf %288, %291 : vector<8x1xf32>
    %293 = math.rsqrt %292 : vector<8x1xf32>
    %294 = vector.broadcast %293 : vector<8x1xf32> to vector<8x32xf32>
    %295 = arith.mulf %290, %294 : vector<8x32xf32>
    %296 = vector.broadcast %275 : vector<1x32xf32> to vector<8x32xf32>
    %297 = arith.mulf %295, %296 : vector<8x32xf32>
    %298 = vector.broadcast %277 : vector<1x32xf32> to vector<8x32xf32>
    %299 = arith.addf %297, %298 : vector<8x32xf32>
    %c1_169 = arith.constant 1 : index
    %c0_170 = arith.constant 0 : index
    %c0_171 = arith.constant 0 : index
    %300 = vector.load %arg29[%c1_169, %c0_170, %c0_171] : memref<2x32x96xf32, #tpu.memory_space<vmem>>, vector<1x32x96xf32>
    %301 = vector.shape_cast %300 : vector<1x32x96xf32> to vector<32x96xf32>
    %cst_172 = arith.constant dense<0.000000e+00> : vector<8x96xf32>
    %302 = tpu.matmul %299, %301, %cst_172 {dimension_numbers = #tpu.dot_dimension_numbers<[1], [0], [0], [1], [0, 0, 1, 1], [], []>} : vector<8x32xf32>, vector<32x96xf32>, vector<8x96xf32> -> vector<8x96xf32>
    %c1_173 = arith.constant 1 : index
    %c0_174 = arith.constant 0 : index
    %c0_175 = arith.constant 0 : index
    %303 = vector.load %arg30[%c1_173, %c0_174, %c0_175] : memref<2x1x96xf32, #tpu.memory_space<vmem>>, vector<1x1x96xf32>
    %304 = vector.shape_cast %303 : vector<1x1x96xf32> to vector<1x96xf32>
    %305 = vector.broadcast %304 : vector<1x96xf32> to vector<8x96xf32>
    %306 = arith.addf %302, %305 : vector<8x96xf32>
    %307 = vector.extract_strided_slice %306 {offsets = [0, 0], sizes = [8, 32], strides = [1, 1]} : vector<8x96xf32> to vector<8x32xf32>
    %308 = vector.extract_strided_slice %306 {offsets = [0, 32], sizes = [8, 32], strides = [1, 1]} : vector<8x96xf32> to vector<8x32xf32>
    %309 = vector.extract_strided_slice %306 {offsets = [0, 64], sizes = [8, 32], strides = [1, 1]} : vector<8x96xf32> to vector<8x32xf32>
    %310 = vector.extract_strided_slice %307 {offsets = [0, 0], sizes = [8, 8], strides = [1, 1]} : vector<8x32xf32> to vector<8x8xf32>
    %311 = vector.extract_strided_slice %308 {offsets = [0, 0], sizes = [8, 8], strides = [1, 1]} : vector<8x32xf32> to vector<8x8xf32>
    %cst_176 = arith.constant dense<0.000000e+00> : vector<8x8xf32>
    %312 = tpu.matmul %310, %311, %cst_176 {dimension_numbers = #tpu.dot_dimension_numbers<[1], [1], [0], [0], [0, 0, 1, 0], [], []>} : vector<8x8xf32>, vector<8x8xf32>, vector<8x8xf32> -> vector<8x8xf32>
    %cst_177 = arith.constant 0.353553385 : f32
    %313 = vector.broadcast %cst_177 : f32 to vector<8x8xf32>
    %314 = arith.mulf %312, %313 : vector<8x8xf32>
    %cst_178 = arith.constant dense<0xFF800000> : vector<8xf32>
    %315 = vector.multi_reduction <maximumf>, %314, %cst_178 [1] : vector<8x8xf32> to vector<8xf32>
    %316 = vector.shape_cast %315 : vector<8xf32> to vector<8x1xf32>
    %317 = vector.broadcast %316 : vector<8x1xf32> to vector<8x8xf32>
    %318 = arith.subf %314, %317 : vector<8x8xf32>
    %319 = math.exp %318 : vector<8x8xf32>
    %cst_179 = arith.constant dense<0.000000e+00> : vector<8xf32>
    %320 = vector.multi_reduction <add>, %319, %cst_179 [1] : vector<8x8xf32> to vector<8xf32>
    %321 = vector.shape_cast %320 : vector<8xf32> to vector<8x1xf32>
    %322 = tpu.reciprocal %321 {approx = true} : vector<8x1xf32> -> vector<8x1xf32>
    %323 = vector.broadcast %322 : vector<8x1xf32> to vector<8x8xf32>
    %324 = arith.mulf %319, %323 : vector<8x8xf32>
    %325 = vector.extract_strided_slice %309 {offsets = [0, 0], sizes = [8, 8], strides = [1, 1]} : vector<8x32xf32> to vector<8x8xf32>
    %cst_180 = arith.constant dense<0.000000e+00> : vector<8x8xf32>
    %326 = tpu.matmul %324, %325, %cst_180 {dimension_numbers = #tpu.dot_dimension_numbers<[1], [0], [0], [1], [0, 0, 1, 1], [], []>} : vector<8x8xf32>, vector<8x8xf32>, vector<8x8xf32> -> vector<8x8xf32>
    %327 = vector.extract_strided_slice %307 {offsets = [0, 8], sizes = [8, 8], strides = [1, 1]} : vector<8x32xf32> to vector<8x8xf32>
    %328 = vector.extract_strided_slice %308 {offsets = [0, 8], sizes = [8, 8], strides = [1, 1]} : vector<8x32xf32> to vector<8x8xf32>
    %cst_181 = arith.constant dense<0.000000e+00> : vector<8x8xf32>
    %329 = tpu.matmul %327, %328, %cst_181 {dimension_numbers = #tpu.dot_dimension_numbers<[1], [1], [0], [0], [0, 0, 1, 0], [], []>} : vector<8x8xf32>, vector<8x8xf32>, vector<8x8xf32> -> vector<8x8xf32>
    %cst_182 = arith.constant 0.353553385 : f32
    %330 = vector.broadcast %cst_182 : f32 to vector<8x8xf32>
    %331 = arith.mulf %329, %330 : vector<8x8xf32>
    %cst_183 = arith.constant dense<0xFF800000> : vector<8xf32>
    %332 = vector.multi_reduction <maximumf>, %331, %cst_183 [1] : vector<8x8xf32> to vector<8xf32>
    %333 = vector.shape_cast %332 : vector<8xf32> to vector<8x1xf32>
    %334 = vector.broadcast %333 : vector<8x1xf32> to vector<8x8xf32>
    %335 = arith.subf %331, %334 : vector<8x8xf32>
    %336 = math.exp %335 : vector<8x8xf32>
    %cst_184 = arith.constant dense<0.000000e+00> : vector<8xf32>
    %337 = vector.multi_reduction <add>, %336, %cst_184 [1] : vector<8x8xf32> to vector<8xf32>
    %338 = vector.shape_cast %337 : vector<8xf32> to vector<8x1xf32>
    %339 = tpu.reciprocal %338 {approx = true} : vector<8x1xf32> -> vector<8x1xf32>
    %340 = vector.broadcast %339 : vector<8x1xf32> to vector<8x8xf32>
    %341 = arith.mulf %336, %340 : vector<8x8xf32>
    %342 = vector.extract_strided_slice %309 {offsets = [0, 8], sizes = [8, 8], strides = [1, 1]} : vector<8x32xf32> to vector<8x8xf32>
    %cst_185 = arith.constant dense<0.000000e+00> : vector<8x8xf32>
    %343 = tpu.matmul %341, %342, %cst_185 {dimension_numbers = #tpu.dot_dimension_numbers<[1], [0], [0], [1], [0, 0, 1, 1], [], []>} : vector<8x8xf32>, vector<8x8xf32>, vector<8x8xf32> -> vector<8x8xf32>
    %344 = vector.extract_strided_slice %307 {offsets = [0, 16], sizes = [8, 8], strides = [1, 1]} : vector<8x32xf32> to vector<8x8xf32>
    %345 = vector.extract_strided_slice %308 {offsets = [0, 16], sizes = [8, 8], strides = [1, 1]} : vector<8x32xf32> to vector<8x8xf32>
    %cst_186 = arith.constant dense<0.000000e+00> : vector<8x8xf32>
    %346 = tpu.matmul %344, %345, %cst_186 {dimension_numbers = #tpu.dot_dimension_numbers<[1], [1], [0], [0], [0, 0, 1, 0], [], []>} : vector<8x8xf32>, vector<8x8xf32>, vector<8x8xf32> -> vector<8x8xf32>
    %cst_187 = arith.constant 0.353553385 : f32
    %347 = vector.broadcast %cst_187 : f32 to vector<8x8xf32>
    %348 = arith.mulf %346, %347 : vector<8x8xf32>
    %cst_188 = arith.constant dense<0xFF800000> : vector<8xf32>
    %349 = vector.multi_reduction <maximumf>, %348, %cst_188 [1] : vector<8x8xf32> to vector<8xf32>
    %350 = vector.shape_cast %349 : vector<8xf32> to vector<8x1xf32>
    %351 = vector.broadcast %350 : vector<8x1xf32> to vector<8x8xf32>
    %352 = arith.subf %348, %351 : vector<8x8xf32>
    %353 = math.exp %352 : vector<8x8xf32>
    %cst_189 = arith.constant dense<0.000000e+00> : vector<8xf32>
    %354 = vector.multi_reduction <add>, %353, %cst_189 [1] : vector<8x8xf32> to vector<8xf32>
    %355 = vector.shape_cast %354 : vector<8xf32> to vector<8x1xf32>
    %356 = tpu.reciprocal %355 {approx = true} : vector<8x1xf32> -> vector<8x1xf32>
    %357 = vector.broadcast %356 : vector<8x1xf32> to vector<8x8xf32>
    %358 = arith.mulf %353, %357 : vector<8x8xf32>
    %359 = vector.extract_strided_slice %309 {offsets = [0, 16], sizes = [8, 8], strides = [1, 1]} : vector<8x32xf32> to vector<8x8xf32>
    %cst_190 = arith.constant dense<0.000000e+00> : vector<8x8xf32>
    %360 = tpu.matmul %358, %359, %cst_190 {dimension_numbers = #tpu.dot_dimension_numbers<[1], [0], [0], [1], [0, 0, 1, 1], [], []>} : vector<8x8xf32>, vector<8x8xf32>, vector<8x8xf32> -> vector<8x8xf32>
    %361 = vector.extract_strided_slice %307 {offsets = [0, 24], sizes = [8, 8], strides = [1, 1]} : vector<8x32xf32> to vector<8x8xf32>
    %362 = vector.extract_strided_slice %308 {offsets = [0, 24], sizes = [8, 8], strides = [1, 1]} : vector<8x32xf32> to vector<8x8xf32>
    %cst_191 = arith.constant dense<0.000000e+00> : vector<8x8xf32>
    %363 = tpu.matmul %361, %362, %cst_191 {dimension_numbers = #tpu.dot_dimension_numbers<[1], [1], [0], [0], [0, 0, 1, 0], [], []>} : vector<8x8xf32>, vector<8x8xf32>, vector<8x8xf32> -> vector<8x8xf32>
    %cst_192 = arith.constant 0.353553385 : f32
    %364 = vector.broadcast %cst_192 : f32 to vector<8x8xf32>
    %365 = arith.mulf %363, %364 : vector<8x8xf32>
    %cst_193 = arith.constant dense<0xFF800000> : vector<8xf32>
    %366 = vector.multi_reduction <maximumf>, %365, %cst_193 [1] : vector<8x8xf32> to vector<8xf32>
    %367 = vector.shape_cast %366 : vector<8xf32> to vector<8x1xf32>
    %368 = vector.broadcast %367 : vector<8x1xf32> to vector<8x8xf32>
    %369 = arith.subf %365, %368 : vector<8x8xf32>
    %370 = math.exp %369 : vector<8x8xf32>
    %cst_194 = arith.constant dense<0.000000e+00> : vector<8xf32>
    %371 = vector.multi_reduction <add>, %370, %cst_194 [1] : vector<8x8xf32> to vector<8xf32>
    %372 = vector.shape_cast %371 : vector<8xf32> to vector<8x1xf32>
    %373 = tpu.reciprocal %372 {approx = true} : vector<8x1xf32> -> vector<8x1xf32>
    %374 = vector.broadcast %373 : vector<8x1xf32> to vector<8x8xf32>
    %375 = arith.mulf %370, %374 : vector<8x8xf32>
    %376 = vector.extract_strided_slice %309 {offsets = [0, 24], sizes = [8, 8], strides = [1, 1]} : vector<8x32xf32> to vector<8x8xf32>
    %cst_195 = arith.constant dense<0.000000e+00> : vector<8x8xf32>
    %377 = tpu.matmul %375, %376, %cst_195 {dimension_numbers = #tpu.dot_dimension_numbers<[1], [0], [0], [1], [0, 0, 1, 1], [], []>} : vector<8x8xf32>, vector<8x8xf32>, vector<8x8xf32> -> vector<8x8xf32>
    %378 = tpu.concatenate %326, %343, %360, %377 in 1 : vector<8x8xf32>, vector<8x8xf32>, vector<8x8xf32>, vector<8x8xf32> -> vector<8x32xf32>
    %c1_196 = arith.constant 1 : index
    %c0_197 = arith.constant 0 : index
    %c0_198 = arith.constant 0 : index
    %379 = vector.load %arg31[%c1_196, %c0_197, %c0_198] : memref<2x32x32xf32, #tpu.memory_space<vmem>>, vector<1x32x32xf32>
    %380 = vector.shape_cast %379 : vector<1x32x32xf32> to vector<32x32xf32>
    %cst_199 = arith.constant dense<0.000000e+00> : vector<8x32xf32>
    %381 = tpu.matmul %378, %380, %cst_199 {dimension_numbers = #tpu.dot_dimension_numbers<[1], [0], [0], [1], [0, 0, 1, 1], [], []>} : vector<8x32xf32>, vector<32x32xf32>, vector<8x32xf32> -> vector<8x32xf32>
    %382 = arith.addf %273, %381 : vector<8x32xf32>
    %c1_200 = arith.constant 1 : index
    %c0_201 = arith.constant 0 : index
    %c0_202 = arith.constant 0 : index
    %383 = vector.load %arg32[%c1_200, %c0_201, %c0_202] : memref<2x1x32xf32, #tpu.memory_space<vmem>>, vector<1x1x32xf32>
    %384 = vector.shape_cast %383 : vector<1x1x32xf32> to vector<1x32xf32>
    %385 = vector.broadcast %384 : vector<1x32xf32> to vector<8x32xf32>
    %386 = arith.addf %382, %385 : vector<8x32xf32>
    %c1_203 = arith.constant 1 : index
    %c0_204 = arith.constant 0 : index
    %c0_205 = arith.constant 0 : index
    %387 = vector.load %arg33[%c1_203, %c0_204, %c0_205] : memref<2x1x32xf32, #tpu.memory_space<vmem>>, vector<1x1x32xf32>
    %388 = vector.shape_cast %387 : vector<1x1x32xf32> to vector<1x32xf32>
    %c1_206 = arith.constant 1 : index
    %c0_207 = arith.constant 0 : index
    %c0_208 = arith.constant 0 : index
    %389 = vector.load %arg34[%c1_206, %c0_207, %c0_208] : memref<2x1x32xf32, #tpu.memory_space<vmem>>, vector<1x1x32xf32>
    %390 = vector.shape_cast %389 : vector<1x1x32xf32> to vector<1x32xf32>
    %cst_209 = arith.constant dense<0.000000e+00> : vector<8xf32>
    %391 = vector.multi_reduction <add>, %386, %cst_209 [1] : vector<8x32xf32> to vector<8xf32>
    %392 = vector.shape_cast %391 : vector<8xf32> to vector<8x1xf32>
    %cst_210 = arith.constant 3.200000e+01 : f32
    %393 = vector.broadcast %cst_210 : f32 to vector<8x1xf32>
    %394 = arith.divf %392, %393 : vector<8x1xf32>
    %395 = vector.broadcast %394 : vector<8x1xf32> to vector<8x32xf32>
    %396 = arith.subf %386, %395 : vector<8x32xf32>
    %397 = arith.mulf %396, %396 : vector<8x32xf32>
    %cst_211 = arith.constant dense<0.000000e+00> : vector<8xf32>
    %398 = vector.multi_reduction <add>, %397, %cst_211 [1] : vector<8x32xf32> to vector<8xf32>
    %399 = vector.shape_cast %398 : vector<8xf32> to vector<8x1xf32>
    %cst_212 = arith.constant 3.200000e+01 : f32
    %400 = vector.broadcast %cst_212 : f32 to vector<8x1xf32>
    %401 = arith.divf %399, %400 : vector<8x1xf32>
    %402 = vector.broadcast %394 : vector<8x1xf32> to vector<8x32xf32>
    %403 = arith.subf %386, %402 : vector<8x32xf32>
    %cst_213 = arith.constant 9.99999974E-6 : f32
    %404 = vector.broadcast %cst_213 : f32 to vector<8x1xf32>
    %405 = arith.addf %401, %404 : vector<8x1xf32>
    %406 = math.rsqrt %405 : vector<8x1xf32>
    %407 = vector.broadcast %406 : vector<8x1xf32> to vector<8x32xf32>
    %408 = arith.mulf %403, %407 : vector<8x32xf32>
    %409 = vector.broadcast %388 : vector<1x32xf32> to vector<8x32xf32>
    %410 = arith.mulf %408, %409 : vector<8x32xf32>
    %411 = vector.broadcast %390 : vector<1x32xf32> to vector<8x32xf32>
    %412 = arith.addf %410, %411 : vector<8x32xf32>
    %c1_214 = arith.constant 1 : index
    %c0_215 = arith.constant 0 : index
    %c0_216 = arith.constant 0 : index
    %413 = vector.load %arg35[%c1_214, %c0_215, %c0_216] : memref<2x32x64xf32, #tpu.memory_space<vmem>>, vector<1x32x64xf32>
    %414 = vector.shape_cast %413 : vector<1x32x64xf32> to vector<32x64xf32>
    %cst_217 = arith.constant dense<0.000000e+00> : vector<8x64xf32>
    %415 = tpu.matmul %412, %414, %cst_217 {dimension_numbers = #tpu.dot_dimension_numbers<[1], [0], [0], [1], [0, 0, 1, 1], [], []>} : vector<8x32xf32>, vector<32x64xf32>, vector<8x64xf32> -> vector<8x64xf32>
    %c1_218 = arith.constant 1 : index
    %c0_219 = arith.constant 0 : index
    %c0_220 = arith.constant 0 : index
    %416 = vector.load %arg36[%c1_218, %c0_219, %c0_220] : memref<2x1x64xf32, #tpu.memory_space<vmem>>, vector<1x1x64xf32>
    %417 = vector.shape_cast %416 : vector<1x1x64xf32> to vector<1x64xf32>
    %418 = vector.broadcast %417 : vector<1x64xf32> to vector<8x64xf32>
    %419 = arith.addf %415, %418 : vector<8x64xf32>
    %cst_221 = arith.constant 0.000000e+00 : f32
    %420 = vector.broadcast %cst_221 : f32 to vector<8x64xf32>
    %421 = arith.maximumf %419, %420 : vector<8x64xf32>
    %c1_222 = arith.constant 1 : index
    %c0_223 = arith.constant 0 : index
    %c0_224 = arith.constant 0 : index
    %422 = vector.load %arg37[%c1_222, %c0_223, %c0_224] : memref<2x64x32xf32, #tpu.memory_space<vmem>>, vector<1x64x32xf32>
    %423 = vector.shape_cast %422 : vector<1x64x32xf32> to vector<64x32xf32>
    %cst_225 = arith.constant dense<0.000000e+00> : vector<8x32xf32>
    %424 = tpu.matmul %421, %423, %cst_225 {dimension_numbers = #tpu.dot_dimension_numbers<[1], [0], [0], [1], [0, 0, 1, 1], [], []>} : vector<8x64xf32>, vector<64x32xf32>, vector<8x32xf32> -> vector<8x32xf32>
    %c1_226 = arith.constant 1 : index
    %c0_227 = arith.constant 0 : index
    %c0_228 = arith.constant 0 : index
    %425 = vector.load %arg38[%c1_226, %c0_227, %c0_228] : memref<2x1x32xf32, #tpu.memory_space<vmem>>, vector<1x1x32xf32>
    %426 = vector.shape_cast %425 : vector<1x1x32xf32> to vector<1x32xf32>
    %427 = vector.broadcast %426 : vector<1x32xf32> to vector<8x32xf32>
    %428 = arith.addf %424, %427 : vector<8x32xf32>
    %429 = arith.addf %386, %428 : vector<8x32xf32>
    %cst_229 = arith.constant dense<0.000000e+00> : vector<16x32xf32>
    %430 = tpu.matmul %116, %429, %cst_229 {dimension_numbers = #tpu.dot_dimension_numbers<[1], [0], [0], [1], [0, 0, 1, 1], [], []>} : vector<16x8xf32>, vector<8x32xf32>, vector<16x32xf32> -> vector<16x32xf32>
    %c0_230 = arith.constant 0 : index
    %c0_231 = arith.constant 0 : index
    %431 = vector.load %arg21[%c0_230, %c0_231] : memref<32x32xf32, #tpu.memory_space<vmem>>, vector<32x32xf32>
    %cst_232 = arith.constant dense<0.000000e+00> : vector<16x32xf32>
    %432 = tpu.matmul %430, %431, %cst_232 {dimension_numbers = #tpu.dot_dimension_numbers<[1], [0], [0], [1], [0, 0, 1, 1], [], []>} : vector<16x32xf32>, vector<32x32xf32>, vector<16x32xf32> -> vector<16x32xf32>
    %c0_233 = arith.constant 0 : index
    %c0_234 = arith.constant 0 : index
    %433 = vector.load %arg22[%c0_233, %c0_234] : memref<1x32xf32, #tpu.memory_space<vmem>>, vector<1x32xf32>
    %434 = vector.broadcast %433 : vector<1x32xf32> to vector<16x32xf32>
    %435 = arith.addf %432, %434 : vector<16x32xf32>
    %cst_235 = arith.constant 0.000000e+00 : f32
    %436 = vector.broadcast %cst_235 : f32 to vector<16x32xf32>
    %437 = arith.maximumf %435, %436 : vector<16x32xf32>
    %c0_236 = arith.constant 0 : index
    %c0_237 = arith.constant 0 : index
    %c0_238 = arith.constant 0 : index
    %438 = vector.load %arg23[%c0_236, %c0_237, %c0_238] : memref<2x32x32xf32, #tpu.memory_space<vmem>>, vector<1x32x32xf32>
    %439 = vector.shape_cast %438 : vector<1x32x32xf32> to vector<32x32xf32>
    %cst_239 = arith.constant dense<0.000000e+00> : vector<16x32xf32>
    %440 = tpu.matmul %437, %439, %cst_239 {dimension_numbers = #tpu.dot_dimension_numbers<[1], [0], [0], [1], [0, 0, 1, 1], [], []>} : vector<16x32xf32>, vector<32x32xf32>, vector<16x32xf32> -> vector<16x32xf32>
    %c0_240 = arith.constant 0 : index
    %c0_241 = arith.constant 0 : index
    %c0_242 = arith.constant 0 : index
    %441 = vector.load %arg24[%c0_240, %c0_241, %c0_242] : memref<2x1x32xf32, #tpu.memory_space<vmem>>, vector<1x1x32xf32>
    %442 = vector.shape_cast %441 : vector<1x1x32xf32> to vector<1x32xf32>
    %443 = vector.broadcast %442 : vector<1x32xf32> to vector<16x32xf32>
    %444 = arith.addf %440, %443 : vector<16x32xf32>
    %cst_243 = arith.constant 0.000000e+00 : f32
    %445 = vector.broadcast %cst_243 : f32 to vector<16x32xf32>
    %446 = arith.maximumf %444, %445 : vector<16x32xf32>
    %447 = arith.addf %437, %446 : vector<16x32xf32>
    %c1_244 = arith.constant 1 : index
    %c0_245 = arith.constant 0 : index
    %c0_246 = arith.constant 0 : index
    %448 = vector.load %arg23[%c1_244, %c0_245, %c0_246] : memref<2x32x32xf32, #tpu.memory_space<vmem>>, vector<1x32x32xf32>
    %449 = vector.shape_cast %448 : vector<1x32x32xf32> to vector<32x32xf32>
    %cst_247 = arith.constant dense<0.000000e+00> : vector<16x32xf32>
    %450 = tpu.matmul %447, %449, %cst_247 {dimension_numbers = #tpu.dot_dimension_numbers<[1], [0], [0], [1], [0, 0, 1, 1], [], []>} : vector<16x32xf32>, vector<32x32xf32>, vector<16x32xf32> -> vector<16x32xf32>
    %c1_248 = arith.constant 1 : index
    %c0_249 = arith.constant 0 : index
    %c0_250 = arith.constant 0 : index
    %451 = vector.load %arg24[%c1_248, %c0_249, %c0_250] : memref<2x1x32xf32, #tpu.memory_space<vmem>>, vector<1x1x32xf32>
    %452 = vector.shape_cast %451 : vector<1x1x32xf32> to vector<1x32xf32>
    %453 = vector.broadcast %452 : vector<1x32xf32> to vector<16x32xf32>
    %454 = arith.addf %450, %453 : vector<16x32xf32>
    %cst_251 = arith.constant 0.000000e+00 : f32
    %455 = vector.broadcast %cst_251 : f32 to vector<16x32xf32>
    %456 = arith.maximumf %454, %455 : vector<16x32xf32>
    %457 = arith.addf %447, %456 : vector<16x32xf32>
    %c0_252 = arith.constant 0 : index
    %c0_253 = arith.constant 0 : index
    %458 = vector.load %arg25[%c0_252, %c0_253] : memref<32x128xf32, #tpu.memory_space<vmem>>, vector<32x128xf32>
    %cst_254 = arith.constant dense<0.000000e+00> : vector<16x128xf32>
    %459 = tpu.matmul %457, %458, %cst_254 {dimension_numbers = #tpu.dot_dimension_numbers<[1], [0], [0], [1], [0, 0, 1, 1], [], []>} : vector<16x32xf32>, vector<32x128xf32>, vector<16x128xf32> -> vector<16x128xf32>
    %c0_255 = arith.constant 0 : index
    %c0_256 = arith.constant 0 : index
    %460 = vector.load %arg26[%c0_255, %c0_256] : memref<1x128xf32, #tpu.memory_space<vmem>>, vector<1x128xf32>
    %461 = vector.broadcast %460 : vector<1x128xf32> to vector<16x128xf32>
    %462 = arith.addf %459, %461 : vector<16x128xf32>
    %c0_257 = arith.constant 0 : index
    %c0_258 = arith.constant 0 : index
    %463 = vector.load %arg39[%c0_257, %c0_258] : memref<16x128xf32, #tpu.memory_space<vmem>>, vector<16x128xf32>
    tpu.vector_store %arg39[%c0_257, %c0_258], %462 {strides = array<i32>} : memref<16x128xf32, #tpu.memory_space<vmem>>, vector<16x128xf32>,
    return
  }
  func.func @transform_0(%arg0: i32) -> (i32, i32) {
    %c0_i32 = arith.constant 0 : i32
    %c0_i32_0 = arith.constant 0 : i32
    return %arg0, %c0_i32 : i32, i32
  }
  func.func @transform_1(%arg0: i32) -> (i32, i32) {
    %c0_i32 = arith.constant 0 : i32
    %c0_i32_0 = arith.constant 0 : i32
    return %arg0, %c0_i32 : i32, i32
  }
  func.func @transform_2(%arg0: i32) -> (i32, i32) {
    %c0_i32 = arith.constant 0 : i32
    %c0_i32_0 = arith.constant 0 : i32
    %c0_i32_1 = arith.constant 0 : i32
    return %c0_i32, %c0_i32_0 : i32, i32
  }
  func.func @transform_3(%arg0: i32) -> (i32, i32) {
    %c0_i32 = arith.constant 0 : i32
    %c0_i32_0 = arith.constant 0 : i32
    %c0_i32_1 = arith.constant 0 : i32
    return %c0_i32, %c0_i32_0 : i32, i32
  }
  func.func @transform_4(%arg0: i32) -> (i32, i32, i32) {
    %c0_i32 = arith.constant 0 : i32
    %c0_i32_0 = arith.constant 0 : i32
    %c0_i32_1 = arith.constant 0 : i32
    %c0_i32_2 = arith.constant 0 : i32
    return %c0_i32, %c0_i32_0, %c0_i32_1 : i32, i32, i32
  }
  func.func @transform_5(%arg0: i32) -> (i32, i32, i32) {
    %c0_i32 = arith.constant 0 : i32
    %c0_i32_0 = arith.constant 0 : i32
    %c0_i32_1 = arith.constant 0 : i32
    %c0_i32_2 = arith.constant 0 : i32
    return %c0_i32, %c0_i32_0, %c0_i32_1 : i32, i32, i32
  }
  func.func @transform_6(%arg0: i32) -> (i32, i32) {
    %c0_i32 = arith.constant 0 : i32
    %c0_i32_0 = arith.constant 0 : i32
    %c0_i32_1 = arith.constant 0 : i32
    return %c0_i32, %c0_i32_0 : i32, i32
  }
  func.func @transform_7(%arg0: i32) -> (i32, i32) {
    %c0_i32 = arith.constant 0 : i32
    %c0_i32_0 = arith.constant 0 : i32
    %c0_i32_1 = arith.constant 0 : i32
    return %c0_i32, %c0_i32_0 : i32, i32
  }
  func.func @transform_8(%arg0: i32) -> (i32, i32) {
    %c0_i32 = arith.constant 0 : i32
    %c0_i32_0 = arith.constant 0 : i32
    %c0_i32_1 = arith.constant 0 : i32
    return %c0_i32, %c0_i32_0 : i32, i32
  }
  func.func @transform_9(%arg0: i32) -> (i32, i32) {
    %c0_i32 = arith.constant 0 : i32
    %c0_i32_0 = arith.constant 0 : i32
    %c0_i32_1 = arith.constant 0 : i32
    return %c0_i32, %c0_i32_0 : i32, i32
  }
  func.func @transform_10(%arg0: i32) -> (i32, i32, i32) {
    %c0_i32 = arith.constant 0 : i32
    %c0_i32_0 = arith.constant 0 : i32
    %c0_i32_1 = arith.constant 0 : i32
    %c0_i32_2 = arith.constant 0 : i32
    return %c0_i32, %c0_i32_0, %c0_i32_1 : i32, i32, i32
  }
  func.func @transform_11(%arg0: i32) -> (i32, i32, i32) {
    %c0_i32 = arith.constant 0 : i32
    %c0_i32_0 = arith.constant 0 : i32
    %c0_i32_1 = arith.constant 0 : i32
    %c0_i32_2 = arith.constant 0 : i32
    return %c0_i32, %c0_i32_0, %c0_i32_1 : i32, i32, i32
  }
  func.func @transform_12(%arg0: i32) -> (i32, i32) {
    %c0_i32 = arith.constant 0 : i32
    %c0_i32_0 = arith.constant 0 : i32
    %c0_i32_1 = arith.constant 0 : i32
    return %c0_i32, %c0_i32_0 : i32, i32
  }
  func.func @transform_13(%arg0: i32) -> (i32, i32) {
    %c0_i32 = arith.constant 0 : i32
    %c0_i32_0 = arith.constant 0 : i32
    %c0_i32_1 = arith.constant 0 : i32
    return %c0_i32, %c0_i32_0 : i32, i32
  }
  func.func @transform_14(%arg0: i32) -> (i32, i32) {
    %c0_i32 = arith.constant 0 : i32
    %c0_i32_0 = arith.constant 0 : i32
    %c0_i32_1 = arith.constant 0 : i32
    return %c0_i32, %c0_i32_0 : i32, i32
  }
  func.func @transform_15(%arg0: i32) -> (i32, i32) {
    %c0_i32 = arith.constant 0 : i32
    %c0_i32_0 = arith.constant 0 : i32
    %c0_i32_1 = arith.constant 0 : i32
    return %c0_i32, %c0_i32_0 : i32, i32
  }
  func.func @transform_16(%arg0: i32) -> (i32, i32, i32) {
    %c0_i32 = arith.constant 0 : i32
    %c0_i32_0 = arith.constant 0 : i32
    %c0_i32_1 = arith.constant 0 : i32
    %c0_i32_2 = arith.constant 0 : i32
    return %c0_i32, %c0_i32_0, %c0_i32_1 : i32, i32, i32
  }
  func.func @transform_17(%arg0: i32) -> (i32, i32, i32) {
    %c0_i32 = arith.constant 0 : i32
    %c0_i32_0 = arith.constant 0 : i32
    %c0_i32_1 = arith.constant 0 : i32
    %c0_i32_2 = arith.constant 0 : i32
    return %c0_i32, %c0_i32_0, %c0_i32_1 : i32, i32, i32
  }
  func.func @transform_18(%arg0: i32) -> (i32, i32) {
    %c0_i32 = arith.constant 0 : i32
    %c0_i32_0 = arith.constant 0 : i32
    %c0_i32_1 = arith.constant 0 : i32
    return %c0_i32, %c0_i32_0 : i32, i32
  }
  func.func @transform_19(%arg0: i32) -> (i32, i32) {
    %c0_i32 = arith.constant 0 : i32
    %c0_i32_0 = arith.constant 0 : i32
    %c0_i32_1 = arith.constant 0 : i32
    return %c0_i32, %c0_i32_0 : i32, i32
  }
  func.func @transform_20(%arg0: i32) -> (i32, i32) {
    %c0_i32 = arith.constant 0 : i32
    %c0_i32_0 = arith.constant 0 : i32
    %c0_i32_1 = arith.constant 0 : i32
    return %c0_i32, %c0_i32_0 : i32, i32
  }
  func.func @transform_21(%arg0: i32) -> (i32, i32) {
    %c0_i32 = arith.constant 0 : i32
    %c0_i32_0 = arith.constant 0 : i32
    %c0_i32_1 = arith.constant 0 : i32
    return %c0_i32, %c0_i32_0 : i32, i32
  }
  func.func @transform_22(%arg0: i32) -> (i32, i32, i32) {
    %c0_i32 = arith.constant 0 : i32
    %c0_i32_0 = arith.constant 0 : i32
    %c0_i32_1 = arith.constant 0 : i32
    %c0_i32_2 = arith.constant 0 : i32
    return %c0_i32, %c0_i32_0, %c0_i32_1 : i32, i32, i32
  }
  func.func @transform_23(%arg0: i32) -> (i32, i32, i32) {
    %c0_i32 = arith.constant 0 : i32
    %c0_i32_0 = arith.constant 0 : i32
    %c0_i32_1 = arith.constant 0 : i32
    %c0_i32_2 = arith.constant 0 : i32
    return %c0_i32, %c0_i32_0, %c0_i32_1 : i32, i32, i32
  }
  func.func @transform_24(%arg0: i32) -> (i32, i32) {
    %c0_i32 = arith.constant 0 : i32
    %c0_i32_0 = arith.constant 0 : i32
    %c0_i32_1 = arith.constant 0 : i32
    return %c0_i32, %c0_i32_0 : i32, i32
  }
  func.func @transform_25(%arg0: i32) -> (i32, i32) {
    %c0_i32 = arith.constant 0 : i32
    %c0_i32_0 = arith.constant 0 : i32
    %c0_i32_1 = arith.constant 0 : i32
    return %c0_i32, %c0_i32_0 : i32, i32
  }
  func.func @transform_26(%arg0: i32) -> (i32, i32, i32) {
    %c0_i32 = arith.constant 0 : i32
    %c0_i32_0 = arith.constant 0 : i32
    %c0_i32_1 = arith.constant 0 : i32
    %c0_i32_2 = arith.constant 0 : i32
    return %c0_i32, %c0_i32_0, %c0_i32_1 : i32, i32, i32
  }
  func.func @transform_27(%arg0: i32) -> (i32, i32, i32) {
    %c0_i32 = arith.constant 0 : i32
    %c0_i32_0 = arith.constant 0 : i32
    %c0_i32_1 = arith.constant 0 : i32
    %c0_i32_2 = arith.constant 0 : i32
    return %c0_i32, %c0_i32_0, %c0_i32_1 : i32, i32, i32
  }
  func.func @transform_28(%arg0: i32) -> (i32, i32, i32) {
    %c0_i32 = arith.constant 0 : i32
    %c0_i32_0 = arith.constant 0 : i32
    %c0_i32_1 = arith.constant 0 : i32
    %c0_i32_2 = arith.constant 0 : i32
    return %c0_i32, %c0_i32_0, %c0_i32_1 : i32, i32, i32
  }
  func.func @transform_29(%arg0: i32) -> (i32, i32, i32) {
    %c0_i32 = arith.constant 0 : i32
    %c0_i32_0 = arith.constant 0 : i32
    %c0_i32_1 = arith.constant 0 : i32
    %c0_i32_2 = arith.constant 0 : i32
    return %c0_i32, %c0_i32_0, %c0_i32_1 : i32, i32, i32
  }
  func.func @transform_30(%arg0: i32) -> (i32, i32, i32) {
    %c0_i32 = arith.constant 0 : i32
    %c0_i32_0 = arith.constant 0 : i32
    %c0_i32_1 = arith.constant 0 : i32
    %c0_i32_2 = arith.constant 0 : i32
    return %c0_i32, %c0_i32_0, %c0_i32_1 : i32, i32, i32
  }
  func.func @transform_31(%arg0: i32) -> (i32, i32, i32) {
    %c0_i32 = arith.constant 0 : i32
    %c0_i32_0 = arith.constant 0 : i32
    %c0_i32_1 = arith.constant 0 : i32
    %c0_i32_2 = arith.constant 0 : i32
    return %c0_i32, %c0_i32_0, %c0_i32_1 : i32, i32, i32
  }
  func.func @transform_32(%arg0: i32) -> (i32, i32, i32) {
    %c0_i32 = arith.constant 0 : i32
    %c0_i32_0 = arith.constant 0 : i32
    %c0_i32_1 = arith.constant 0 : i32
    %c0_i32_2 = arith.constant 0 : i32
    return %c0_i32, %c0_i32_0, %c0_i32_1 : i32, i32, i32
  }
  func.func @transform_33(%arg0: i32) -> (i32, i32, i32) {
    %c0_i32 = arith.constant 0 : i32
    %c0_i32_0 = arith.constant 0 : i32
    %c0_i32_1 = arith.constant 0 : i32
    %c0_i32_2 = arith.constant 0 : i32
    return %c0_i32, %c0_i32_0, %c0_i32_1 : i32, i32, i32
  }
  func.func @transform_34(%arg0: i32) -> (i32, i32, i32) {
    %c0_i32 = arith.constant 0 : i32
    %c0_i32_0 = arith.constant 0 : i32
    %c0_i32_1 = arith.constant 0 : i32
    %c0_i32_2 = arith.constant 0 : i32
    return %c0_i32, %c0_i32_0, %c0_i32_1 : i32, i32, i32
  }
  func.func @transform_35(%arg0: i32) -> (i32, i32, i32) {
    %c0_i32 = arith.constant 0 : i32
    %c0_i32_0 = arith.constant 0 : i32
    %c0_i32_1 = arith.constant 0 : i32
    %c0_i32_2 = arith.constant 0 : i32
    return %c0_i32, %c0_i32_0, %c0_i32_1 : i32, i32, i32
  }
  func.func @transform_36(%arg0: i32) -> (i32, i32, i32) {
    %c0_i32 = arith.constant 0 : i32
    %c0_i32_0 = arith.constant 0 : i32
    %c0_i32_1 = arith.constant 0 : i32
    %c0_i32_2 = arith.constant 0 : i32
    return %c0_i32, %c0_i32_0, %c0_i32_1 : i32, i32, i32
  }
  func.func @transform_37(%arg0: i32) -> (i32, i32, i32) {
    %c0_i32 = arith.constant 0 : i32
    %c0_i32_0 = arith.constant 0 : i32
    %c0_i32_1 = arith.constant 0 : i32
    %c0_i32_2 = arith.constant 0 : i32
    return %c0_i32, %c0_i32_0, %c0_i32_1 : i32, i32, i32
  }
  func.func @transform_38(%arg0: i32) -> (i32, i32) {
    %c0_i32 = arith.constant 0 : i32
    %c0_i32_0 = arith.constant 0 : i32
    return %arg0, %c0_i32 : i32, i32
  }
}

</mosaic_0001>

<bundles_post_ra>
// kernel: tpu_custom_call.1
= control target key start
LH: loop header
LB: loop body
LE: loop exit
PB: predicated region body
PF: predicated region fallthrough
CT: control target
= control target key end

     0   :  { %s7292_s6 = smov 1   ;;  %s7293_s10 = smov 2   ;;  %s8245_s0 = inlined_call_operand.smem [shape: u32[39], index: -1, kind: input, shape index: {}] }
   0x1   :  { %s7378_s5 = sld [smem:[%s8245_s0]]   ;;  %s7294_s14 = smov 3  }
   0x2   :  { %s7383_s9 = sld [smem:[%s8245_s0 + %s7292_s6]]   ;;  %s7295_s18 = smov 4  }
   0x3   :  { %s7388_s13 = sld [smem:[%s8245_s0 + %s7293_s10]]   ;;  %s7296_s22 = smov 5  }
   0x4   :  { %s7393_s17 = sld [smem:[%s8245_s0 + %s7294_s14]]   ;;  %s7297_s26 = smov 6  }
   0x5   :  { %s7398_s21 = sld [smem:[%s8245_s0 + %s7295_s18]]   ;;  %s7298_s30 = smov 7  }
   0x6   :  { %s7403_s25 = sld [smem:[%s8245_s0 + %s7296_s22]]   ;;  %s7299_s4 = smov 8  }
   0x7   :  { %8297 = sst [smem:[#allocation43_spill]] %s7378_s5  ;;  %s7300_s10 = smov 9  }
   0x8   :  { %8298 = sst [smem:[#allocation44_spill]] %s7383_s9  ;;  %s7301_s15 = smov 10  }
   0x9   :  { %s7408_s29 = sld [smem:[%s8245_s0 + %s7297_s26]]   ;;  %s7302_s20 = smov 11  }
   0xa   :  { %8299 = sst [smem:[#allocation45_spill]] %s7393_s17  ;;  %s7303_s26 = smov 12  }
   0xb   :  { %8300 = sst [smem:[#allocation46_spill]] %s7398_s21  ;;  %s7304_s1 = smov 13  }
   0xc   :  { %s7413_s3 = sld [smem:[%s8245_s0 + %s7298_s30]]   ;;  %s7305_s7 = smov 14  }
   0xd   :  { %s7418_s8 = sld [smem:[%s8245_s0 + %s7299_s4]]   ;;  %s7307_s22 = smov 16  }
   0xe   :  { %s7423_s14 = sld [smem:[%s8245_s0 + %s7300_s10]]   ;;  %s7308_s28 = smov 17  }
   0xf   :  { %s7428_s19 = sld [smem:[%s8245_s0 + %s7301_s15]]   ;;  %s7306_s15 = smov 15  }
  0x10   :  { %s7433_s24 = sld [smem:[%s8245_s0 + %s7302_s20]]  }
  0x11   :  { %s7438_s30 = sld [smem:[%s8245_s0 + %s7303_s26]]  }
  0x12   :  { %8301 = sst [smem:[#allocation47_spill]] %s7413_s3 }
  0x13   :  { %8302 = sst [smem:[#allocation48_spill]] %s7418_s8 }
  0x14   :  { %s7443_s6 = sld [smem:[%s8245_s0 + %s7304_s1]]  }
  0x15   :  { %8303 = sst [smem:[#allocation49_spill]] %s7428_s19 }
  0x16   :  { %8304 = sst [smem:[#allocation50_spill]] %s7433_s24 }
  0x17   :  { %s7448_s12 = sld [smem:[%s8245_s0 + %s7305_s7]]   ;;  %s7309_s7 = smov 18  }
  0x18   :  { %s7453_s20 = sld [smem:[%s8245_s0 + %s7306_s15]]   ;;  %s7310_s15 = smov 19  }
  0x19   :  { %s7458_s27 = sld [smem:[%s8245_s0 + %s7307_s22]]   ;;  %s7311_s22 = smov 20  }
  0x1a   :  { %8305 = sst [smem:[#allocation51_spill]] %s7443_s6 }
  0x1b   :  { %s7463_s4 = sld [smem:[%s8245_s0 + %s7308_s28]]   ;;  %s7312_s28 = smov 21  }
  0x1c   :  { %s7468_s19 = sld [smem:[%s8245_s0 + %s7309_s7]]   ;;  %s7313_s7 = smov 22  }
  0x1d   :  { %s7473_s9 = sld [smem:[%s8245_s0 + %s7310_s15]]   ;;  %s7314_s15 = smov 23  }
  0x1e   :  { %s7493_s21 = sld [smem:[%s8245_s0 + %s7314_s15]]   ;;  %s7318_s15 = smov 27  }
  0x1f   :  { %8306 = sst [smem:[#allocation52_spill]] %s7458_s27 }
  0x20   :  { %s7478_s27 = sld [smem:[%s8245_s0 + %s7311_s22]]   ;;  %s7315_s22 = smov 24  }
  0x21   :  { %8307 = sst [smem:[#allocation53_spill]] %s7463_s4 }
  0x22   :  { %8308 = sst [smem:[#allocation54_spill]] %s7468_s19 }
  0x23   :  { %8309 = sst [smem:[#allocation55_spill]] %s7473_s9 }
  0x24   :  { %s7483_s4 = sld [smem:[%s8245_s0 + %s7312_s28]]   ;;  %s7316_s28 = smov 25  }
  0x25   :  { %s7488_s19 = sld [smem:[%s8245_s0 + %s7313_s7]]   ;;  %s7317_s7 = smov 26  }
  0x26   :  { %8312 = sst [smem:[#allocation58_spill]] %s7493_s21 }
  0x27   :  { %s7498_s5 = sld [smem:[%s8245_s0 + %s7315_s22]]   ;;  %s7319_s22 = smov 28  }
  0x28   :  { %s7513_s21 = sld [smem:[%s8245_s0 + %s7318_s15]]   ;;  %s7322_s15 = smov 31  }
  0x29   :  { %s7518_s9 = sld [smem:[%s8245_s0 + %s7319_s22]]   ;;  %s7323_s22 = smov 32  }
  0x2a   :  { %8310 = sst [smem:[#allocation56_spill]] %s7483_s4 }
  0x2b   :  { %8311 = sst [smem:[#allocation57_spill]] %s7488_s19 }
  0x2c   :  { %s7503_s4 = sld [smem:[%s8245_s0 + %s7316_s28]]   ;;  %s7320_s28 = smov 29  }
  0x2d   :  { %8313 = sst [smem:[#allocation59_spill]] %s7498_s5 }
  0x2e   :  { %s7508_s19 = sld [smem:[%s8245_s0 + %s7317_s7]]   ;;  %s7321_s7 = smov 30  }
  0x2f   :  { %8316 = sst [smem:[#allocation62_spill]] %s7513_s21 }
  0x30   :  { %8317 = sst [smem:[#allocation63_spill]] %s7518_s9 }
  0x31   :  { %s7533_s21 = sld [smem:[%s8245_s0 + %s7322_s15]]   ;;  %s7326_s15 = smov 35  }
  0x32   :  { %8314 = sst [smem:[#allocation60_spill]] %s7503_s4 }
  0x33   :  { %s7523_s4 = sld [smem:[%s8245_s0 + %s7320_s28]]   ;;  %s7324_s28 = smov 33  }
  0x34   :  { %8315 = sst [smem:[#allocation61_spill]] %s7508_s19 }
  0x35   :  { %s7528_s19 = sld [smem:[%s8245_s0 + %s7321_s7]]   ;;  %s7325_s7 = smov 34  }
  0x36   :  { %s7538_s9 = sld [smem:[%s8245_s0 + %s7323_s22]]   ;;  %s7327_s22 = smov 36  }
  0x37   :  { %8320 = sst [smem:[#allocation66_spill]] %s7533_s21 }
  0x38   :  { %s7553_s21 = sld [smem:[%s8245_s0 + %s7326_s15]]  }
  0x39   :  { %8318 = sst [smem:[#allocation64_spill]] %s7523_s4 }
  0x3a   :  { %s7543_s4 = sld [smem:[%s8245_s0 + %s7324_s28]]   ;;  %s7328_s28 = smov 37  }
  0x3b   :  { %8319 = sst [smem:[#allocation65_spill]] %s7528_s19 }
  0x3c   :  { %8321 = sst [smem:[#allocation67_spill]] %s7538_s9 }
  0x3d   :  { %s7548_s19 = sld [smem:[%s8245_s0 + %s7325_s7]]   ;;  %s7329_s7 = smov 38  }
  0x3e   :  { %s7558_s9 = sld [smem:[%s8245_s0 + %s7327_s22]]  }
  0x40   :  { %8322 = sst [smem:[#allocation68_spill]] %s7543_s4 }
  0x41   :  { %s7563_s4 = sld [smem:[%s8245_s0 + %s7328_s28]]  }
  0x43   :  { %8323 = sst [smem:[#allocation69_spill]] %s7548_s19 }
  0x44   :  { %s7568_s19 = sld [smem:[%s8245_s0 + %s7329_s7]]  }
  0x47   :  { %8324 = sst [smem:[#allocation70_spill]] %s7563_s4 }
  0x48   :  { %82 = vsyncpa [#allocation3], 0 }
  0x49   :  { %83 = vsyncpa [#allocation6], 0 }
  0x4a   :  { %84 = vsyncpa [#allocation9], 0 }
  0x4b   :  { %85 = vsyncpa [#allocation12], 0 }
  0x4c   :  { %86 = vsyncpa [#allocation15], 0 }
  0x4d   :  { %87 = vsyncpa [#allocation18], 0 }
  0x4e   :  { %88 = vsyncpa [#allocation21], 0 }
  0x4f   :  { %89 = vsyncpa [#allocation24], 0 }
  0x50   :  { %90 = vsyncpa [#allocation27], 0 }
  0x51   :  { %91 = vsyncpa [#allocation30], 0 }
  0x52   :  { %92 = vsyncpa [#allocation4], 0 }
  0x53   :  { %94 = vsyncpa [#allocation4 + $0x1], 0  ;;  %s7570_s15 = smov 0   ;;  %s7572_s16 = smov 0  }
  0x54   :  { %s7574_s18 = smov 0   ;;  %s7576_s0 = smov 0  }
  0x55 LB: > { %s8325_s4 = sld [smem:[#allocation70_spill]]  ;;  %s7591_s22 = sadd.s32 4294967295, %s7290_s0   ;;  %s7278_s15 = sphi %s7570_s15, %s8412_s15   ;;  %s7290_s0 = sphi %s7576_s0, %s8409_s0   ;;  %s7286_s18 = sphi %s7574_s18, %s8411_s18   ;;  %s7282_s16 = sphi %s7572_s16, %s8413_s16  }
  0x56   : > { %8326 = sst [smem:[#allocation71_spill]] %s7278_s15  ;;  %s5663_s23 = sadd.s32 4294967294, %s7290_s0  }
  0x57   : > { %8327 = sst [smem:[#allocation72_spill]] %s7286_s18  ;;  %s7595_s26 = sadd.s32 1, %s7290_s0  }
  0x58   : > { %8328 = sst [smem:[#allocation73_spill]] %s7595_s26  ;;  %s915_s28 = sadd.s32 1, %s7286_s18 }
  0x59   : > { %s912_s1 = ssub.s32 %s7290_s0, %s7595_s26  ;;  %p925_p0 = scmp.ne.s32.totalorder %s7286_s18, %s7282_s16 }
  0x5a   : > { %p913_p1 = scmp.eq.s32.totalorder %s912_s1, 0  ;;  %p926_p2 = scmp.eq.s32.totalorder %s7591_s22, 1 }
  0x5b   : > { %p931_p3 = scmp.ne.s32.totalorder %s7282_s16, %s7278_s15  ;;  %p932_p4 = scmp.eq.s32.totalorder %s5663_s23, 1 }
  0x5c   : > { %s7606_s2 = scalar_select %p913_p1, %s7286_s18, %s915_s28  }
  0x5d   : > { %p7608_p5 = por %p926_p2, %p925_p0  ;;  %p7612_p6 = por %p932_p4, %p931_p3 }
  0x5e   : > { %8329 = sst [smem:[#allocation74_spill]] %s7606_s2  ;;  %p5664_p7 = scmp.ge.s32.totalorder %s7290_s0, 1 }
  0x5f   : > { %s8330_s7 = scalar_select %p7608_p5, 1, 0 }
  0x60   : > { %s8331_s10 = scalar_select %p7612_p6, 1, 0 }
  0x61   : > { %p939_p8 = scmp.lt.s32.totalorder %s7290_s0, 3  ;;  %p8265_p9 = scmp.eq.s32.totalorder %s7591_s22, 0 }
  0x62   : > { %8332 = sst [smem:[#allocation75_spill]] %s8331_s10  ;;  %s7330_s1 = smov [#allocation5]  }
  0x63   : > { %p7619_p10 = pnand %p5664_p7, %p939_p8  ;;  %s963_s23 = sshll.u32 %s7330_s1, 4  ;;  %s964_s23 = int_to_ptr.vmem [resolvable:$true] %s963_s23 }
  0x64   : > { %s7331_s28 = smov [#allocation8]   ;;  %s7332_s26 = smov [#allocation11]  }
  0x65   : > { %s8333_s11 = scalar_select %p7619_p10, 1, 0 }
  0x66   : > { %p6463_p11 = pneg %p7619_p10  ;;  %s989_s2 = sshll.u32 %s7331_s28, 4  ;;  %s7631_s2 = int_to_ptr.vmem [resolvable:$true] %s989_s2 }
  0x67   : > { %s1014_s10 = sshll.u32 %s7332_s26, 4  ;;  %s6733_s1 = scalar_lea.vmem %s964_s23, 16  ;;  %s1015_s10 = int_to_ptr.vmem [resolvable:$true] %s1014_s10 }
  0x68   : > { %p7627_p12 = pnand %p8265_p9, %p6463_p11  ;;  %p6734_p0 = scmp.ne.s32.totalorder %s964_s23, %s6733_s1 }
  0x69   : > { %s6740_s28 = scalar_lea.vmem %s964_s23, 32  ;;  %p6741_p3 = scmp.lt.s32.totalorder %s964_s23, %s964_s23 }
  0x6a   : > { %p7635_p13 = pneg %p7627_p12  ;;  %p6742_p4 = scmp.lt.s32.totalorder %s6740_s28, %s6733_s1 }
  0x6c   : > { %p6736_p1 = pnand %p6734_p0, %p7635_p13  ;;  %p6743_p7 = por %p6742_p4, %p6741_p3 }
  0x6e   : > { %p6737_p2 = pneg %p6736_p1 }
  0x70   : > { %p6744_p8 = pnand %p6743_p7, %p6737_p2 }
  0x72   : > { %6747 = shalt.err (!%p6744_p8)
}
  0x73   : > { %s8336_s17 = sld [smem:[#allocation45_spill]]  ;;  %s6759_s26 = scalar_lea.vmem %s7631_s2, 512 }
  0x74   : > { %p6760_p11 = scmp.ne.s32.totalorder %s7631_s2, %s6759_s26  ;;  %p6767_p1 = scmp.lt.s32.totalorder %s7631_s2, %s7631_s2 }
  0x75   : > { %p6768_p6 = scmp.lt.s32.totalorder %s6759_s26, %s6759_s26 }
  0x76   : > { %p6762_p9 = pnand %p6760_p11, %p7635_p13 }
  0x77   : > { %p6769_p5 = por %p6768_p6, %p6767_p1 }
  0x78   : > { %p6763_p0 = pneg %p6762_p9 }
  0x79   : > { %6469 = dma.hbm_to_vmem [thread:$0]  (!%p7627_p12), %s8336_s17, 16, %s964_s23, [#allocation6]  }
  0x7a   : > { %p6770_p3 = pnand %p6769_p5, %p6763_p0 }
  0x7c   : > { %6773 = shalt.err (!%p6770_p3)
}
  0x7d   : > { %s8267_s1 = smov 128   ;;  %s8269_s28 = smov 8  }
  0x7e   : > { %6475 = dma.hbm_to_vmem [thread:$0]  (!%p7627_p12), %s7408_s29, 512, %s7631_s2, [#allocation9], %s8267_s1, %s8267_s1, %s8269_s28  }
  0x7f   : > { %s6785_s23 = scalar_lea.vmem %s1015_s10, 64  ;;  %p6793_p6 = scmp.lt.s32.totalorder %s1015_s10, %s1015_s10 }
  0x80   : > { %p6786_p9 = scmp.ne.s32.totalorder %s1015_s10, %s6785_s23  ;;  %p6794_p5 = scmp.lt.s32.totalorder %s6785_s23, %s6785_s23 }
  0x82   : > { %p6788_p2 = pnand %p6786_p9, %p7635_p13  ;;  %p6795_p7 = por %p6794_p5, %p6793_p6 }
  0x84   : > { %p6789_p4 = pneg %p6788_p2 }
  0x86   : > { %p6796_p8 = pnand %p6795_p7, %p6789_p4 }
  0x88   : > { %6799 = shalt.err (!%p6796_p8)
}
  0x89   : > { %s8337_s8 = sld [smem:[#allocation48_spill]]  ;;  %s7335_s26 = smov [#allocation14]  }
  0x8a   : > { %s1038_s17 = sshll.u32 %s7335_s26, 4  ;;  %s7336_s2 = smov [#allocation17]   ;;  %s1039_s17 = int_to_ptr.vmem [resolvable:$true] %s1038_s17 }
  0x8b   : > { %s1065_s1 = sshll.u32 %s7336_s2, 4  ;;  %s6811_s28 = scalar_lea.vmem %s1039_s17, 32  ;;  %s1066_s1 = int_to_ptr.vmem [resolvable:$true] %s1065_s1 }
  0x8c   : > { %p6812_p11 = scmp.ne.s32.totalorder %s1039_s17, %s6811_s28  ;;  %p6819_p3 = scmp.lt.s32.totalorder %s1039_s17, %s1039_s17 }
  0x8d   : > { %p6820_p9 = scmp.lt.s32.totalorder %s6811_s28, %s6811_s28 }
  0x8e   : > { %p6814_p0 = pnand %p6812_p11, %p7635_p13 }
  0x8f   : > { %6481 = dma.hbm_to_vmem [thread:$0]  (!%p7627_p12), %s8337_s8, 64, %s1015_s10, [#allocation12]  }
  0x90   : > { %p6815_p1 = pneg %p6814_p0  ;;  %p6821_p2 = por %p6820_p9, %p6819_p3 }
  0x92   : > { %p6822_p4 = pnand %p6821_p2, %p6815_p1 }
  0x94   : > { %6825 = shalt.err (!%p6822_p4)
}
  0x95   : > { %s8271_s23 = smov 16   ;;  %s8338_s24 = sld [smem:[#allocation50_spill]] }
  0x96   : > { %s8272_s10 = smov 1   ;;  %s6837_s26 = scalar_lea.vmem %s1066_s1, 16 }
  0x97   : > { %p6838_p6 = scmp.ne.s32.totalorder %s1066_s1, %s6837_s26  ;;  %s6844_s28 = scalar_lea.vmem %s1066_s1, 32 }
  0x98   : > { %p6845_p8 = scmp.lt.s32.totalorder %s1066_s1, %s1066_s1  ;;  %p6846_p11 = scmp.lt.s32.totalorder %s6844_s28, %s6837_s26 }
  0x99   : > { %p6840_p5 = pnand %p6838_p6, %p7635_p13 }
  0x9a   : > { %p6847_p0 = por %p6846_p11, %p6845_p8 }
  0x9b   : > { %6487 = dma.hbm_to_vmem [thread:$0]  (!%p7627_p12), %s8338_s24, 32, %s1039_s17, [#allocation15], %s8271_s23, %s8271_s23, %s8272_s10  }
  0x9c   : > { %p6841_p7 = pneg %p6840_p5 }
  0x9e   : > { %p6848_p1 = pnand %p6847_p0, %p6841_p7 }
  0xa0   : > { %6851 = shalt.err (!%p6848_p1)
}
  0xa1   : > { %s8339_s6 = sld [smem:[#allocation51_spill]]  ;;  %s7339_s2 = smov [#allocation20]  }
  0xa2   : > { %s1089_s8 = sshll.u32 %s7339_s2, 4  ;;  %s7340_s17 = smov [#allocation23]   ;;  %s1090_s8 = int_to_ptr.vmem [resolvable:$true] %s1089_s8 }
  0xa3   : > { %s1119_s23 = sshll.u32 %s7340_s17, 4  ;;  %s6863_s10 = scalar_lea.vmem %s1090_s8, 16  ;;  %s1120_s23 = int_to_ptr.vmem [resolvable:$true] %s1119_s23 }
  0xa4   : > { %p6864_p3 = scmp.ne.s32.totalorder %s1090_s8, %s6863_s10  ;;  %s6870_s24 = scalar_lea.vmem %s1090_s8, 32 }
  0xa5   : > { %p6871_p4 = scmp.lt.s32.totalorder %s1090_s8, %s1090_s8  ;;  %p6872_p6 = scmp.lt.s32.totalorder %s6870_s24, %s6863_s10 }
  0xa6   : > { %p6866_p9 = pnand %p6864_p3, %p7635_p13 }
  0xa7   : > { %6493 = dma.hbm_to_vmem [thread:$0]  (!%p7627_p12), %s8339_s6, 16, %s1066_s1, [#allocation18]  }
  0xa8   : > { %p6867_p2 = pneg %p6866_p9  ;;  %p6873_p5 = por %p6872_p6, %p6871_p4 }
  0xaa   : > { %p6874_p7 = pnand %p6873_p5, %p6867_p2 }
  0xac   : > { %6877 = shalt.err (!%p6874_p7)
}
  0xad   : > { %6499 = dma.hbm_to_vmem [thread:$0]  (!%p7627_p12), %s7453_s20, 16, %s1090_s8, [#allocation21]  }
  0xae   : > { %s6889_s1 = scalar_lea.vmem %s1120_s23, 512  ;;  %p6897_p1 = scmp.lt.s32.totalorder %s1120_s23, %s1120_s23 }
  0xaf   : > { %p6890_p8 = scmp.ne.s32.totalorder %s1120_s23, %s6889_s1  ;;  %p6898_p3 = scmp.lt.s32.totalorder %s6889_s1, %s6889_s1 }
  0xb1   : > { %p6892_p11 = pnand %p6890_p8, %p7635_p13  ;;  %p6899_p9 = por %p6898_p3, %p6897_p1 }
  0xb3   : > { %p6893_p0 = pneg %p6892_p11 }
  0xb5   : > { %p6900_p10 = pnand %p6899_p9, %p6893_p0 }
  0xb7   : > { %6903 = shalt.err (!%p6900_p10)
}
  0xb8   : > { %s8340_s24 = smov 8   ;;  %s8341_s10 = smov 128  }
  0xb9   : > { %6505 = dma.hbm_to_vmem [thread:$0]  (!%p7627_p12), %s7478_s27, 512, %s1120_s23, [#allocation24], %s8341_s10, %s8341_s10, %s8340_s24  }
  0xba   : > { %s7341_s8 = smov [#allocation26]   ;;  %s7342_s28 = smov [#allocation2]  }
  0xbb   : > { %s1149_s26 = sshll.u32 %s7341_s8, 4  ;;  %s952_s2 = sshll.u32 %s7342_s28, 4  ;;  %s1150_s26 = int_to_ptr.vmem [resolvable:$true] %s1149_s26  ;;  %s953_s2 = int_to_ptr.vmem [resolvable:$true] %s952_s2 }
  0xbc   : > { %s6915_s17 = scalar_lea.vmem %s1150_s26, 512  ;;  %p6923_p5 = scmp.lt.s32.totalorder %s1150_s26, %s1150_s26 }
  0xbd   : > { %p6916_p2 = scmp.ne.s32.totalorder %s1150_s26, %s6915_s17  ;;  %p6924_p10 = scmp.lt.s32.totalorder %s6915_s17, %s6915_s17 }
  0xbf   : > { %p6918_p4 = pnand %p6916_p2, %p7635_p13  ;;  %p6925_p7 = por %p6924_p10, %p6923_p5 }
  0xc1   : > { %p6919_p6 = pneg %p6918_p4 }
  0xc3   : > { %p6926_p8 = pnand %p6925_p7, %p6919_p6 }
  0xc5   : > { %6929 = shalt.err (!%p6926_p8)
}
  0xc6   : > { %s8342_s5 = sld [smem:[#allocation59_spill]]  ;;  %s6941_s23 = scalar_lea.vmem %s953_s2, 32 }
  0xc7   : > { %p6942_p11 = scmp.ne.s32.totalorder %s953_s2, %s6941_s23  ;;  %p6949_p3 = scmp.lt.s32.totalorder %s953_s2, %s953_s2 }
  0xc8   : > { %p6950_p9 = scmp.lt.s32.totalorder %s6941_s23, %s6941_s23 }
  0xc9   : > { %p6944_p0 = pnand %p6942_p11, %p7635_p13 }
  0xca   : > { %p6951_p2 = por %p6950_p9, %p6949_p3 }
  0xcb   : > { %p6945_p1 = pneg %p6944_p0 }
  0xcc   : > { %6511 = dma.hbm_to_vmem [thread:$0]  (!%p7627_p12), %s8342_s5, 512, %s1150_s26, [#allocation27], %s8341_s10, %s8341_s10, %s8340_s24  }
  0xcd   : > { %p6952_p4 = pnand %p6951_p2, %p6945_p1 }
  0xcf   : > { %6955 = shalt.err (!%p6952_p4)
}
  0xd0   : > { %6466 = dma.hbm_to_vmem [thread:$0]  (!%p7627_p12), %s7388_s13, 32, %s953_s2, [#allocation3]  }
  0xd1   : > { %s7343_s1 = smov [#allocation7]   ;;  %s7344_s26 = smov [#allocation10]  }
  0xd2   : > { %s976_s8 = sshll.u32 %s7343_s1, 4  ;;  %s1003_s28 = sshll.u32 %s7344_s26, 4  ;;  %s977_s8 = int_to_ptr.vmem [resolvable:$true] %s976_s8  ;;  %s1004_s28 = int_to_ptr.vmem [resolvable:$true] %s1003_s28 }
  0xd3   : > { %s6967_s17 = scalar_lea.vmem %s977_s8, 32  ;;  %p6975_p7 = scmp.lt.s32.totalorder %s977_s8, %s977_s8 }
  0xd4   : > { %p6968_p6 = scmp.ne.s32.totalorder %s977_s8, %s6967_s17  ;;  %p6976_p8 = scmp.lt.s32.totalorder %s6967_s17, %s6967_s17 }
  0xd6   : > { %p6970_p5 = pnand %p6968_p6, %p7635_p13  ;;  %p6977_p11 = por %p6976_p8, %p6975_p7 }
  0xd8   : > { %p6971_p10 = pneg %p6970_p5 }
  0xda   : > { %p6978_p0 = pnand %p6977_p11, %p6971_p10 }
  0xdc   : > { %6981 = shalt.err (!%p6978_p0)
}
  0xdd   : > { %s8343_s23 = smov 1   ;;  %s8344_s5 = smov 16  }
  0xde   : > { %6472 = dma.hbm_to_vmem [thread:$0]  (!%p7627_p12), %s7403_s25, 32, %s977_s8, [#allocation6], %s8344_s5, %s8344_s5, %s8343_s23  }
  0xdf   : > { %s6993_s2 = scalar_lea.vmem %s1004_s28, 16  ;;  %s7000_s1 = scalar_lea.vmem %s1004_s28, 32 }
  0xe0   : > { %p6994_p1 = scmp.ne.s32.totalorder %s1004_s28, %s6993_s2  ;;  %p7001_p2 = scmp.lt.s32.totalorder %s1004_s28, %s1004_s28 }
  0xe1   : > { %p7002_p4 = scmp.lt.s32.totalorder %s7000_s1, %s6993_s2 }
  0xe2   : > { %p6996_p3 = pnand %p6994_p1, %p7635_p13 }
  0xe3   : > { %p7003_p6 = por %p7002_p4, %p7001_p2 }
  0xe4   : > { %p6997_p9 = pneg %p6996_p3 }
  0xe6   : > { %p7004_p5 = pnand %p7003_p6, %p6997_p9 }
  0xe8   : > { %7007 = shalt.err (!%p7004_p5)
}
  0xe9   : > { %s8345_s3 = sld [smem:[#allocation47_spill]]  ;;  %s7345_s26 = smov [#allocation13]  }
  0xea   : > { %s1025_s17 = sshll.u32 %s7345_s26, 4  ;;  %s7346_s5 = smov [#allocation16]   ;;  %s1026_s17 = int_to_ptr.vmem [resolvable:$true] %s1025_s17 }
  0xeb   : > { %s1051_s8 = sshll.u32 %s7346_s5, 4  ;;  %s7019_s23 = scalar_lea.vmem %s1026_s17, 16  ;;  %s1052_s8 = int_to_ptr.vmem [resolvable:$true] %s1051_s8 }
  0xec   : > { %p7020_p10 = scmp.ne.s32.totalorder %s1026_s17, %s7019_s23  ;;  %s7026_s6 = scalar_lea.vmem %s1026_s17, 32 }
  0xed   : > { %p7027_p11 = scmp.lt.s32.totalorder %s1026_s17, %s1026_s17  ;;  %p7028_p0 = scmp.lt.s32.totalorder %s7026_s6, %s7019_s23 }
  0xee   : > { %p7022_p7 = pnand %p7020_p10, %p7635_p13 }
  0xef   : > { %6478 = dma.hbm_to_vmem [thread:$0]  (!%p7627_p12), %s8345_s3, 16, %s1004_s28, [#allocation9]  }
  0xf0   : > { %p7023_p8 = pneg %p7022_p7  ;;  %p7029_p1 = por %p7028_p0, %p7027_p11 }
  0xf2   : > { %p7030_p3 = pnand %p7029_p1, %p7023_p8 }
  0xf4   : > { %7033 = shalt.err (!%p7030_p3)
}
  0xf5   : > { %6484 = dma.hbm_to_vmem [thread:$0]  (!%p7627_p12), %s7423_s14, 16, %s1026_s17, [#allocation12]  }
  0xf6   : > { %s7045_s28 = scalar_lea.vmem %s1052_s8, 512  ;;  %p7053_p6 = scmp.lt.s32.totalorder %s1052_s8, %s1052_s8 }
  0xf7   : > { %p7046_p9 = scmp.ne.s32.totalorder %s1052_s8, %s7045_s28  ;;  %p7054_p5 = scmp.lt.s32.totalorder %s7045_s28, %s7045_s28 }
  0xf9   : > { %p7048_p2 = pnand %p7046_p9, %p7635_p13  ;;  %p7055_p10 = por %p7054_p5, %p7053_p6 }
  0xfb   : > { %p7049_p4 = pneg %p7048_p2 }
  0xfd   : > { %p7056_p7 = pnand %p7055_p10, %p7049_p4 }
  0xff   : > { %7059 = shalt.err (!%p7056_p7)
}
 0x100   : > { %6490 = dma.hbm_to_vmem [thread:$0]  (!%p7627_p12), %s7438_s30, 512, %s1052_s8, [#allocation15], %s8341_s10, %s8341_s10, %s8340_s24  }
 0x101   : > { %s7347_s6 = smov [#allocation19]   ;;  %s7348_s1 = smov [#allocation22]  }
 0x102   : > { %s1075_s2 = sshll.u32 %s7347_s6, 4  ;;  %s1109_s26 = sshll.u32 %s7348_s1, 4  ;;  %s1076_s2 = int_to_ptr.vmem [resolvable:$true] %s1075_s2  ;;  %s1110_s26 = int_to_ptr.vmem [resolvable:$true] %s1109_s26 }
 0x103   : > { %s7071_s17 = scalar_lea.vmem %s1076_s2, 512  ;;  %p7079_p1 = scmp.lt.s32.totalorder %s1076_s2, %s1076_s2 }
 0x104   : > { %p7072_p8 = scmp.ne.s32.totalorder %s1076_s2, %s7071_s17  ;;  %p7080_p3 = scmp.lt.s32.totalorder %s7071_s17, %s7071_s17 }
 0x106   : > { %p7074_p11 = pnand %p7072_p8, %p7635_p13  ;;  %p7081_p9 = por %p7080_p3, %p7079_p1 }
 0x108   : > { %p7075_p0 = pneg %p7074_p11 }
 0x10a   : > { %p7082_p2 = pnand %p7081_p9, %p7075_p0 }
 0x10c   : > { %7085 = shalt.err (!%p7082_p2)
}
 0x10d   : > { %6496 = dma.hbm_to_vmem [thread:$0]  (!%p7627_p12), %s7448_s12, 512, %s1076_s2, [#allocation18], %s8341_s10, %s8341_s10, %s8340_s24  }
 0x10e   : > { %s7097_s5 = scalar_lea.vmem %s1110_s26, 16  ;;  %s7104_s8 = scalar_lea.vmem %s1110_s26, 32 }
 0x10f   : > { %p7098_p4 = scmp.ne.s32.totalorder %s1110_s26, %s7097_s5  ;;  %p7105_p10 = scmp.lt.s32.totalorder %s1110_s26, %s1110_s26 }
 0x110   : > { %p7106_p7 = scmp.lt.s32.totalorder %s7104_s8, %s7097_s5 }
 0x111   : > { %p7100_p6 = pnand %p7098_p4, %p7635_p13 }
 0x112   : > { %p7107_p8 = por %p7106_p7, %p7105_p10 }
 0x113   : > { %p7101_p5 = pneg %p7100_p6 }
 0x115   : > { %p7108_p11 = pnand %p7107_p8, %p7101_p5 }
 0x117   : > { %7111 = shalt.err (!%p7108_p11)
}
 0x118   : > { %s8346_s23 = sld [smem:[#allocation55_spill]]  ;;  %s7349_s28 = smov [#allocation25]  }
 0x119   : > { %s1133_s6 = sshll.u32 %s7349_s28, 4  ;;  %s7350_s2 = smov [#allocation28]   ;;  %s1134_s6 = int_to_ptr.vmem [resolvable:$true] %s1133_s6 }
 0x11a   : > { %s1177_s1 = sshll.u32 %s7350_s2, 4  ;;  %s7123_s17 = scalar_lea.vmem %s1134_s6, 16  ;;  %s1178_s1 = int_to_ptr.vmem [resolvable:$true] %s1177_s1 }
 0x11b   : > { %p7124_p0 = scmp.ne.s32.totalorder %s1134_s6, %s7123_s17  ;;  %s7130_s3 = scalar_lea.vmem %s1134_s6, 32 }
 0x11c   : > { %p7131_p9 = scmp.lt.s32.totalorder %s1134_s6, %s1134_s6  ;;  %p7132_p2 = scmp.lt.s32.totalorder %s7130_s3, %s7123_s17 }
 0x11d   : > { %p7126_p1 = pnand %p7124_p0, %p7635_p13 }
 0x11e   : > { %6502 = dma.hbm_to_vmem [thread:$0]  (!%p7627_p12), %s8346_s23, 16, %s1110_s26, [#allocation21]  }
 0x11f   : > { %p7127_p3 = pneg %p7126_p1  ;;  %p7133_p4 = por %p7132_p2, %p7131_p9 }
 0x121   : > { %p7134_p6 = pnand %p7133_p4, %p7127_p3 }
 0x123   : > { %7137 = shalt.err (!%p7134_p6)
}
 0x124   : > { %s8347_s5 = sld [smem:[#allocation56_spill]]  ;;  %s7149_s26 = scalar_lea.vmem %s1178_s1, 1024 }
 0x125   : > { %p7150_p5 = scmp.ne.s32.totalorder %s1178_s1, %s7149_s26  ;;  %p7157_p8 = scmp.lt.s32.totalorder %s1178_s1, %s1178_s1 }
 0x126   : > { %p7158_p11 = scmp.lt.s32.totalorder %s7149_s26, %s7149_s26 }
 0x127   : > { %p7152_p10 = pnand %p7150_p5, %p7635_p13 }
 0x128   : > { %p7159_p0 = por %p7158_p11, %p7157_p8 }
 0x129   : > { %p7153_p7 = pneg %p7152_p10 }
 0x12a   : > { %6508 = dma.hbm_to_vmem [thread:$0]  (!%p7627_p12), %s8347_s5, 16, %s1134_s6, [#allocation24]  }
 0x12b   : > { %p7160_p1 = pnand %p7159_p0, %p7153_p7 }
 0x12d   : > { %7163 = shalt.err (!%p7160_p1)
}
 0x12e   : > { %s8348_s3 = sld [smem:[#allocation65_spill]]  ;;  %s7351_s8 = smov [#allocation29]  }
 0x12f   : > { %s1199_s23 = sshll.u32 %s7351_s8, 4  ;;  %s1200_s23 = int_to_ptr.vmem [resolvable:$true] %s1199_s23 }
 0x130   : > { %s7175_s28 = scalar_lea.vmem %s1200_s23, 1024  ;;  %p7183_p4 = scmp.lt.s32.totalorder %s1200_s23, %s1200_s23 }
 0x131   : > { %p7176_p3 = scmp.ne.s32.totalorder %s1200_s23, %s7175_s28  ;;  %p7184_p6 = scmp.lt.s32.totalorder %s7175_s28, %s7175_s28 }
 0x133   : > { %p7178_p9 = pnand %p7176_p3, %p7635_p13  ;;  %p7185_p5 = por %p7184_p6, %p7183_p4 }
 0x134   : > { %6514 = dma.hbm_to_vmem [thread:$0]  (!%p7627_p12), %s8348_s3, 1024, %s1178_s1, [#allocation27], %s8341_s10, %s8341_s10, %s8340_s24  }
 0x135   : > { %p7179_p2 = pneg %p7178_p9 }
 0x137   : > { %p7186_p10 = pnand %p7185_p5, %p7179_p2 }
 0x139   : > { %7189 = shalt.err (!%p7186_p10)
}
 0x13a   : > { %s8349_s6 = sld [smem:[#allocation69_spill]]  ;;  %p8350_p7 = scmp.ne.s32.totalorder %s8333_s11, 0 }
 0x13b   : > { %p8351_p8 = scmp.eq.s32.totalorder (!%p8350_p7), %s7591_s22, 0 }
 0x13c   : > { %1242 = sbr.rel (%p8350_p7) target bundleno = 8160 (0x1fe0), region = 172 }
 0x140   : > { %6517 = dma.hbm_to_vmem [thread:$0]  (!%p7627_p12), %s8349_s6, 1024, %s1200_s23, [#allocation30], %s8341_s10, %s8341_s10, %s8340_s24  }
 0x141   : > { %7233 = dma.done.wait (%p8351_p8), [#allocation3], 32   ;;  %p8352_p13 = pmov %p8351_p8 }
 0x142   : > { %p8353_p11 = pmov %p8351_p8 }
 0x143   : > { %7235 = vsyncadd (%p8352_p13), [#allocation3], 4294967264 }
 0x144   : > { %7237 = dma.done.wait (%p8353_p11), [#allocation6], 48   ;;  %p8354_p0 = pmov %p8351_p8 }
 0x146   : > { %7239 = vsyncadd (%p8354_p0), [#allocation6], 4294967248  ;;  %p8355_p1 = pmov %p8354_p0 }
 0x147   : > { %p8356_p12 = pmov %p8354_p0 }
 0x148   : > { %7241 = dma.done.wait (%p8355_p1), [#allocation9], 528  }
 0x149   : > { %7243 = vsyncadd (%p8356_p12), [#allocation9], 4294966768  ;;  %p8357_p3 = pmov %p8354_p0 }
 0x14a   : > { %p8358_p9 = pmov %p8354_p0 }
 0x14b   : > { %7245 = dma.done.wait (%p8357_p3), [#allocation12], 80  }
 0x14c   : > { %7247 = vsyncadd (%p8358_p9), [#allocation12], 4294967216  ;;  %p8359_p2 = pmov %p8354_p0 }
 0x14d   : > { %p8360_p4 = pmov %p8354_p0 }
 0x14e   : > { %7249 = dma.done.wait (%p8359_p2), [#allocation15], 544  }
 0x14f   : > { %7251 = vsyncadd (%p8360_p4), [#allocation15], 4294966752  ;;  %p8361_p6 = pmov %p8354_p0 }
 0x150   : > { %p8362_p5 = pmov %p8354_p0 }
 0x151   : > { %7253 = dma.done.wait (%p8361_p6), [#allocation18], 528  }
 0x152   : > { %7255 = vsyncadd (%p8362_p5), [#allocation18], 4294966768  ;;  %p8363_p10 = pmov %p8354_p0 }
 0x153   : > { %p8364_p7 = pmov %p8354_p0 }
 0x154   : > { %7257 = dma.done.wait (%p8363_p10), [#allocation21], 32  }
 0x155   : > { %7259 = vsyncadd (%p8364_p7), [#allocation21], 4294967264  ;;  %p8365_p8 = pmov %p8354_p0 }
 0x156   : > { %p8366_p13 = pmov %p8354_p0 }
 0x157   : > { %7261 = dma.done.wait (%p8365_p8), [#allocation24], 528  }
 0x158   : > { %7263 = vsyncadd (%p8366_p13), [#allocation24], 4294966768  ;;  %p8367_p11 = pmov %p8354_p0 }
 0x15a   : > { %7265 = dma.done.wait (%p8367_p11), [#allocation27], 1536  }
 0x15b   : > { %7267 = vsyncadd (%p8354_p0), [#allocation27], 4294965760  ;;  %p8368_p1 = pmov %p8354_p0 }
 0x15c   : > { %p8369_p12 = pmov %p8354_p0 }
 0x15d   : > { %7269 = dma.done.wait (%p8368_p1), [#allocation30], 1024  }
 0x15e   : > { %7271 = vsyncadd (%p8369_p12), [#allocation30], 4294966272  ;;  %s8370_s15 = sld [smem:[#allocation43_spill]]  ;;  %s5704_s24 = sshll.u32 %s7591_s22, 1  ;;  %vm1439_vm0 = vcmask 1041408   ;;  %vm1432_vm1 = vcmask 15360  }
 0x15f   : > { %s8371_s18 = sld [smem:[#allocation46_spill]]  ;;  %p1410_p3 = scmp.lt.s32.totalorder %s5704_s24, 3  ;;  %v1424_v0 = vld [vmem:[#allocation2] sm:$0x3]  ;;  %v5708_v7 = vld [vmem:[#allocation5] ss:$0 sm:$0xff] }
 0x160   : > { %6029 = vmatprep.subr.msk.mxu1 %vm1439_vm0, %v1424_v0  ;;  %vm1531_vm2 = vcmask 261120   ;;  %s8373_s1 = sld [smem:[#allocation44_spill]]  ;;  %v1809_v18 = vld [vmem:[#allocation11] sm:$0x7]  ;;  %vm1824_vm3 = vcmask 1042432   ;;  %vm1817_vm4 = vcmask 23552  }
 0x161   : > { %s8415_s24 = smov (!%p1410_p3, %s5704_s24), 3  ;;  %6030 = vmatpush3.msk.msra.mxu1 %vm1439_vm0, %v1424_v0  ;;  %v5712_v19 = vld [vmem:[#allocation7] ss:$0 sm:$0xff]  ;;  %s8374_s5 = sld [smem:[#allocation49_spill]]  ;;  %v1717_v31 = vld [vmem:[#allocation8 + $0x10] sm:$0xff]  ;;  %v1716_v33 = vld [vmem:[#allocation8 + $0x8] sm:$0xff] }
 0x162   : > { %s5705_s10 = sshll.u32 %s8415_s24, 3  ;;  %v1718_v30 = vld [vmem:[#allocation8 + $0x18] sm:$0xff]  ;;  %v1715_v35 = vld [vmem:[#allocation8] sm:$0xff]  ;;  %v5729_v59 = vld [vmem:[#allocation14] ss:$0 sm:$0xff]  ;;  %s8375_s26 = sld [smem:[#allocation52_spill]] }
 0x163   : > { %v5719_v38 = vld [vmem:[#allocation7 + $0x1] ss:$0 sm:$0xff]  ;;  %v5725_v43 = vld [vmem:[#allocation13] ss:$0 sm:$0xff]  ;;  %s8376_s3 = sld [smem:[#allocation53_spill]]  ;;  %vm7353_vm5 = vmmov 0  }
 0x164   : > { %s1413_s2 = scalar_lea.vmem %s8370_s15, %s5705_s10  ;;  %v2194_v58 = vld [vmem:[#allocation19 + $0x18] sm:$0xff]  ;;  %s8377_s8 = sld [smem:[#allocation54_spill]]  ;;  %vm2571_vm6 = vcmask 64512   ;;  %vm2651_vm7 = vcmask 130048   ;;  %vm3516_vm8 = vcmask 195584   ;;  %vm3733_vm9 = vcmask 523264  }
 0x165   : > { %s8372_s11 = smov %s8371_s18  ;;  %v1422_v1 = vld [vmem:[%s1413_s2] sm:$0xff]  ;;  %v1423_v2 = vld [vmem:[%s1413_s2 + $0x8] sm:$0xff]  ;;  %v1523_v3 = vld [vmem:[%s8371_s18 + $0x18] sm:$0xff]  ;;  %s8378_s23 = sld [smem:[#allocation63_spill]] }
 0x166   : > { %6031 = vmatprep.mubr.msk.f32.mxu1 %vm1432_vm1, %v1422_v1  ;;  %6034 = vmatprep.subr.mxu1 %v1523_v3  ;;  %v1522_v4 = vld [vmem:[%s8372_s11 + $0x10] sm:$0xff]  ;;  %v1521_v5 = vld [vmem:[%s8372_s11 + $0x8] sm:$0xff]  ;;  %v1520_v6 = vld [vmem:[%s8372_s11] sm:$0xff]  ;;  %s1419_s17 = scalar_lea.vmem %s8373_s1, %s5705_s10  ;;  %s8379_s28 = sld [smem:[#allocation61_spill]] }
 0x167   : > { %6032 = vmatmul.mubr.msk.f32.vlgmr.msra.gmra.mxu1 %vm1432_vm1, %v1423_v2  ;;  %v5718_v14 = vld [vmem:[%s8372_s11 + $0x38] sm:$0xff]  ;;  %v5717_v15 = vld [vmem:[%s8372_s11 + $0x30] sm:$0xff]  ;;  %v5716_v16 = vld [vmem:[%s8372_s11 + $0x28] sm:$0xff]  ;;  %s8380_s6 = sld [smem:[#allocation62_spill]]  ;;  %s8274_s18 = smov 88  }
 0x168   : > { %6035 = vmatpush3.msra.mxu1 %v1523_v3  ;;  %6045 = vmatprep.subr.mxu0 %v5718_v14  ;;  %v5715_v17 = vld [vmem:[%s8372_s11 + $0x20] sm:$0xff]  ;;  %v1808_v29 = vld [vmem:[%s1419_s17 + $0x8] sm:$0xff]  ;;  %v1908_v32 = vld [vmem:[%s8374_s5 + $0x18] sm:$0xff]  ;;  %s8381_s15 = sld [smem:[#allocation64_spill]]  ;;  %s7355_s10 = smov 96  }
 0x169   : > { %6036 = vmatprep.subr.mxu1 %v1522_v4  ;;  %6046 = vmatpush3.msra.mxu0 %v5718_v14  ;;  %v1807_v28 = vld [vmem:[%s1419_s17] sm:$0xff]  ;;  %v1907_v34 = vld [vmem:[%s8374_s5 + $0x10] sm:$0xff]  ;;  %v1906_v36 = vld [vmem:[%s8374_s5 + $0x8] sm:$0xff]  ;;  %s8282_s2 = smov 120   ;;  %s8277_s1 = smov 80  }
 0x16a   : > { %6037 = vmatpush3.msra.mxu1 %v1522_v4  ;;  %6047 = vmatprep.subr.mxu0 %v5717_v15  ;;  %v1905_v37 = vld [vmem:[%s8374_s5] sm:$0xff]  ;;  %v5735_v54 = vld [vmem:[%s8374_s5 + $0x38] sm:$0xff]  ;;  %v5734_v55 = vld [vmem:[%s8374_s5 + $0x30] sm:$0xff]  ;;  %s8287_s17 = smov 112   ;;  %p8405_p2 = scmp.ne.s32.totalorder %s8330_s7, 0 }
 0x16b   : > { %6038 = vmatprep.subr.mxu1 %v1521_v5  ;;  %6048 = vmatpush3.msra.mxu0 %v5717_v15  ;;  %v5733_v56 = vld [vmem:[%s8374_s5 + $0x28] sm:$0xff]  ;;  %v5732_v57 = vld [vmem:[%s8374_s5 + $0x20] sm:$0xff]  ;;  %v2099_v15 = vld [vmem:[#allocation16] sm:$0xff]  ;;  %s8392_s5 = smov 104  }
 0x16c   : > { %6039 = vmatpush3.msra.mxu1 %v1521_v5  ;;  %6049 = vmatprep.subr.mxu0 %v5716_v16  ;;  %v5722_v5 = vld [vmem:[#allocation10] ss:$0 sm:$0xff]  ;;  %v2100_v14 = vld [vmem:[#allocation16 + $0x8] sm:$0xff] }
 0x16d   : > { %6040 = vmatprep.subr.mxu1 %v1520_v6  ;;  %6050 = vmatpush3.msra.mxu0 %v5716_v16  ;;  %v2288_v16 = vld [vmem:[%s8375_s26 + $0x18] sm:$0xff] }
 0x16e   : > { %6041 = vmatpush3.msra.mxu1 %v1520_v6  ;;  %6051 = vmatprep.subr.mxu0 %v5715_v17  ;;  %s8382_s24 = smov %s8381_s15 }
 0x16f   : > { %6052 = vmatpush3.msra.mxu0 %v5715_v17  ;;  %6056 = vmatprep.subr.mxu1 %v1718_v30  ;;  %v5736_v17 = vld [vmem:[#allocation14 + $0x1] ss:$0 sm:$0xff] }
 0x170   : > { %6067 = vmatprep.subr.msk.mxu0 %vm1824_vm3, %v1809_v18 }
 0x227   : > { %v6033_v8 = vpop.f32.mrf.mxu1 }
 0x228   : > { %v1515_v9 = vadd.f32 %v6033_v8, %v5708_v7  ;;  %v2193_v8 = vld [vmem:[#allocation19 + $0x10] sm:$0xff] }
 0x229   : > { %v1509_v10 = vpop.f32.mrf.mxu1 }
 0x22a   : > { %v1510_v11 = vadd.f32 %v5708_v7, %v1509_v10  ;;  %v1519_v13 = vmax.f32 %v1515_v9, 0.0  ;;  %v2192_v9 = vld [vmem:[#allocation19 + $0x8] sm:$0xff]  ;;  %v2191_v10 = vld [vmem:[#allocation19] sm:$0xff] }
 0x22c   : > { %v1518_v12 = vmax.f32 %v1510_v11, 0.0 }
 0x22e   : > { %6042 = vmatprep.mubr.msk.f32.mxu1 %vm1531_vm2, %v1518_v12 }
 0x22f   : > { %6043 = vmatmul.mubr.msk.f32.vlgmr.msra.gmra.mxu1 %vm1531_vm2, %v1519_v13 }
 0x230   : > { %6057 = vmatpush3.msra.mxu1 %v1718_v30 }
 0x231   : > { %6058 = vmatprep.subr.mxu1 %v1717_v31 }
 0x232   : > { %6059 = vmatpush3.msra.mxu1 %v1717_v31  ;;  %v2286_v31 = vld [vmem:[%s8375_s26 + $0x8] sm:$0xff] }
 0x233   : > { %6060 = vmatprep.subr.mxu1 %v1716_v33 }
 0x234   : > { %6061 = vmatpush3.msra.mxu1 %v1716_v33 }
 0x235   : > { %6062 = vmatprep.subr.mxu1 %v1715_v35 }
 0x236   : > { %6063 = vmatpush3.msra.mxu1 %v1715_v35 }
 0x237   : > { %6083 = vmatprep.subr.mxu1 %v5735_v54 }
 0x2ef   : > { %v6044_v20 = vpop.f32.mrf.mxu1 }
 0x2f0   : > { %v1610_v21 = vadd.f32 %v6044_v20, %v5712_v19 }
 0x2f1   : > { %v1604_v22 = vpop.f32.mrf.mxu1 }
 0x2f2   : > { %v1605_v23 = vadd.f32 %v5712_v19, %v1604_v22  ;;  %v1614_v24 = vmax.f32 %v1610_v21, 0.0 }
 0x2f4   : > { %v1613_v25 = vmax.f32 %v1605_v23, 0.0  ;;  %v1616_v27 = vadd.f32 %v1614_v24, %v1519_v13  ;;  %v2101_v13 = vld [vmem:[#allocation16 + $0x10] sm:$0xff] }
 0x2f6   : > { %v1615_v26 = vadd.f32 %v1613_v25, %v1518_v12  ;;  %v2102_v12 = vld [vmem:[#allocation16 + $0x18] sm:$0xff] }
 0x2f8   : > { %6053 = vmatprep.mubr.msk.f32.mxu0 %vm1531_vm2, %v1615_v26 }
 0x2f9   : > { %6054 = vmatmul.mubr.msk.f32.vlgmr.msra.gmra.mxu0 %vm1531_vm2, %v1616_v27 }
 0x2fa   : > { %6068 = vmatpush3.msk.msra.mxu0 %vm1824_vm3, %v1809_v18  ;;  %6069 = vmatprep.mubr.msk.f32.mxu0 %vm1817_vm4, %v1807_v28  ;;  %v2287_v28 = vld [vmem:[%s8375_s26 + $0x10] sm:$0xff] }
 0x2fb   : > { %6072 = vmatprep.subr.mxu0 %v1908_v32 }
 0x2fd   : > { %6070 = vmatmul.mubr.msk.f32.vlgmr.msra.gmra.mxu0 %vm1817_vm4, %v1808_v29 }
 0x2fe   : > { %6073 = vmatpush3.msra.mxu0 %v1908_v32 }
 0x2ff   : > { %6074 = vmatprep.subr.mxu0 %v1907_v34 }
 0x300   : > { %6075 = vmatpush3.msra.mxu0 %v1907_v34  ;;  %v2285_v34 = vld [vmem:[%s8375_s26] sm:$0xff] }
 0x301   : > { %6076 = vmatprep.subr.mxu0 %v1906_v36 }
 0x302   : > { %6077 = vmatpush3.msra.mxu0 %v1906_v36  ;;  %v5751_v36 = vld [vmem:[%s8375_s26 + $0x38] sm:$0xff] }
 0x303   : > { %6078 = vmatprep.subr.mxu0 %v1905_v37 }
 0x304   : > { %6079 = vmatpush3.msra.mxu0 %v1905_v37  ;;  %v5750_v37 = vld [vmem:[%s8375_s26 + $0x30] sm:$0xff] }
 0x305   : > { %6094 = vmatprep.subr.mxu0 %v2102_v12 }
 0x3b9   : > { %v6055_v39 = vpop.f32.mrf.mxu0 }
 0x3ba   : > { %v1708_v40 = vadd.f32 %v6055_v39, %v5719_v38  ;;  %v5748_v39 = vld [vmem:[%s8375_s26 + $0x20] sm:$0xff] }
 0x3bb   : > { %v1702_v41 = vpop.f32.mrf.mxu0 }
 0x3bc   : > { %v1703_v42 = vadd.f32 %v5719_v38, %v1702_v41  ;;  %v1712_v44 = vmax.f32 %v1708_v40, 0.0  ;;  %v5749_v38 = vld [vmem:[%s8375_s26 + $0x28] sm:$0xff]  ;;  %v7352_v40 = vmov 0.0  }
 0x3bd   : > { %v6071_v45 = vpop.f32.mrf.mxu0 }
 0x3be   : > { %v1711_v46 = vmax.f32 %v1703_v42, 0.0  ;;  %v1900_v47 = vadd.f32 %v6071_v45, %v5725_v43  ;;  %v1714_v51 = vadd.f32 %v1712_v44, %v1616_v27  ;;  %v5742_v27 = vld [vmem:[#allocation20] ss:$0 sm:$0xff] }
 0x3bf   : > { %v1894_v48 = vpop.f32.mrf.mxu0 }
 0x3c0   : > { %v1713_v49 = vadd.f32 %v1711_v46, %v1615_v26  ;;  %v1895_v50 = vadd.f32 %v5725_v43, %v1894_v48  ;;  %v1904_v53 = vmax.f32 %v1900_v47, 0.0  ;;  %v5745_v43 = vld [vmem:[%s8376_s3] ss:$0 sm:$0xff] }
 0x3c2   : > { %v1903_v52 = vmax.f32 %v1895_v50, 0.0  ;;  %6064 = vmatprep.mubr.msk.f32.mxu1 %vm1531_vm2, %v1713_v49  ;;  %v5739_v50 = vld [vmem:[#allocation17] ss:$0 sm:$0xff] }
 0x3c3   : > { %6065 = vmatmul.mubr.msk.f32.vlgmr.msra.gmra.mxu1 %vm1531_vm2, %v1714_v51 }
 0x3c4   : > { %6080 = vmatprep.mubr.msk.f32.mxu0 %vm1531_vm2, %v1903_v52  ;;  %6084 = vmatpush3.msra.mxu1 %v5735_v54 }
 0x3c5   : > { %6081 = vmatmul.mubr.msk.f32.vlgmr.msra.gmra.mxu0 %vm1531_vm2, %v1904_v53  ;;  %6085 = vmatprep.subr.mxu1 %v5734_v55 }
 0x3c6   : > { %6086 = vmatpush3.msra.mxu1 %v5734_v55  ;;  %6095 = vmatpush3.msra.mxu0 %v2102_v12  ;;  %v2482_v55 = vld [vmem:[%s8377_s8 + $0x18] sm:$0xff] }
 0x3c7   : > { %6087 = vmatprep.subr.mxu1 %v5733_v56  ;;  %6096 = vmatprep.subr.mxu0 %v2101_v13 }
 0x3c8   : > { %6088 = vmatpush3.msra.mxu1 %v5733_v56  ;;  %6097 = vmatpush3.msra.mxu0 %v2101_v13  ;;  %v2481_v56 = vld [vmem:[%s8377_s8 + $0x10] sm:$0xff] }
 0x3c9   : > { %6089 = vmatprep.subr.mxu1 %v5732_v57  ;;  %6098 = vmatprep.subr.mxu0 %v2100_v14 }
 0x3ca   : > { %6090 = vmatpush3.msra.mxu1 %v5732_v57  ;;  %6099 = vmatpush3.msra.mxu0 %v2100_v14  ;;  %v2480_v57 = vld [vmem:[%s8377_s8 + $0x8] sm:$0xff] }
 0x3cb   : > { %6105 = vmatprep.subr.mxu1 %v2194_v58  ;;  %6100 = vmatprep.subr.mxu0 %v2099_v15 }
 0x3cc   : > { %6101 = vmatpush3.msra.mxu0 %v2099_v15 }
 0x3cd   : > { %6116 = vmatprep.subr.mxu0 %v2288_v16 }
 0x483   : > { %v6066_v62 = vpop.f32.mrf.mxu1 }
 0x484   : > { %v1804_v11 = vadd.f32 %v6066_v62, %v5722_v5 }
 0x485   : > { %v6082_v60 = vpop.f32.mrf.mxu0  ;;  %v1798_v3 = vpop.f32.mrf.mxu1 }
 0x486   : > { %v1994_v61 = vadd.f32 %v6082_v60, %v5729_v59  ;;  %v1799_v7 = vadd.f32 %v5722_v5, %v1798_v3 }
 0x487   : > { %v1988_v63 = vpop.f32.mrf.mxu0 }
 0x488   : > { %v1989_v0 = vadd.f32 %v5729_v59, %v1988_v63  ;;  %v1998_v1 = vmax.f32 %v1994_v61, 0.0  ;;  %v5753_v59 = vld [vmem:[%s8376_s3 + $0x1] ss:$0 sm:$0xff]  ;;  %s8391_s3 = smov 120  }
 0x48a   : > { %v1997_v2 = vmax.f32 %v1989_v0, 0.0  ;;  %v2000_v6 = vadd.f32 %v1998_v1, %v1904_v53 }
 0x48c   : > { %v1999_v4 = vadd.f32 %v1997_v2, %v1903_v52 }
 0x48e   : > { %6091 = vmatprep.mubr.msk.f32.mxu1 %vm1531_vm2, %v1999_v4 }
 0x48f   : > { %6092 = vmatmul.mubr.msk.f32.vlgmr.msra.gmra.mxu1 %vm1531_vm2, %v2000_v6 }
 0x490   : > { %6106 = vmatpush3.msra.mxu1 %v2194_v58  ;;  %6113 = vmatprep.mubr.msk.f32.mxu1 %vm1531_vm2, %v1799_v7  ;;  %v2479_v58 = vld [vmem:[%s8377_s8] sm:$0xff]  ;;  %s8394_s8 = smov 72  }
 0x491   : > { %6107 = vmatprep.subr.mxu1 %v2193_v8 }
 0x492   : > { %6108 = vmatpush3.msra.mxu1 %v2193_v8 }
 0x493   : > { %6109 = vmatprep.subr.mxu1 %v2192_v9 }
 0x494   : > { %6110 = vmatpush3.msra.mxu1 %v2192_v9 }
 0x495   : > { %6111 = vmatprep.subr.mxu1 %v2191_v10 }
 0x496   : > { %6112 = vmatpush3.msra.mxu1 %v2191_v10 }
 0x497   : > { %6114 = vmatmul.mubr.msk.f32.vlgmr.msra.gmra.mxu1 %vm1531_vm2, %v1804_v11  ;;  %6127 = vmatprep.subr.mxu1 %v5751_v36 }
 0x498   : > { %6128 = vmatpush3.msra.mxu1 %v5751_v36 }
 0x499   : > { %6129 = vmatprep.subr.mxu1 %v5750_v37 }
 0x49a   : > { %6130 = vmatpush3.msra.mxu1 %v5750_v37 }
 0x49b   : > { %6131 = vmatprep.subr.mxu1 %v5749_v38 }
 0x49c   : > { %6132 = vmatpush3.msra.mxu1 %v5749_v38 }
 0x49d   : > { %6133 = vmatprep.subr.mxu1 %v5748_v39 }
 0x49e   : > { %6134 = vmatpush3.msra.mxu1 %v5748_v39 }
 0x49f   : > { %6149 = vmatprep.subr.mxu1 %v7352_v40 }
 0x54f   : > { %v6093_v18 = vpop.f32.mrf.mxu1 }
 0x550   : > { %v2092_v19 = vadd.f32 %v6093_v18, %v5736_v17 }
 0x551   : > { %v2086_v20 = vpop.f32.mrf.mxu1 }
 0x552   : > { %v2087_v21 = vadd.f32 %v5736_v17, %v2086_v20  ;;  %v2096_v22 = vmax.f32 %v2092_v19, 0.0 }
 0x554   : > { %v2095_v23 = vmax.f32 %v2087_v21, 0.0  ;;  %v2098_v25 = vadd.f32 %v2096_v22, %v2000_v6 }
 0x556   : > { %v2097_v24 = vadd.f32 %v2095_v23, %v1999_v4  ;;  %v5756_v4 = vld [vmem:[#allocation22] ss:$0 sm:$0xff] }
 0x557   : > { %v6115_v26 = vpop.f32.mrf.mxu1 }
 0x558   : > { %6102 = vmatprep.mubr.msk.f32.mxu0 %vm1531_vm2, %v2097_v24  ;;  %v2280_v32 = vadd.f32 %v6115_v26, %v5742_v27 }
 0x559   : > { %v2274_v29 = vpop.f32.mrf.mxu1  ;;  %6103 = vmatmul.mubr.msk.f32.vlgmr.msra.gmra.mxu0 %vm1531_vm2, %v2098_v25 }
 0x55a   : > { %v2275_v30 = vadd.f32 %v5742_v27, %v2274_v29  ;;  %6117 = vmatpush3.msra.mxu0 %v2288_v16  ;;  %v2284_v35 = vmax.f32 %v2280_v32, 0.0 }
 0x55b   : > { %6118 = vmatprep.subr.mxu0 %v2287_v28 }
 0x55c   : > { %v2283_v33 = vmax.f32 %v2275_v30, 0.0  ;;  %6119 = vmatpush3.msra.mxu0 %v2287_v28 }
 0x55d   : > { %6120 = vmatprep.subr.mxu0 %v2286_v31 }
 0x55e   : > { %6121 = vmatpush3.msra.mxu0 %v2286_v31  ;;  %6124 = vmatprep.mubr.msk.f32.mxu0 %vm1531_vm2, %v2283_v33 }
 0x55f   : > { %6122 = vmatprep.subr.mxu0 %v2285_v34 }
 0x560   : > { %6123 = vmatpush3.msra.mxu0 %v2285_v34 }
 0x561   : > { %6125 = vmatmul.mubr.msk.f32.vlgmr.msra.gmra.mxu0 %vm1531_vm2, %v2284_v35  ;;  %6138 = vmatprep.subr.mxu0 %v2482_v55 }
 0x562   : > { %6139 = vmatpush3.msra.mxu0 %v2482_v55 }
 0x563   : > { %6140 = vmatprep.subr.mxu0 %v2481_v56 }
 0x564   : > { %6141 = vmatpush3.msra.mxu0 %v2481_v56  ;;  %v5761_v56 = vld [vmem:[%s8380_s6] ss:$0 sm:$0xff] }
 0x565   : > { %6142 = vmatprep.subr.mxu0 %v2480_v57 }
 0x566   : > { %6143 = vmatpush3.msra.mxu0 %v2480_v57 }
 0x567   : > { %6144 = vmatprep.subr.mxu0 %v2479_v58 }
 0x568   : > { %6145 = vmatpush3.msra.mxu0 %v2479_v58 }
 0x569   : > { %6167 = vmatprep.subr.mxu0 %v7352_v40 }
 0x619   : > { %v6104_v41 = vpop.f32.mrf.mxu0 }
 0x61a   : > { %v2188_v53 = vadd.f32 %v6104_v41, %v5739_v50 }
 0x61b   : > { %v2182_v42 = vpop.f32.mrf.mxu0 }
 0x61c   : > { %v2183_v54 = vadd.f32 %v5739_v50, %v2182_v42 }
 0x621   : > { %v6126_v44 = vpop.f32.mrf.mxu0 }
 0x622   : > { %v2374_v45 = vadd.f32 %v6126_v44, %v5745_v43 }
 0x623   : > { %v2368_v46 = vpop.f32.mrf.mxu0 }
 0x624   : > { %v2369_v47 = vadd.f32 %v5745_v43, %v2368_v46  ;;  %v2378_v48 = vmax.f32 %v2374_v45, 0.0  ;;  %v2758_v46 = vld [vmem:[%s8378_s23 + $0x18] sm:$0xff] }
 0x626   : > { %v2377_v49 = vmax.f32 %v2369_v47, 0.0  ;;  %v2380_v52 = vadd.f32 %v2378_v48, %v2284_v35  ;;  %v2757_v47 = vld [vmem:[%s8378_s23 + $0x10] sm:$0xff]  ;;  %v2756_v48 = vld [vmem:[%s8378_s23 + $0x8] sm:$0xff] }
 0x628   : > { %v2379_v51 = vadd.f32 %v2377_v49, %v2283_v33  ;;  %v2755_v49 = vld [vmem:[%s8378_s23] sm:$0xff] }
 0x62a   : > { %6135 = vmatprep.mubr.msk.f32.mxu1 %vm1531_vm2, %v2379_v51 }
 0x62b   : > { %6136 = vmatmul.mubr.msk.f32.vlgmr.msra.gmra.mxu1 %vm1531_vm2, %v2380_v52 }
 0x62c   : > { %6150 = vmatpush3.msra.mxu1 %v2188_v53  ;;  %6153 = vmatprep.mubr.msk.f32.mxu1 %vm7353_vm5, %v7352_v40 }
 0x62d   : > { %6151 = vmatprep.subr.mxu1 %v7352_v40 }
 0x62e   : > { %6152 = vmatpush3.msra.mxu1 %v2183_v54  ;;  %v5760_v54 = vld [vmem:[%s8379_s28] ss:$0 sm:$0xff] }
 0x62f   : > { %6156 = vmatprep.subr.mxu1 %v7352_v40 }
 0x6eb   : > { %v6137_v60 = vpop.f32.mrf.mxu1 }
 0x6ec   : > { %v2472_v61 = vadd.f32 %v6137_v60, %v5753_v59 }
 0x6ed   : > { %v2466_v62 = vpop.f32.mrf.mxu1 }
 0x6ee   : > { %v2467_v63 = vadd.f32 %v5753_v59, %v2466_v62  ;;  %v2476_v0 = vmax.f32 %v2472_v61, 0.0  ;;  %v5762_v59 = vld [vmem:[%s8381_s15] ss:$0 sm:$0xff]  ;;  %s8275_s15 = smov 72  }
 0x6f0   : > { %v2475_v1 = vmax.f32 %v2467_v63, 0.0  ;;  %v2478_v3 = vadd.f32 %v2476_v0, %v2380_v52 }
 0x6f2   : > { %v2477_v2 = vadd.f32 %v2475_v1, %v2379_v51 }
 0x6f4   : > { %6146 = vmatprep.mubr.msk.f32.mxu0 %vm1531_vm2, %v2477_v2 }
 0x6f5   : > { %6147 = vmatmul.mubr.msk.f32.vlgmr.msra.gmra.mxu0 %vm1531_vm2, %v2478_v3 }
 0x6f6   : > { %6169 = vmatprep.mubr.msk.f32.mxu0 %vm7353_vm5, %v7352_v40 }
 0x7b5   : > { %v6148_v5 = vpop.f32.mrf.mxu0 }
 0x7b6   : > { %v7873_v6 = vadd.f32 %v6148_v5, %v5756_v4 }
 0x7b7   : > { %v2562_v7 = vpop.f32.mrf.mxu0 }
 0x7b8   : > { %v7875_v8 = vadd.f32 %v5756_v4, %v2562_v7  ;;  %v7879_v9 = vsel %vm2571_vm6, %v7873_v6, -inf }
 0x7ba   : > { %v7883_v10 = vsel %vm2571_vm6, %v7875_v8, -inf }
 0x7bb   : > { %v2574_v11 = vmax.f32 %v7883_v10, %v7879_v9 }
 0x7bd   : > { %v2575_v12 = vrot.slane %v2574_v11, 4 }
 0x7bf   : > { %v2576_v13 = vmax.f32 %v2574_v11, %v2575_v12 }
 0x7c1   : > { %v2577_v14 = vrot.slane %v2576_v13, 2 }
 0x7c3   : > { %v2578_v15 = vmax.f32 %v2576_v13, %v2577_v14 }
 0x7c5   : > { %v2579_v16 = vrot.slane %v2578_v15, 1 }
 0x7c7   : > { %v2580_v17 = vmax.f32 %v2578_v15, %v2579_v16 }
 0x7c9   : > { %v2581_v18 = vsub.f32 %v7875_v8, %v2580_v17  ;;  %v2582_v19 = vsub.f32 %v7873_v6, %v2580_v17 }
 0x7cb   : > { %v2583_v20 = vmul.f32 1.442695, %v2581_v18  ;;  %v2585_v21 = vmul.f32 1.442695, %v2582_v19 }
 0x7cd   : > { %6668 = vpow2.f32 %v2583_v20 }
 0x7ce   : > { %6670 = vpow2.f32 %v2585_v21 }
 0x7da   : > { %v6669_v22 = vpop.eup %6668 }
 0x7db   : > { %v6671_v23 = vpop.eup %6670  ;;  %v2587_v24 = vsel %vm2571_vm6, %v6669_v22, 0.0 }
 0x7dc   : > { %v2588_v25 = vsel %vm2571_vm6, %v6671_v23, 0.0 }
 0x7dd   : > { %v2589_v26 = vadd.f32 %v2588_v25, %v2587_v24 }
 0x7df   : > { %v2590_v27 = vrot.slane %v2589_v26, 4 }
 0x7e1   : > { %v2591_v28 = vadd.f32 %v2590_v27, %v2589_v26 }
 0x7e3   : > { %v2592_v29 = vrot.slane %v2591_v28, 2 }
 0x7e5   : > { %v2593_v30 = vadd.f32 %v2592_v29, %v2591_v28 }
 0x7e7   : > { %v2594_v31 = vrot.slane %v2593_v30, 1 }
 0x7e9   : > { %v2595_v32 = vadd.f32 %v2594_v31, %v2593_v30 }
 0x7eb   : > { %6672 = vrcp.f32 %v2595_v32 }
 0x7f8   : > { %v6673_v33 = vpop.eup %6672 }
 0x7f9   : > { %v2597_v34 = vmul.f32 %v6673_v33, %v6669_v22  ;;  %v2598_v35 = vmul.f32 %v6673_v33, %v6671_v23 }
 0x7fb   : > { %2599 = vxpose.xlu0.b32.start [1/2] (short) (narrow) %v2597_v34, 8 }
 0x7ff   : > { %2600 = vxpose.xlu0.b32.end [2/2] (short) (narrow) %v2598_v35, 8 }
 0x877   : > { %v2615_v36 = vpop.trf.xlu0 }
 0x878   : > { %6154 = vmatmul.mubr.msk.f32.vlgmr.msra.gmra.mxu1 %vm2651_vm7, %v2615_v36 }
 0x879   : > { %6164 = vmatprep.mubr.msk.f32.mxu1 %vm7353_vm5, %v7352_v40  ;;  %6157 = vmatpush3.msra.mxu1 %v2758_v46 }
 0x87a   : > { %6158 = vmatprep.subr.mxu1 %v7352_v40 }
 0x87b   : > { %6159 = vmatpush3.msra.mxu1 %v2757_v47 }
 0x87c   : > { %6160 = vmatprep.subr.mxu1 %v7352_v40 }
 0x87d   : > { %6161 = vmatpush3.msra.mxu1 %v2756_v48 }
 0x87e   : > { %6162 = vmatprep.subr.mxu1 %v7352_v40 }
 0x87f   : > { %6163 = vmatpush3.msra.mxu1 %v2755_v49 }
 0x880   : > { %6177 = vmatprep.subr.mxu1 %v7352_v40 }
 0x938   : > { %v7894_v37 = vpop.f32.mrf.mxu1 }
 0x939   : > { %v2727_v38 = vsel %vm1531_vm2, %v7894_v37, 0.0 }
 0x93a   : > { %2728 = vadd.xlane.f32.xlu1 %v2727_v38  ;;  %v6155_v39 = vpop.f32.mrf.mxu1 }
 0x9c3   : > { %v2729_v41 = vpop.xlane.xlu1 %2728 }
 0x9c4   : > { %v2731_v42 = vmul.f32 0.03125, %v2729_v41 }
 0x9c6   : > { %v2732_v43 = vsub.f32 %v7894_v37, %v2731_v42 }
 0x9c8   : > { %v2733_v44 = vmul.f32 %v2732_v43, %v2732_v43 }
 0x9ca   : > { %v2734_v45 = vsel %vm1531_vm2, %v2733_v44, 0.0 }
 0x9cb   : > { %2735 = vadd.xlane.f32.xlu1 %v2734_v45 }
 0xa54   : > { %v2736_v50 = vpop.xlane.xlu1 %2735 }
 0xa55   : > { %v2737_v51 = vmul.f32 0.03125, %v2736_v50 }
 0xa57   : > { %v2738_v52 = vadd.f32 1e-05, %v2737_v51 }
 0xa59   : > { %6674 = vrsqrt.f32 %v2738_v52 }
 0xa66   : > { %v6675_v53 = vpop.eup %6674 }
 0xa67   : > { %v2740_v55 = vmul.f32 %v6675_v53, %v2732_v43 }
 0xa69   : > { %v2747_v57 = vmul.f32 %v5760_v54, %v2740_v55 }
 0xa6b   : > { %v2754_v58 = vadd.f32 %v5761_v56, %v2747_v57 }
 0xa6d   : > { %6165 = vmatmul.mubr.msk.f32.vlgmr.msra.gmra.mxu1 %vm1531_vm2, %v2754_v58 }
 0xa6e   : > { %6179 = vmatprep.mubr.msk.f32.mxu1 %vm7353_vm5, %v7352_v40 }
 0xb2d   : > { %v2835_v60 = vpop.f32.mrf.mxu1 }
 0xb2e   : > { %v7914_v61 = vadd.f32 %v5762_v59, %v2835_v60 }
 0xb2f   : > { %v6166_v62 = vpop.f32.mrf.mxu1 }
 0xb30   : > { %3006 = vrot.lane.b32.xlu1 %v7914_v61, %s8274_s18  ;;  %2840 = vrot.lane.b32.xlu0 %v7914_v61, %s7355_s10  ;;  %s8278_s18 = smov 104  }
 0xb34   : > { %3004 = vrot.lane.b32.xlu1 %v7914_v61, %s8282_s2 }
 0xb38   : > { %3172 = vrot.lane.b32.xlu1 %v7914_v61, %s8277_s1  ;;  %s8280_s1 = smov 48  }
 0xb3c   : > { %3170 = vrot.lane.b32.xlu1 %v7914_v61, %s8287_s17 }
 0xb40   : > { %3338 = vrot.lane.b32.xlu1 %v7914_v61, %s8275_s15  ;;  %s8276_s15 = smov 56  }
 0xb44   : > { %3336 = vrot.lane.b32.xlu1 %v7914_v61, %s8278_s18  ;;  %s8279_s18 = smov 40  }
 0xba2   : > { %v3007_v63 = vpop.permute.xlu1 %3006  ;;  %v2841_v0 = vpop.permute.xlu0 %2840 }
 0xba3   : > { %6168 = vmatpush3.xpose.msk.msra.mxu0 %vm2571_vm6, %v2841_v0  ;;  %6178 = vmatpush3.xpose.msk.msra.mxu1 %vm2571_vm6, %v3007_v63  ;;  %v3521_v0 = vld [vmem:[#allocation28 + $0x18] sm:$0xff] }
 0xba4   : > { %6187 = vmatprep.subr.mxu1 %v7352_v40  ;;  %6172 = vmatprep.subr.mxu0 %v7352_v40 }
 0xba6   : > { %v3005_v1 = vpop.permute.xlu1 %3004  ;;  %6170 = vmatmul.mubr.msk.f32.vlgmr.msra.gmra.mxu0 %vm2571_vm6, %v7914_v61 }
 0xba7   : > { %6180 = vmatmul.mubr.msk.f32.vlgmr.msra.gmra.mxu1 %vm2571_vm6, %v3005_v1  ;;  %6174 = vmatprep.mubr.msk.f32.mxu0 %vm7353_vm5, %v7352_v40 }
 0xba8   : > { %6189 = vmatprep.mubr.msk.f32.mxu1 %vm7353_vm5, %v7352_v40 }
 0xbaa   : > { %v3173_v2 = vpop.permute.xlu1 %3172 }
 0xbab   : > { %6188 = vmatpush3.xpose.msk.msra.mxu1 %vm2571_vm6, %v3173_v2 }
 0xbac   : > { %6197 = vmatprep.subr.mxu1 %v7352_v40 }
 0xbae   : > { %v3171_v3 = vpop.permute.xlu1 %3170 }
 0xbaf   : > { %6190 = vmatmul.mubr.msk.f32.vlgmr.msra.gmra.mxu1 %vm2571_vm6, %v3171_v3 }
 0xbb0   : > { %6199 = vmatprep.mubr.msk.f32.mxu1 %vm7353_vm5, %v7352_v40 }
 0xbb2   : > { %v3339_v4 = vpop.permute.xlu1 %3338 }
 0xbb3   : > { %6198 = vmatpush3.xpose.msk.msra.mxu1 %vm2571_vm6, %v3339_v4 }
 0xbb4   : > { %6207 = vmatprep.subr.mxu1 %v7352_v40 }
 0xbb6   : > { %v3337_v5 = vpop.permute.xlu1 %3336 }
 0xbb7   : > { %6200 = vmatmul.mubr.msk.f32.vlgmr.msra.gmra.mxu1 %vm2571_vm6, %v3337_v5  ;;  %v3520_v5 = vld [vmem:[#allocation28 + $0x10] sm:$0xff] }
 0xbb8   : > { %6215 = vmatprep.mubr.msk.f32.mxu1 %vm7353_vm5, %v7352_v40  ;;  %6208 = vmatpush3.msra.mxu1 %v3521_v0 }
 0xbb9   : > { %6209 = vmatprep.subr.mxu1 %v7352_v40 }
 0xbba   : > { %6210 = vmatpush3.msra.mxu1 %v3520_v5 }
 0xbbb   : > { %6211 = vmatprep.subr.mxu1 %v7352_v40 }
 0xc66   : > { %v2912_v7 = vpop.f32.mrf.mxu0 }
 0xc67   : > { %v2916_v11 = vmul.f32 0.35355338, %v2912_v7  ;;  %v3078_v12 = vpop.f32.mrf.mxu1  ;;  %v3519_v7 = vld [vmem:[#allocation28 + $0x8] sm:$0xff] }
 0xc68   : > { %v3082_v13 = vmul.f32 0.35355338, %v3078_v12  ;;  %v6171_v14 = vpop.f32.mrf.mxu0  ;;  %6212 = vmatpush3.msra.mxu1 %v3519_v7 }
 0xc69   : > { %v6181_v15 = vpop.f32.mrf.mxu1  ;;  %v2917_v16 = vsel %vm2571_vm6, %v2916_v11, -inf  ;;  %6213 = vmatprep.subr.mxu1 %v7352_v40 }
 0xc6a   : > { %2918 = vmax.xlane.f32.xlu1 %v2917_v16  ;;  %v3083_v17 = vsel %vm2571_vm6, %v3082_v13, -inf }
 0xc6b   : > { %3084 = vmax.xlane.f32.xlu0 %v3083_v17 }
 0xc6f   : > { %v3244_v18 = vpop.f32.mrf.mxu1 }
 0xc70   : > { %v3248_v19 = vmul.f32 0.35355338, %v3244_v18 }
 0xc71   : > { %v6191_v20 = vpop.f32.mrf.mxu1 }
 0xc72   : > { %v3249_v21 = vsel %vm2571_vm6, %v3248_v19, -inf }
 0xc73   : > { %3250 = vmax.xlane.f32.xlu0 %v3249_v21 }
 0xc77   : > { %v3410_v22 = vpop.f32.mrf.mxu1 }
 0xc78   : > { %v3414_v23 = vmul.f32 0.35355338, %v3410_v22 }
 0xc79   : > { %v6201_v24 = vpop.f32.mrf.mxu1 }
 0xc7a   : > { %v3415_v25 = vsel %vm2571_vm6, %v3414_v23, -inf }
 0xc7b   : > { %3416 = vmax.xlane.f32.xlu1 %v3415_v25 }
 0xc8c   : > { %3094 = vrot.lane.b32.xlu1 %v7914_v61, %s8276_s15  ;;  %s8281_s15 = smov 64  }
 0xcf3   : > { %v2919_v26 = vpop.xlane.xlu1 %2918 }
 0xcf4   : > { %v2920_v27 = vsub.f32 %v2916_v11, %v2919_v26  ;;  %v3085_v28 = vpop.xlane.xlu0 %3084  ;;  %v3518_v11 = vld [vmem:[#allocation28] sm:$0xff] }
 0xcf5   : > { %v3086_v29 = vsub.f32 %v3082_v13, %v3085_v28  ;;  %6214 = vmatpush3.msra.mxu1 %v3518_v11  ;;  %v5791_v11 = vld [vmem:[%s8378_s23 + $0x38] sm:$0xff] }
 0xcf6   : > { %v2921_v30 = vmul.f32 1.442695, %v2920_v27  ;;  %6229 = vmatprep.subr.mxu1 %v7352_v40 }
 0xcf7   : > { %v3087_v31 = vmul.f32 1.442695, %v3086_v29 }
 0xcf8   : > { %6676 = vpow2.f32 %v2921_v30 }
 0xcf9   : > { %6678 = vpow2.f32 %v3087_v31 }
 0xcfc   : > { %v3251_v43 = vpop.xlane.xlu0 %3250 }
 0xcfd   : > { %v3252_v44 = vsub.f32 %v3248_v19, %v3251_v43 }
 0xcff   : > { %v3253_v45 = vmul.f32 1.442695, %v3252_v44 }
 0xd04   : > { %v3417_v32 = vpop.xlane.xlu1 %3416 }
 0xd05   : > { %v6677_v33 = vpop.eup %6676  ;;  %v3418_v34 = vsub.f32 %v3414_v23, %v3417_v32 }
 0xd06   : > { %v6679_v35 = vpop.eup %6678  ;;  %v2923_v36 = vsel %vm2571_vm6, %v6677_v33, 0.0 }
 0xd07   : > { %v3419_v38 = vmul.f32 1.442695, %v3418_v34  ;;  %2924 = vadd.xlane.f32.xlu0 %v2923_v36  ;;  %v3089_v39 = vsel %vm2571_vm6, %v6679_v35, 0.0  ;;  %v3634_v34 = vld [vmem:[#allocation29 + $0x8] sm:$0xff]  ;;  %v3725_v36 = vld [vmem:[%s7558_s9 + $0x38] sm:$0xff] }
 0xd08   : > { %3090 = vadd.xlane.f32.xlu1 %v3089_v39  ;;  %v3095_v48 = vpop.permute.xlu1 %3094  ;;  %v3723_v39 = vld [vmem:[%s7558_s9 + $0x28] sm:$0xff] }
 0xd09   : > { %6680 = vpow2.f32 %v3419_v38  ;;  %v3724_v38 = vld [vmem:[%s7558_s9 + $0x30] sm:$0xff] }
 0xd0a   : > { %6682 = vpow2.f32 %v3253_v45 }
 0xd16   : > { %v6681_v41 = vpop.eup %6680 }
 0xd17   : > { %v3421_v42 = vsel %vm2571_vm6, %v6681_v41, 0.0  ;;  %v6683_v46 = vpop.eup %6682 }
 0xd18   : > { %3422 = vadd.xlane.f32.xlu1 %v3421_v42  ;;  %v3255_v47 = vsel %vm2571_vm6, %v6683_v46, 0.0  ;;  %v3721_v42 = vld [vmem:[%s7558_s9 + $0x18] sm:$0xff] }
 0xd1d   : > { %2928 = vrot.lane.b32.xlu0 %v7914_v61, %s8281_s15  ;;  %s8383_s15 = sld [smem:[#allocation66_spill]] }
 0xd23   : > { %s8384_s2 = smov %s8383_s15  ;;  %v5777_v23 = vld [vmem:[%s8383_s15] ss:$0 sm:$0xff]  ;;  %s8385_s15 = sld [smem:[#allocation67_spill]] }
 0xd29   : > { %3260 = vrot.lane.b32.xlu1 %v7914_v61, %s8280_s1  ;;  %s8285_s1 = smov 16  }
 0xd3c   : > { %3256 = vadd.xlane.f32.xlu0 %v3255_v47  ;;  %v5778_v47 = vld [vmem:[%s8385_s15] ss:$0 sm:$0xff] }
 0xd52   : > { %3426 = vrot.lane.b32.xlu0 %v7914_v61, %s8279_s18  ;;  %s8283_s18 = smov 8  }
 0xd90   : > { %v2925_v49 = vpop.xlane.xlu0 %2924 }
 0xd91   : > { %6684 = vrcp.f32 %v2925_v49  ;;  %v3091_v50 = vpop.xlane.xlu1 %3090 }
 0xd92   : > { %6686 = vrcp.f32 %v3091_v50 }
 0xd94   : > { %v2929_v51 = vpop.permute.xlu0 %2928 }
 0xd95   : > { %6173 = vmatpush3.msra.mxu0 %v2929_v51 }
 0xd96   : > { %6182 = vmatprep.subr.mxu0 %v7352_v40 }
 0xd9e   : > { %v6685_v52 = vpop.eup %6684 }
 0xd9f   : > { %v2927_v53 = vmul.f32 %v6685_v52, %v6677_v33  ;;  %v6687_v54 = vpop.eup %6686  ;;  %v3636_v33 = vld [vmem:[#allocation29 + $0x18] sm:$0xff]  ;;  %v3720_v52 = vld [vmem:[%s7558_s9 + $0x10] sm:$0xff] }
 0xda0   : > { %v3093_v56 = vmul.f32 %v6687_v54, %v6679_v35  ;;  %v3633_v35 = vld [vmem:[#allocation29] sm:$0xff] }
 0xda1   : > { %6175 = vmatmul.mubr.msk.f32.vlgmr.msra.gmra.mxu0 %vm2571_vm6, %v2927_v53  ;;  %v3423_v55 = vpop.xlane.xlu1 %3422  ;;  %v3719_v53 = vld [vmem:[%s7558_s9 + $0x8] sm:$0xff]  ;;  %v3718_v54 = vld [vmem:[%s7558_s9] sm:$0xff] }
 0xda2   : > { %6183 = vmatpush3.msra.mxu0 %v3095_v48  ;;  %6184 = vmatprep.mubr.msk.f32.mxu0 %vm7353_vm5, %v7352_v40 }
 0xda3   : > { %6192 = vmatprep.subr.mxu0 %v7352_v40 }
 0xda5   : > { %6185 = vmatmul.mubr.msk.f32.vlgmr.msra.gmra.mxu0 %vm2571_vm6, %v3093_v56  ;;  %v3261_v57 = vpop.permute.xlu1 %3260 }
 0xda6   : > { %6193 = vmatpush3.msra.mxu0 %v3261_v57  ;;  %6194 = vmatprep.mubr.msk.f32.mxu0 %vm7353_vm5, %v7352_v40 }
 0xda7   : > { %6202 = vmatprep.subr.mxu0 %v7352_v40 }
 0xdc5   : > { %v3257_v58 = vpop.xlane.xlu0 %3256 }
 0xdc6   : > { %6688 = vrcp.f32 %v3257_v58 }
 0xdc7   : > { %6690 = vrcp.f32 %v3423_v55  ;;  %v5780_v55 = vld [vmem:[%s7553_s21] ss:$0 sm:$0xff] }
 0xdc9   : > { %v3427_v62 = vpop.permute.xlu0 %3426 }
 0xdd3   : > { %v6689_v59 = vpop.eup %6688 }
 0xdd4   : > { %v3259_v60 = vmul.f32 %v6689_v59, %v6683_v46  ;;  %v6691_v61 = vpop.eup %6690 }
 0xdd5   : > { %v3425_v63 = vmul.f32 %v6691_v61, %v6681_v41  ;;  %v3722_v41 = vld [vmem:[%s7558_s9 + $0x20] sm:$0xff] }
 0xdd6   : > { %6195 = vmatmul.mubr.msk.f32.vlgmr.msra.gmra.mxu0 %vm2571_vm6, %v3259_v60  ;;  %v5782_v60 = vld [vmem:[%s8325_s4] ss:$0 sm:$0xff] }
 0xdd7   : > { %6203 = vmatpush3.msra.mxu0 %v3427_v62  ;;  %6204 = vmatprep.mubr.msk.f32.mxu0 %vm7353_vm5, %v7352_v40 }
 0xdd8   : > { %6218 = vmatprep.subr.mxu0 %v7352_v40 }
 0xdda   : > { %6205 = vmatmul.mubr.msk.f32.vlgmr.msra.gmra.mxu0 %vm2571_vm6, %v3425_v63 }
 0xddb   : > { %6226 = vmatprep.mubr.msk.f32.mxu0 %vm7353_vm5, %v7352_v40  ;;  %6219 = vmatpush3.msra.mxu0 %v3636_v33 }
 0xddc   : > { %6220 = vmatprep.subr.mxu0 %v7352_v40 }
 0xe61   : > { %v3000_v1 = vpop.f32.mrf.mxu0 }
 0xe63   : > { %v6176_v2 = vpop.f32.mrf.mxu0 }
 0xe65   : > { %v3166_v3 = vpop.f32.mrf.mxu0 }
 0xe66   : > { %3503 = vrot.lane.b32.xlu1 %v3166_v3, %s8283_s18  ;;  %s8286_s18 = smov 24  }
 0xe67   : > { %v6186_v4 = vpop.f32.mrf.mxu0 }
 0xe96   : > { %v3332_v12 = vpop.f32.mrf.mxu0 }
 0xe97   : > { %3507 = vrot.lane.b32.xlu0 %v3332_v12, %s8285_s1  ;;  %s8386_s1 = smov %s8385_s15  ;;  %v5790_v12 = vld [vmem:[%s8378_s23 + $0x30] sm:$0xff]  ;;  %s8390_s15 = smov 112  }
 0xe98   : > { %v6196_v13 = vpop.f32.mrf.mxu0 }
 0xe99   : > { %v5789_v13 = vld [vmem:[%s8378_s23 + $0x28] sm:$0xff] }
 0xe9a   : > { %v3498_v14 = vpop.f32.mrf.mxu0 }
 0xe9b   : > { %3511 = vrot.lane.b32.xlu1 %v3498_v14, %s8286_s18  ;;  %s8387_s18 = sld [smem:[#allocation68_spill]]  ;;  %v5788_v14 = vld [vmem:[%s8378_s23 + $0x20] sm:$0xff] }
 0xe9c   : > { %v6206_v15 = vpop.f32.mrf.mxu0 }
 0xea1   : > { %s8388_s17 = smov %s8387_s18  ;;  %v5779_v49 = vld [vmem:[%s8387_s18] ss:$0 sm:$0xff]  ;;  %s8389_s18 = smov 88  }
 0xed8   : > { %v3504_v16 = vpop.permute.xlu1 %3503 }
 0xed9   : > { %v3514_v18 = vsel %vm2571_vm6, %v3000_v1, %v3504_v16 }
 0xf09   : > { %v3508_v17 = vpop.permute.xlu0 %3507 }
 0xf0a   : > { %v3515_v19 = vsel %vm2651_vm7, %v3514_v18, %v3508_v17 }
 0xf0d   : > { %v3512_v20 = vpop.permute.xlu1 %3511 }
 0xf0e   : > { %v3517_v21 = vsel %vm3516_vm8, %v3515_v19, %v3512_v20  ;;  %v5786_v19 = vld [vmem:[%s8379_s28 + $0x1] ss:$0 sm:$0xff] }
 0xf0f   : > { %6216 = vmatmul.mubr.msk.f32.vlgmr.msra.gmra.mxu1 %vm1531_vm2, %v3517_v21  ;;  %v5787_v21 = vld [vmem:[%s8380_s6 + $0x1] ss:$0 sm:$0xff]  ;;  %s8393_s6 = smov 80  }
 0xf10   : > { %6245 = vmatprep.mubr.msk.f32.mxu1 %vm7353_vm5, %v7352_v40  ;;  %6230 = vmatpush3.msra.mxu1 %v3725_v36 }
 0xf11   : > { %6231 = vmatprep.subr.mxu1 %v7352_v40 }
 0xf12   : > { %6232 = vmatpush3.msra.mxu1 %v3724_v38 }
 0xf13   : > { %6233 = vmatprep.subr.mxu1 %v7352_v40 }
 0xf14   : > { %6234 = vmatpush3.msra.mxu1 %v3723_v39 }
 0xf15   : > { %6235 = vmatprep.subr.mxu1 %v7352_v40 }
 0xf16   : > { %6236 = vmatpush3.msra.mxu1 %v3722_v41 }
 0xf17   : > { %6237 = vmatprep.subr.mxu1 %v7352_v40 }
 0xf18   : > { %6238 = vmatpush3.msra.mxu1 %v3721_v42 }
 0xf19   : > { %6239 = vmatprep.subr.mxu1 %v7352_v40 }
 0xf1a   : > { %6240 = vmatpush3.msra.mxu1 %v3720_v52 }
 0xf1b   : > { %6241 = vmatprep.subr.mxu1 %v7352_v40 }
 0xf1c   : > { %6242 = vmatpush3.msra.mxu1 %v3719_v53 }
 0xf1d   : > { %6243 = vmatprep.subr.mxu1 %v7352_v40 }
 0xf1e   : > { %6244 = vmatpush3.msra.mxu1 %v3718_v54 }
 0xf1f   : > { %6269 = vmatprep.subr.mxu1 %v7352_v40 }
 0xfcf   : > { %v3591_v22 = vpop.f32.mrf.mxu1 }
 0xfd0   : > { %v3595_v24 = vadd.f32 %v3591_v22, %v7894_v37  ;;  %v3635_v37 = vld [vmem:[#allocation29 + $0x10] sm:$0xff] }
 0xfd1   : > { %v6217_v25 = vpop.f32.mrf.mxu1  ;;  %6221 = vmatpush3.msra.mxu0 %v3635_v37 }
 0xfd2   : > { %v7998_v26 = vadd.f32 %v5777_v23, %v3595_v24  ;;  %6222 = vmatprep.subr.mxu0 %v7352_v40  ;;  %v5793_v24 = vld [vmem:[%s8382_s24 + $0x1] ss:$0 sm:$0xff] }
 0xfd3   : > { %6223 = vmatpush3.msra.mxu0 %v3634_v34 }
 0xfd4   : > { %v3606_v27 = vsel %vm1531_vm2, %v7998_v26, 0.0  ;;  %6224 = vmatprep.subr.mxu0 %v7352_v40 }
 0xfd5   : > { %3607 = vadd.xlane.f32.xlu0 %v3606_v27  ;;  %6225 = vmatpush3.msra.mxu0 %v3633_v35 }
 0xfd6   : > { %6248 = vmatprep.subr.mxu0 %v7352_v40 }
0x105e   : > { %v3608_v28 = vpop.xlane.xlu0 %3607 }
0x105f   : > { %v3609_v29 = vmul.f32 0.03125, %v3608_v28 }
0x1061   : > { %v3610_v30 = vsub.f32 %v7998_v26, %v3609_v29 }
0x1063   : > { %v3611_v31 = vmul.f32 %v3610_v30, %v3610_v30 }
0x1065   : > { %v3612_v32 = vsel %vm1531_vm2, %v3611_v31, 0.0 }
0x1066   : > { %3613 = vadd.xlane.f32.xlu1 %v3612_v32 }
0x10ef   : > { %v3614_v43 = vpop.xlane.xlu1 %3613 }
0x10f0   : > { %v3615_v44 = vmul.f32 0.03125, %v3614_v43 }
0x10f2   : > { %v3616_v45 = vadd.f32 1e-05, %v3615_v44 }
0x10f4   : > { %6692 = vrsqrt.f32 %v3616_v45 }
0x1101   : > { %v6693_v46 = vpop.eup %6692 }
0x1102   : > { %v3618_v48 = vmul.f32 %v6693_v46, %v3610_v30 }
0x1104   : > { %v3625_v50 = vmul.f32 %v5778_v47, %v3618_v48 }
0x1106   : > { %v3632_v51 = vadd.f32 %v5779_v49, %v3625_v50 }
0x1108   : > { %6227 = vmatmul.mubr.msk.f32.vlgmr.msra.gmra.mxu0 %vm1531_vm2, %v3632_v51 }
0x1109   : > { %6256 = vmatprep.mubr.msk.f32.mxu0 %vm7353_vm5, %v7352_v40  ;;  %6249 = vmatpush3.msra.mxu0 %v5791_v11 }
0x110a   : > { %6250 = vmatprep.subr.mxu0 %v7352_v40 }
0x110b   : > { %6251 = vmatpush3.msra.mxu0 %v5790_v12 }
0x110c   : > { %6252 = vmatprep.subr.mxu0 %v7352_v40 }
0x110d   : > { %6253 = vmatpush3.msra.mxu0 %v5789_v13 }
0x110e   : > { %6254 = vmatprep.subr.mxu0 %v7352_v40 }
0x110f   : > { %6255 = vmatpush3.msra.mxu0 %v5788_v14 }
0x1110   : > { %6259 = vmatprep.subr.mxu0 %v7352_v40 }
0x11c8   : > { %v3713_v56 = vpop.f32.mrf.mxu0 }
0x11c9   : > { %v3714_v57 = vadd.f32 %v5780_v55, %v3713_v56 }
0x11ca   : > { %v6228_v58 = vpop.f32.mrf.mxu0 }
0x11cb   : > { %v3717_v59 = vmax.f32 %v3714_v57, 0.0 }
0x11cd   : > { %6246 = vmatmul.mubr.msk.f32.vlgmr.msra.gmra.mxu1 %vm3733_vm9, %v3717_v59 }
0x11ce   : > { %6271 = vmatprep.mubr.msk.f32.mxu1 %vm7353_vm5, %v7352_v40 }
0x128d   : > { %v3803_v61 = vpop.f32.mrf.mxu1 }
0x128e   : > { %v3804_v62 = vadd.f32 %v5782_v60, %v3803_v61 }
0x128f   : > { %v6247_v63 = vpop.f32.mrf.mxu1 }
0x1290   : > { %v8035_v0 = vadd.f32 %v3804_v62, %v7998_v26 }
0x1292   : > { %v3812_v1 = vsel %vm1531_vm2, %v8035_v0, 0.0 }
0x1293   : > { %3813 = vadd.xlane.f32.xlu0 %v3812_v1 }
0x131c   : > { %v3814_v2 = vpop.xlane.xlu0 %3813 }
0x131d   : > { %v3815_v3 = vmul.f32 0.03125, %v3814_v2 }
0x131f   : > { %v3816_v4 = vsub.f32 %v8035_v0, %v3815_v3 }
0x1321   : > { %v3817_v5 = vmul.f32 %v3816_v4, %v3816_v4 }
0x1323   : > { %v3818_v7 = vsel %vm1531_vm2, %v3817_v5, 0.0 }
0x1324   : > { %3819 = vadd.xlane.f32.xlu0 %v3818_v7 }
0x13ad   : > { %v3820_v15 = vpop.xlane.xlu0 %3819 }
0x13ae   : > { %v3821_v16 = vmul.f32 0.03125, %v3820_v15 }
0x13b0   : > { %v3822_v17 = vadd.f32 1e-05, %v3821_v16 }
0x13b2   : > { %6694 = vrsqrt.f32 %v3822_v17 }
0x13bf   : > { %v6695_v18 = vpop.eup %6694 }
0x13c0   : > { %v3824_v20 = vmul.f32 %v6695_v18, %v3816_v4 }
0x13c2   : > { %v3831_v22 = vmul.f32 %v5786_v19, %v3824_v20 }
0x13c4   : > { %v3838_v23 = vadd.f32 %v5787_v21, %v3831_v22 }
0x13c6   : > { %6257 = vmatmul.mubr.msk.f32.vlgmr.msra.gmra.mxu0 %vm1531_vm2, %v3838_v23 }
0x13c7   : > { %6261 = vmatprep.mubr.msk.f32.mxu0 %vm7353_vm5, %v7352_v40 }
0x1486   : > { %v3921_v25 = vpop.f32.mrf.mxu0 }
0x1487   : > { %v8055_v26 = vadd.f32 %v5793_v24, %v3921_v25 }
0x1488   : > { %v6258_v27 = vpop.f32.mrf.mxu0 }
0x1489   : > { %4092 = vrot.lane.b32.xlu0 %v8055_v26, %s8389_s18  ;;  %3926 = vrot.lane.b32.xlu1 %v8055_v26, %s7355_s10  ;;  %s8399_s10 = smov 8   ;;  %s8400_s18 = smov 16  }
0x148d   : > { %4256 = vrot.lane.b32.xlu0 %v8055_v26, %s8390_s15  ;;  %4090 = vrot.lane.b32.xlu1 %v8055_v26, %s8391_s3  ;;  %s8396_s3 = smov 64   ;;  %s8401_s15 = smov 24  }
0x1491   : > { %4422 = vrot.lane.b32.xlu0 %v8055_v26, %s8392_s5  ;;  %4258 = vrot.lane.b32.xlu1 %v8055_v26, %s8393_s6  ;;  %s8395_s5 = smov 56   ;;  %s8398_s6 = smov 40  }
0x1495   : > { %4424 = vrot.lane.b32.xlu1 %v8055_v26, %s8394_s8  ;;  %s8397_s8 = smov 48  }
0x14fb   : > { %v4093_v28 = vpop.permute.xlu0 %4092  ;;  %v3927_v29 = vpop.permute.xlu1 %3926 }
0x14fc   : > { %6260 = vmatpush3.xpose.msk.msra.mxu0 %vm2571_vm6, %v3927_v29  ;;  %6270 = vmatpush3.xpose.msk.msra.mxu1 %vm2571_vm6, %v4093_v28  ;;  %v4607_v29 = vld [vmem:[#allocation28 + $0x38] sm:$0xff] }
0x14fd   : > { %6279 = vmatprep.subr.mxu1 %v7352_v40  ;;  %6264 = vmatprep.subr.mxu0 %v7352_v40 }
0x14ff   : > { %6262 = vmatmul.mubr.msk.f32.vlgmr.msra.gmra.mxu0 %vm2571_vm6, %v8055_v26  ;;  %v4091_v30 = vpop.permute.xlu1 %4090  ;;  %v4257_v32 = vpop.permute.xlu0 %4256 }
0x1500   : > { %6272 = vmatmul.mubr.msk.f32.vlgmr.msra.gmra.mxu1 %vm2571_vm6, %v4091_v30  ;;  %6266 = vmatprep.mubr.msk.f32.mxu0 %vm7353_vm5, %v7352_v40 }
0x1501   : > { %6281 = vmatprep.mubr.msk.f32.mxu1 %vm7353_vm5, %v7352_v40 }
0x1503   : > { %v4259_v31 = vpop.permute.xlu1 %4258  ;;  %v4423_v37 = vpop.permute.xlu0 %4422 }
0x1504   : > { %6280 = vmatpush3.xpose.msk.msra.mxu1 %vm2571_vm6, %v4259_v31 }
0x1505   : > { %6289 = vmatprep.subr.mxu1 %v7352_v40 }
0x1507   : > { %6282 = vmatmul.mubr.msk.f32.vlgmr.msra.gmra.mxu1 %vm2571_vm6, %v4257_v32  ;;  %v4425_v33 = vpop.permute.xlu1 %4424 }
0x1508   : > { %6290 = vmatpush3.xpose.msk.msra.mxu1 %vm2571_vm6, %v4425_v33  ;;  %6291 = vmatprep.mubr.msk.f32.mxu1 %vm7353_vm5, %v7352_v40 }
0x1509   : > { %6299 = vmatprep.subr.mxu1 %v7352_v40 }
0x150b   : > { %6292 = vmatmul.mubr.msk.f32.vlgmr.msra.gmra.mxu1 %vm2571_vm6, %v4423_v37  ;;  %v4606_v37 = vld [vmem:[#allocation28 + $0x30] sm:$0xff] }
0x150c   : > { %6307 = vmatprep.mubr.msk.f32.mxu1 %vm7353_vm5, %v7352_v40  ;;  %6300 = vmatpush3.msra.mxu1 %v4607_v29  ;;  %v5815_v29 = vld [vmem:[%s7553_s21 + $0x1] ss:$0 sm:$0xff] }
0x150d   : > { %6301 = vmatprep.subr.mxu1 %v7352_v40 }
0x150e   : > { %6302 = vmatpush3.msra.mxu1 %v4606_v37 }
0x150f   : > { %6303 = vmatprep.subr.mxu1 %v7352_v40 }
0x15bf   : > { %v3998_v34 = vpop.f32.mrf.mxu0 }
0x15c0   : > { %v4002_v35 = vmul.f32 0.35355338, %v3998_v34  ;;  %v4164_v36 = vpop.f32.mrf.mxu1  ;;  %v4605_v34 = vld [vmem:[#allocation28 + $0x28] sm:$0xff] }
0x15c1   : > { %v4168_v38 = vmul.f32 0.35355338, %v4164_v36  ;;  %v6263_v39 = vpop.f32.mrf.mxu0  ;;  %6304 = vmatpush3.msra.mxu1 %v4605_v34  ;;  %v5826_v34 = vld [vmem:[%s8325_s4 + $0x1] ss:$0 sm:$0xff] }
0x15c2   : > { %v6273_v41 = vpop.f32.mrf.mxu1  ;;  %v4003_v42 = vsel %vm2571_vm6, %v4002_v35, -inf  ;;  %6305 = vmatprep.subr.mxu1 %v7352_v40 }
0x15c3   : > { %4004 = vmax.xlane.f32.xlu1 %v4003_v42  ;;  %v4169_v43 = vsel %vm2571_vm6, %v4168_v38, -inf }
0x15c4   : > { %4170 = vmax.xlane.f32.xlu0 %v4169_v43 }
0x15c7   : > { %v4330_v44 = vpop.f32.mrf.mxu1 }
0x15c8   : > { %v4334_v45 = vmul.f32 0.35355338, %v4330_v44 }
0x15c9   : > { %v6283_v46 = vpop.f32.mrf.mxu1 }
0x15ca   : > { %v4335_v47 = vsel %vm2571_vm6, %v4334_v45, -inf }
0x15cb   : > { %4336 = vmax.xlane.f32.xlu0 %v4335_v47  ;;  %v4496_v48 = vpop.f32.mrf.mxu1 }
0x15cc   : > { %v4500_v49 = vmul.f32 0.35355338, %v4496_v48 }
0x15cd   : > { %v6293_v50 = vpop.f32.mrf.mxu1 }
0x15ce   : > { %v4501_v51 = vsel %vm2571_vm6, %v4500_v49, -inf }
0x15cf   : > { %4502 = vmax.xlane.f32.xlu1 %v4501_v51 }
0x15e0   : > { %4180 = vrot.lane.b32.xlu1 %v8055_v26, %s8395_s5  ;;  %s8402_s5 = sld [smem:[#allocation57_spill]] }
0x164c   : > { %v4005_v52 = vpop.xlane.xlu1 %4004 }
0x164d   : > { %v4006_v53 = vsub.f32 %v4002_v35, %v4005_v52  ;;  %v4171_v54 = vpop.xlane.xlu0 %4170  ;;  %v4604_v35 = vld [vmem:[#allocation28 + $0x20] sm:$0xff] }
0x164e   : > { %v4172_v55 = vsub.f32 %v4168_v38, %v4171_v54  ;;  %6306 = vmatpush3.msra.mxu1 %v4604_v35 }
0x164f   : > { %v4007_v56 = vmul.f32 1.442695, %v4006_v53  ;;  %6321 = vmatprep.subr.mxu1 %v7352_v40 }
0x1650   : > { %v4173_v57 = vmul.f32 1.442695, %v4172_v55 }
0x1651   : > { %6696 = vpow2.f32 %v4007_v56 }
0x1652   : > { %6698 = vpow2.f32 %v4173_v57 }
0x1654   : > { %v4337_v4 = vpop.xlane.xlu0 %4336 }
0x1655   : > { %v4338_v5 = vsub.f32 %v4334_v45, %v4337_v4  ;;  %v4723_v4 = vld [vmem:[#allocation29 + $0x20] sm:$0xff] }
0x1657   : > { %v4339_v7 = vmul.f32 1.442695, %v4338_v5  ;;  %v5824_v5 = vld [vmem:[%s7558_s9 + $0x78] sm:$0xff] }
0x1658   : > { %v4503_v58 = vpop.xlane.xlu1 %4502 }
0x1659   : > { %v4504_v59 = vsub.f32 %v4500_v49, %v4503_v58  ;;  %v5809_v49 = vld [vmem:[%s8384_s2 + $0x1] ss:$0 sm:$0xff]  ;;  %s5852_s2 = sshll.u32 %s7591_s22, 8  ;;  %s7368_s22 = smov [#allocation31]  }
0x165b   : > { %v4505_v60 = vmul.f32 1.442695, %v4504_v59 }
0x165c   : > { %v4181_v13 = vpop.permute.xlu1 %4180 }
0x165d   : > { %6700 = vpow2.f32 %v4505_v60 }
0x165e   : > { %v6697_v61 = vpop.eup %6696  ;;  %6702 = vpow2.f32 %v4339_v7  ;;  %v5823_v7 = vld [vmem:[%s7558_s9 + $0x70] sm:$0xff] }
0x165f   : > { %v6699_v62 = vpop.eup %6698  ;;  %v4009_v63 = vsel %vm2571_vm6, %v6697_v61, 0.0 }
0x1660   : > { %4010 = vadd.xlane.f32.xlu0 %v4009_v63  ;;  %v4175_v1 = vsel %vm2571_vm6, %v6699_v62, 0.0 }
0x1661   : > { %4176 = vadd.xlane.f32.xlu1 %v4175_v1 }
0x166a   : > { %v6701_v2 = vpop.eup %6700 }
0x166b   : > { %v4507_v3 = vsel %vm2571_vm6, %v6701_v2, 0.0  ;;  %v6703_v11 = vpop.eup %6702 }
0x166c   : > { %4508 = vadd.xlane.f32.xlu1 %v4507_v3  ;;  %v4341_v12 = vsel %vm2571_vm6, %v6703_v11, 0.0  ;;  %v4725_v3 = vld [vmem:[#allocation29 + $0x30] sm:$0xff] }
0x1676   : > { %4014 = vrot.lane.b32.xlu0 %v8055_v26, %s8396_s3  ;;  %s8403_s3 = sld [smem:[#allocation58_spill]] }
0x167d   : > { %4346 = vrot.lane.b32.xlu1 %v8055_v26, %s8397_s8  ;;  %s8404_s8 = sld [smem:[#allocation60_spill]] }
0x1695   : > { %4342 = vadd.xlane.f32.xlu0 %v4341_v12  ;;  %v5821_v12 = vld [vmem:[%s7558_s9 + $0x60] sm:$0xff] }
0x16ab   : > { %4512 = vrot.lane.b32.xlu0 %v8055_v26, %s8398_s6  ;;  %s1406_s6 = sand.u32 1, %s7282_s16  }
0x16ac   : > { %s8208_s4 = scalar_lea.sflag [#allocation4], %s1406_s6 }
0x16e9   : > { %v4011_v14 = vpop.xlane.xlu0 %4010 }
0x16ea   : > { %6704 = vrcp.f32 %v4011_v14  ;;  %v4177_v15 = vpop.xlane.xlu1 %4176 }
0x16eb   : > { %6706 = vrcp.f32 %v4177_v15 }
0x16ed   : > { %v4015_v16 = vpop.permute.xlu0 %4014 }
0x16ee   : > { %6265 = vmatpush3.msra.mxu0 %v4015_v16 }
0x16ef   : > { %6274 = vmatprep.subr.mxu0 %v7352_v40 }
0x16f5   : > { %v4509_v18 = vpop.xlane.xlu1 %4508 }
0x16f7   : > { %v6705_v17 = vpop.eup %6704 }
0x16f8   : > { %v4013_v19 = vmul.f32 %v6705_v17, %v6697_v61  ;;  %v6707_v20 = vpop.eup %6706 }
0x16f9   : > { %v4179_v21 = vmul.f32 %v6707_v20, %v6699_v62  ;;  %v4347_v22 = vpop.permute.xlu1 %4346 }
0x16fa   : > { %6267 = vmatmul.mubr.msk.f32.vlgmr.msra.gmra.mxu0 %vm2571_vm6, %v4013_v19  ;;  %v5812_v19 = vld [vmem:[%s8386_s1 + $0x1] ss:$0 sm:$0xff] }
0x16fb   : > { %6275 = vmatpush3.msra.mxu0 %v4181_v13  ;;  %6276 = vmatprep.mubr.msk.f32.mxu0 %vm7353_vm5, %v7352_v40  ;;  %v5820_v13 = vld [vmem:[%s7558_s9 + $0x58] sm:$0xff] }
0x16fc   : > { %6284 = vmatprep.subr.mxu0 %v7352_v40 }
0x16fe   : > { %6277 = vmatmul.mubr.msk.f32.vlgmr.msra.gmra.mxu0 %vm2571_vm6, %v4179_v21  ;;  %v5813_v21 = vld [vmem:[%s8388_s17 + $0x1] ss:$0 sm:$0xff] }
0x16ff   : > { %6285 = vmatpush3.msra.mxu0 %v4347_v22  ;;  %6286 = vmatprep.mubr.msk.f32.mxu0 %vm7353_vm5, %v7352_v40 }
0x1700   : > { %6294 = vmatprep.subr.mxu0 %v7352_v40 }
0x171e   : > { %v4343_v23 = vpop.xlane.xlu0 %4342 }
0x171f   : > { %6708 = vrcp.f32 %v4343_v23 }
0x1720   : > { %6710 = vrcp.f32 %v4509_v18 }
0x1722   : > { %v4513_v27 = vpop.permute.xlu0 %4512 }
0x172c   : > { %v6709_v24 = vpop.eup %6708 }
0x172d   : > { %v4345_v25 = vmul.f32 %v6709_v24, %v6703_v11  ;;  %v6711_v26 = vpop.eup %6710  ;;  %v5822_v11 = vld [vmem:[%s7558_s9 + $0x68] sm:$0xff] }
0x172e   : > { %v4511_v28 = vmul.f32 %v6711_v26, %v6701_v2  ;;  %v4726_v2 = vld [vmem:[#allocation29 + $0x38] sm:$0xff]  ;;  %v5819_v26 = vld [vmem:[%s7558_s9 + $0x50] sm:$0xff] }
0x172f   : > { %6287 = vmatmul.mubr.msk.f32.vlgmr.msra.gmra.mxu0 %vm2571_vm6, %v4345_v25 }
0x1730   : > { %6295 = vmatpush3.msra.mxu0 %v4513_v27  ;;  %6296 = vmatprep.mubr.msk.f32.mxu0 %vm7353_vm5, %v7352_v40  ;;  %v5818_v27 = vld [vmem:[%s7558_s9 + $0x48] sm:$0xff] }
0x1731   : > { %6310 = vmatprep.subr.mxu0 %v7352_v40 }
0x1733   : > { %6297 = vmatmul.mubr.msk.f32.vlgmr.msra.gmra.mxu0 %vm2571_vm6, %v4511_v28  ;;  %v5817_v28 = vld [vmem:[%s7558_s9 + $0x40] sm:$0xff] }
0x1734   : > { %6318 = vmatprep.mubr.msk.f32.mxu0 %vm7353_vm5, %v7352_v40  ;;  %6311 = vmatpush3.msra.mxu0 %v4726_v2 }
0x1735   : > { %6312 = vmatprep.subr.mxu0 %v7352_v40 }
0x1736   : > { %6313 = vmatpush3.msra.mxu0 %v4725_v3 }
0x1737   : > { %6314 = vmatprep.subr.mxu0 %v7352_v40 }
0x17ba   : > { %v4086_v30 = vpop.f32.mrf.mxu0 }
0x17bc   : > { %v6268_v31 = vpop.f32.mrf.mxu0 }
0x17be   : > { %v4252_v32 = vpop.f32.mrf.mxu0 }
0x17bf   : > { %4589 = vrot.lane.b32.xlu1 %v4252_v32, %s8399_s10 }
0x17c0   : > { %v6278_v33 = vpop.f32.mrf.mxu0 }
0x17ef   : > { %v4418_v36 = vpop.f32.mrf.mxu0 }
0x17f0   : > { %4593 = vrot.lane.b32.xlu0 %v4418_v36, %s8400_s18  ;;  %s5703_s18 = sshll.u32 %s1406_s6, 4 }
0x17f1   : > { %v6288_v38 = vpop.f32.mrf.mxu0 }
0x17f3   : > { %v4584_v39 = vpop.f32.mrf.mxu0 }
0x17f4   : > { %4597 = vrot.lane.b32.xlu1 %v4584_v39, %s8401_s15  ;;  %s1408_s15 = scalar_lea.vmem [#allocation31], %s5703_s18 }
0x17f5   : > { %v6298_v41 = vpop.f32.mrf.mxu0  ;;  %s5377_s1 = sshll.u32 %s1408_s15, 4  ;;  %s8203_s1 = int_to_ptr.vmem [resolvable:$true] %s5377_s1 }
0x1831   : > { %v4590_v42 = vpop.permute.xlu1 %4589 }
0x1832   : > { %v4600_v44 = vsel %vm2571_vm6, %v4086_v30, %v4590_v42  ;;  %v4984_v42 = vld [vmem:[#allocation23 + $0x18] sm:$0xff] }
0x1862   : > { %v4594_v43 = vpop.permute.xlu0 %4593 }
0x1863   : > { %v4601_v45 = vsel %vm2651_vm7, %v4600_v44, %v4594_v43  ;;  %v4983_v43 = vld [vmem:[#allocation23 + $0x10] sm:$0xff]  ;;  %v4982_v44 = vld [vmem:[#allocation23 + $0x8] sm:$0xff] }
0x1866   : > { %v4598_v46 = vpop.permute.xlu1 %4597 }
0x1867   : > { %v4602_v47 = vsel %vm3516_vm8, %v4601_v45, %v4598_v46  ;;  %v4981_v45 = vld [vmem:[#allocation23] sm:$0xff] }
0x1868   : > { %6308 = vmatmul.mubr.msk.f32.vlgmr.msra.gmra.mxu1 %vm1531_vm2, %v4602_v47 }
0x1869   : > { %6337 = vmatprep.mubr.msk.f32.mxu1 %vm7353_vm5, %v7352_v40  ;;  %6322 = vmatpush3.msra.mxu1 %v5824_v5  ;;  %v5271_v5 = vld [vmem:[#allocation26 + $0x10] sm:$0xff] }
0x186a   : > { %6323 = vmatprep.subr.mxu1 %v7352_v40 }
0x186b   : > { %6324 = vmatpush3.msra.mxu1 %v5823_v7  ;;  %v5270_v7 = vld [vmem:[#allocation26 + $0x8] sm:$0xff] }
0x186c   : > { %6325 = vmatprep.subr.mxu1 %v7352_v40 }
0x186d   : > { %6326 = vmatpush3.msra.mxu1 %v5822_v11  ;;  %v5269_v11 = vld [vmem:[#allocation26] sm:$0xff] }
0x186e   : > { %6327 = vmatprep.subr.mxu1 %v7352_v40 }
0x186f   : > { %6328 = vmatpush3.msra.mxu1 %v5821_v12  ;;  %v5841_v12 = vld [vmem:[%s8403_s3 + $0x1] ss:$0 sm:$0xff] }
0x1870   : > { %6329 = vmatprep.subr.mxu1 %v7352_v40 }
0x1871   : > { %6330 = vmatpush3.msra.mxu1 %v5820_v13 }
0x1872   : > { %6331 = vmatprep.subr.mxu1 %v7352_v40 }
0x1873   : > { %6332 = vmatpush3.msra.mxu1 %v5819_v26 }
0x1874   : > { %6333 = vmatprep.subr.mxu1 %v7352_v40 }
0x1875   : > { %6334 = vmatpush3.msra.mxu1 %v5818_v27 }
0x1876   : > { %6335 = vmatprep.subr.mxu1 %v7352_v40 }
0x1877   : > { %6336 = vmatpush3.msra.mxu1 %v5817_v28 }
0x1928   : > { %v4677_v48 = vpop.f32.mrf.mxu1 }
0x1929   : > { %v4681_v50 = vadd.f32 %v4677_v48, %v8035_v0  ;;  %v5078_v48 = vld [vmem:[%s8402_s5 + $0x18] sm:$0xff] }
0x192a   : > { %v6309_v51 = vpop.f32.mrf.mxu1 }
0x192b   : > { %v8139_v52 = vadd.f32 %v5809_v49, %v4681_v50  ;;  %v5077_v49 = vld [vmem:[%s8402_s5 + $0x10] sm:$0xff]  ;;  %v5076_v50 = vld [vmem:[%s8402_s5 + $0x8] sm:$0xff]  ;;  %v5075_v51 = vld [vmem:[%s8402_s5] sm:$0xff] }
0x192d   : > { %v4695_v53 = vsel %vm1531_vm2, %v8139_v52, 0.0 }
0x192e   : > { %4696 = vadd.xlane.f32.xlu0 %v4695_v53 }
0x1932   : > { %2631 = vmax.xlane.f32.xlu0 %v7883_v10 }
0x1936   : > { %2633 = vmax.xlane.f32.xlu0 %v7879_v9 }
0x19b7   : > { %v4697_v54 = vpop.xlane.xlu0 %4696 }
0x19b8   : > { %v4698_v55 = vmul.f32 0.03125, %v4697_v54 }
0x19ba   : > { %v4699_v56 = vsub.f32 %v8139_v52, %v4698_v55 }
0x19bb   : > { %v2632_v57 = vpop.xlane.xlu0 %2631 }
0x19bc   : > { %v2635_v58 = vsub.f32 %v7875_v8, %v2632_v57  ;;  %v4700_v59 = vmul.f32 %v4699_v56, %v4699_v56 }
0x19be   : > { %v2637_v0 = vmul.f32 1.442695, %v2635_v58  ;;  %v4701_v60 = vsel %vm1531_vm2, %v4700_v59, 0.0  ;;  %v5839_v59 = vld [vmem:[%s8402_s5 + $0x38] sm:$0xff] }
0x19bf   : > { %4702 = vadd.xlane.f32.xlu1 %v4701_v60  ;;  %v2634_v61 = vpop.xlane.xlu0 %2633  ;;  %6367 = vmatprep.subr.mxu1 %v5839_v59  ;;  %v5837_v60 = vld [vmem:[%s8402_s5 + $0x28] sm:$0xff] }
0x19c0   : > { %6712 = vpow2.f32 %v2637_v0  ;;  %v2636_v62 = vsub.f32 %v7873_v6, %v2634_v61  ;;  %v4724_v6 = vld [vmem:[#allocation29 + $0x28] sm:$0xff]  ;;  %v5838_v0 = vld [vmem:[%s8402_s5 + $0x30] sm:$0xff]  ;;  %v5836_v61 = vld [vmem:[%s8402_s5 + $0x20] sm:$0xff]  ;;  %s7190_s5 = scalar_lea.vmem %s8203_s1, 256 }
0x19c1   : > { %6315 = vmatpush3.msra.mxu0 %v4724_v6  ;;  %p7191_p9 = scmp.ne.s32.totalorder %s8203_s1, %s7190_s5 }
0x19c2   : > { %v2639_v63 = vmul.f32 1.442695, %v2636_v62  ;;  %6316 = vmatprep.subr.mxu0 %v7352_v40  ;;  %v5833_v62 = vld [vmem:[%s8403_s3] ss:$0 sm:$0xff]  ;;  %s8206_s3 = scalar_lea.hbm %s7568_s19, %s5852_s2 }
0x19c3   : > { %6317 = vmatpush3.msra.mxu0 %v4723_v4  ;;  %v5272_v4 = vld [vmem:[#allocation26 + $0x18] sm:$0xff]  ;;  %p7192_p4 = pnand %p7191_p9, %p8405_p2 }
0x19c4   : > { %6714 = vpow2.f32 %v2639_v63 }
0x19c5   : > { %p7193_p6 = pneg %p7192_p4 }
0x19cd   : > { %v6713_v10 = vpop.eup %6712 }
0x19ce   : > { %v2641_v9 = vsel %vm2571_vm6, %v6713_v10, 0.0 }
0x19cf   : > { %2642 = vadd.xlane.f32.xlu1 %v2641_v9 }
0x19d1   : > { %v8150_v1 = vpop.eup %6714 }
0x19d2   : > { %v2644_v8 = vsel %vm2571_vm6, %v8150_v1, 0.0 }
0x19d3   : > { %2645 = vadd.xlane.f32.xlu0 %v2644_v8 }
0x1a48   : > { %v4703_v14 = vpop.xlane.xlu1 %4702 }
0x1a49   : > { %v4704_v15 = vmul.f32 0.03125, %v4703_v14 }
0x1a4b   : > { %v4705_v16 = vadd.f32 1e-05, %v4704_v15 }
0x1a4d   : > { %6716 = vrsqrt.f32 %v4705_v16 }
0x1a58   : > { %v2643_v17 = vpop.xlane.xlu1 %2642 }
0x1a59   : > { %6718 = vrcp.f32 %v2643_v17 }
0x1a5a   : > { %v6717_v18 = vpop.eup %6716 }
0x1a5b   : > { %v4707_v20 = vmul.f32 %v6717_v18, %v4699_v56 }
0x1a5c   : > { %v2646_v37 = vpop.xlane.xlu0 %2645 }
0x1a5d   : > { %v4714_v22 = vmul.f32 %v5812_v19, %v4707_v20  ;;  %6720 = vrcp.f32 %v2646_v37 }
0x1a5f   : > { %v4721_v23 = vadd.f32 %v5813_v21, %v4714_v22  ;;  %v5844_v21 = vld [vmem:[%s8404_s8] ss:$0 sm:$0xff]  ;;  %s7194_s8 = sshll.u32 %s7368_s22, 4  ;;  %s7195_s8 = int_to_ptr.vmem [resolvable:$false] %s7194_s8 }
0x1a60   : > { %s7196_s18 = scalar_lea.vmem %s7195_s8, 512  ;;  %p7197_p5 = scmp.lt.s32.totalorder %s8203_s1, %s7195_s8 }
0x1a61   : > { %6319 = vmatmul.mubr.msk.f32.vlgmr.msra.gmra.mxu0 %vm1531_vm2, %v4721_v23  ;;  %p7198_p10 = scmp.lt.s32.totalorder %s7196_s18, %s7190_s5 }
0x1a63   : > { %p7199_p7 = por %p7198_p10, %p7197_p5 }
0x1a65   : > { %p7200_p8 = pnand %p7199_p7, %p7193_p6 }
0x1a66   : > { %v6719_v24 = vpop.eup %6718 }
0x1a67   : > { %v2648_v25 = vmul.f32 %v6719_v24, %v6713_v10 }
0x1a69   : > { %6342 = vmatprep.mubr.msk.f32.mxu0 %vm2571_vm6, %v2648_v25 }
0x1a6a   : > { %v6721_v38 = vpop.eup %6720 }
0x1a6b   : > { %v2650_v40 = vmul.f32 %v6721_v38, %v8150_v1 }
0x1b21   : > { %v4804_v30 = vpop.f32.mrf.mxu0 }
0x1b22   : > { %v4805_v31 = vadd.f32 %v5815_v29, %v4804_v30 }
0x1b23   : > { %v6320_v32 = vpop.f32.mrf.mxu0 }
0x1b24   : > { %v4808_v33 = vmax.f32 %v4805_v31, 0.0 }
0x1b26   : > { %6338 = vmatmul.mubr.msk.f32.vlgmr.msra.gmra.mxu1 %vm3733_vm9, %v4808_v33 }
0x1b27   : > { %6368 = vmatpush3.msra.mxu1 %v5839_v59 }
0x1b28   : > { %6369 = vmatprep.subr.mxu1 %v5838_v0 }
0x1b29   : > { %6370 = vmatpush3.msra.mxu1 %v5838_v0 }
0x1b2a   : > { %6371 = vmatprep.subr.mxu1 %v5837_v60 }
0x1b2b   : > { %6372 = vmatpush3.msra.mxu1 %v5837_v60 }
0x1b2c   : > { %6373 = vmatprep.subr.mxu1 %v5836_v61 }
0x1b2d   : > { %6374 = vmatpush3.msra.mxu1 %v5836_v61 }
0x1be6   : > { %v4895_v35 = vpop.f32.mrf.mxu1 }
0x1be7   : > { %v4896_v36 = vadd.f32 %v5826_v34, %v4895_v35 }
0x1be8   : > { %v6339_v39 = vpop.f32.mrf.mxu1 }
0x1be9   : > { %v4899_v41 = vadd.f32 %v4896_v36, %v8139_v52  ;;  %v5830_v52 = vld [vmem:[#allocation25] ss:$0 sm:$0xff] }
0x1beb   : > { %6340 = vmatprep.subr.mxu0 %v4899_v41 }
0x1bec   : > { %6341 = vmatpush3.msra.mxu0 %v4899_v41 }
0x1bed   : > { %6343 = vmatmul.mubr.msk.f32.vlgmr.msra.gmra.mxu0 %vm2571_vm6, %v2650_v40  ;;  %6345 = vmatprep.subr.mxu0 %v4984_v42 }
0x1bee   : > { %6346 = vmatpush3.msra.mxu0 %v4984_v42 }
0x1bef   : > { %6347 = vmatprep.subr.mxu0 %v4983_v43 }
0x1bf0   : > { %6348 = vmatpush3.msra.mxu0 %v4983_v43 }
0x1bf1   : > { %6349 = vmatprep.subr.mxu0 %v4982_v44 }
0x1bf2   : > { %6350 = vmatpush3.msra.mxu0 %v4982_v44 }
0x1bf3   : > { %6351 = vmatprep.subr.mxu0 %v4981_v45 }
0x1bf4   : > { %6352 = vmatpush3.msra.mxu0 %v4981_v45 }
0x1bf5   : > { %6356 = vmatprep.subr.mxu0 %v5078_v48 }
0x1cad   : > { %v6344_v46 = vpop.f32.mrf.mxu0 }
0x1caf   : > { %v4972_v47 = vpop.f32.mrf.mxu0 }
0x1cb0   : > { %6353 = vmatprep.mubr.msk.f32.mxu0 %vm1531_vm2, %v4972_v47 }
0x1cb1   : > { %6354 = vmatmul.mubr.msk.f32.vlgmr.msra.gmra.mxu0 %vm1531_vm2, %v6344_v46 }
0x1cb2   : > { %6357 = vmatpush3.msra.mxu0 %v5078_v48 }
0x1cb3   : > { %6358 = vmatprep.subr.mxu0 %v5077_v49 }
0x1cb4   : > { %6359 = vmatpush3.msra.mxu0 %v5077_v49 }
0x1cb5   : > { %6360 = vmatprep.subr.mxu0 %v5076_v50 }
0x1cb6   : > { %6361 = vmatpush3.msra.mxu0 %v5076_v50 }
0x1cb7   : > { %6362 = vmatprep.subr.mxu0 %v5075_v51 }
0x1cb8   : > { %6363 = vmatpush3.msra.mxu0 %v5075_v51 }
0x1cb9   : > { %6378 = vmatprep.subr.mxu0 %v5272_v4 }
0x1d71   : > { %v6355_v53 = vpop.f32.mrf.mxu0 }
0x1d72   : > { %v5070_v54 = vadd.f32 %v6355_v53, %v5830_v52 }
0x1d73   : > { %v5064_v55 = vpop.f32.mrf.mxu0 }
0x1d74   : > { %v5065_v56 = vadd.f32 %v5830_v52, %v5064_v55  ;;  %v5074_v58 = vmax.f32 %v5070_v54, 0.0 }
0x1d76   : > { %v5073_v57 = vmax.f32 %v5065_v56, 0.0 }
0x1d78   : > { %6364 = vmatprep.mubr.msk.f32.mxu0 %vm1531_vm2, %v5073_v57 }
0x1d79   : > { %6365 = vmatmul.mubr.msk.f32.vlgmr.msra.gmra.mxu0 %vm1531_vm2, %v5074_v58 }
0x1d7a   : > { %6379 = vmatpush3.msra.mxu0 %v5272_v4 }
0x1d7b   : > { %6380 = vmatprep.subr.mxu0 %v5271_v5 }
0x1d7c   : > { %6381 = vmatpush3.msra.mxu0 %v5271_v5 }
0x1d7d   : > { %6382 = vmatprep.subr.mxu0 %v5270_v7 }
0x1d7e   : > { %6383 = vmatpush3.msra.mxu0 %v5270_v7 }
0x1d7f   : > { %6384 = vmatprep.subr.mxu0 %v5269_v11 }
0x1d80   : > { %6385 = vmatpush3.msra.mxu0 %v5269_v11 }
0x1e39   : > { %v6366_v63 = vpop.f32.mrf.mxu0 }
0x1e3a   : > { %v5164_v10 = vadd.f32 %v6366_v63, %v5833_v62 }
0x1e3b   : > { %v5158_v9 = vpop.f32.mrf.mxu0 }
0x1e3c   : > { %v5159_v1 = vadd.f32 %v5833_v62, %v5158_v9  ;;  %v5168_v8 = vmax.f32 %v5164_v10, 0.0 }
0x1e3e   : > { %v5167_v2 = vmax.f32 %v5159_v1, 0.0  ;;  %v5170_v6 = vadd.f32 %v5168_v8, %v5074_v58 }
0x1e40   : > { %v5169_v3 = vadd.f32 %v5167_v2, %v5073_v57 }
0x1e42   : > { %6375 = vmatprep.mubr.msk.f32.mxu1 %vm1531_vm2, %v5169_v3 }
0x1e43   : > { %6376 = vmatmul.mubr.msk.f32.vlgmr.msra.gmra.mxu1 %vm1531_vm2, %v5170_v6 }
0x1f03   : > { %v6377_v13 = vpop.f32.mrf.mxu1 }
0x1f04   : > { %v5262_v14 = vadd.f32 %v6377_v13, %v5841_v12 }
0x1f05   : > { %v5256_v15 = vpop.f32.mrf.mxu1 }
0x1f06   : > { %v5257_v16 = vadd.f32 %v5841_v12, %v5256_v15  ;;  %v5266_v17 = vmax.f32 %v5262_v14, 0.0 }
0x1f08   : > { %v5265_v18 = vmax.f32 %v5257_v16, 0.0  ;;  %v5268_v20 = vadd.f32 %v5266_v17, %v5170_v6 }
0x1f0a   : > { %v5267_v19 = vadd.f32 %v5265_v18, %v5169_v3 }
0x1f0c   : > { %6386 = vmatprep.mubr.msk.f32.mxu0 %vm1531_vm2, %v5267_v19 }
0x1f0d   : > { %6387 = vmatmul.mubr.msk.f32.vlgmr.msra.gmra.mxu0 %vm1531_vm2, %v5268_v20 }
0x1fcd   : > { %v6388_v22 = vpop.f32.mrf.mxu0 }
0x1fce   : > { %v5358_v23 = vadd.f32 %v6388_v22, %v5844_v21 }
0x1fcf   : > { %v5352_v24 = vpop.f32.mrf.mxu0 }
0x1fd0   : > { %5362 = vst [vmem:[%s1408_s15 + $0x8] sm:$0xff] %v5358_v23  ;;  %v5353_v25 = vadd.f32 %v5844_v21, %v5352_v24 }
0x1fd2   : > { %5361 = vst [vmem:[%s1408_s15] sm:$0xff] %v5353_v25 }
0x1fd3   : > { %7203 = shalt.err (!%p7200_p8)
}
0x1fd4   : > { %s7204_s2 = scalar_lea.hbm %s8206_s3, 256  ;;  %s7208_s6 = scalar_lea.hbm %s7568_s19, 512 }
0x1fd5   : > { %p7205_p13 = scmp.ne.s32.totalorder %s8206_s3, %s7204_s2  ;;  %p7209_p1 = scmp.lt.s32.totalorder %s8206_s3, %s7568_s19 }
0x1fd6   : > { %p7210_p12 = scmp.lt.s32.totalorder %s7208_s6, %s7204_s2 }
0x1fd7   : > { %p7206_p11 = pnand %p7205_p13, %p8405_p2 }
0x1fd8   : > { %p7211_p3 = por %p7210_p12, %p7209_p1 }
0x1fd9   : > { %p7207_p0 = pneg %p7206_p11 }
0x1fdb   : > { %p7212_p9 = pnand %p7211_p3, %p7207_p0 }
0x1fdd   : > { %7215 = shalt.err (!%p7212_p9)
}
0x1fde   : > { %s7369_s5 = smov 128  }
0x1fdf   : > { %6461 = dma.vmem_to_hbm [thread:$0]  (%p8405_p2), %s8203_s1, 256, %s8206_s3, %s8208_s4, %s7369_s5, %s7369_s5, %s8399_s10  }
0x1fe0 PF: > { %s8406_s15 = sld [smem:[#allocation71_spill]]  ;;  %p6558_p4 = scmp.ge.s32.totalorder %s7290_s0, 2 }
0x1fe1   : > { %s8407_s22 = sld [smem:[#allocation75_spill]] }
0x1fe6   : > { %s5392_s8 = sand.u32 1, %s8406_s15  }
0x1fe7   : > { %p8408_p6 = scmp.ne.s32.totalorder %s8407_s22, 0  ;;  %s5393_s18 = scalar_lea.sflag [#allocation4], %s5392_s8 }
0x1fe9   : > { %p6519_p5 = pnand %p6558_p4, %p8408_p6 }
0x1feb   : > { %p6520_p10 = pneg %p6519_p5 }
0x1fed   : > { %7273 = dma.done.wait (%p6520_p10), %s5393_s18, 256  }
0x1fee   : > { %7275 = vsyncadd (%p6520_p10), %s5393_s18, 4294967040  ;;  %s8409_s0 = sld [smem:[#allocation73_spill]]  ;;  %s8412_s15 = smov %s7282_s16 }
0x1fef   : > { %s8410_s7 = sld [smem:[#allocation72_spill]] }
0x1ff0   : > { %s8411_s18 = sld [smem:[#allocation74_spill]] }
0x1ff4   : > { %p97_p7 = scmp.ge.s32.totalorder %s8409_s0, 4  }
0x1ff5   : > { %s8413_s16 = smov %s8410_s7 }
0x1ff6   :  { %99 = sbr.rel (!%p97_p7) target bundleno = 85 (0x55), region = 341 }
0x1ffb   :  { %5398 = vsyncpa [#allocation3], 1 }
0x1ffc   :  { %5400 = vsyncpa [#allocation3 + $0x1], 1 }
0x1ffd   :  { %5401 = vsyncpa [#allocation6], 1 }
0x1ffe   :  { %5402 = vsyncpa [#allocation9], 1 }
0x1fff   :  { %5403 = vsyncpa [#allocation12], 1 }
0x2000   :  { %5404 = vsyncpa [#allocation15], 1 }
0x2001   :  { %5405 = vsyncpa [#allocation18], 1 }
0x2002   :  { %5406 = vsyncpa [#allocation21], 1 }
0x2003   :  { %5407 = vsyncpa [#allocation24], 1 }
0x2004   :  { %5408 = vsyncpa [#allocation27], 1 }
0x2005   :  { %5409 = vsyncpa [#allocation30], 1 }
0x2006   :  { %5410 = vsyncpa [#allocation4], 1 }
0x2007   :  { %5412 = vsyncpa [#allocation4 + $0x1], 1 }

</bundles_post_ra>
